<compile_context>
chip_gen: v6e
topology: v6e:2x2x1
jax: 0.10.0
libtpu: 0.0.40
codegen_flags: <defaults>
</compile_context>

<pallas_src>
import functools
import math

import jax
import jax.numpy as jnp
from jax.experimental import pallas as pl
from jax.experimental.pallas import tpu as pltpu

NEG_INF = -1e9  # additive mask value (== softmax weight ~0, like torch's -inf)
LN_EPS = 1e-5


# ------------------------------ tiling helper --------------------------------

def _pick_tile(dim, target, align):
    """Largest multiple of `align` that divides `dim` and is <= target, else dim."""
    if dim <= target:
        return dim
    t = (target // align) * align
    while t >= align:
        if dim % t == 0:
            return t
        t -= align
    return dim


# ------------------------------ Pallas kernels -------------------------------

def _matmul_kernel(x_ref, w_ref, b_ref, o_ref, acc_ref, *, relu):
    @pl.when(pl.program_id(2) == 0)
    def _():
        acc_ref[...] = jnp.zeros_like(acc_ref)

    acc_ref[...] += jnp.dot(x_ref[...].astype(jnp.bfloat16), w_ref[...],
                            preferred_element_type=jnp.float32)

    @pl.when(pl.program_id(2) == pl.num_programs(2) - 1)
    def _():
        y = acc_ref[...] + b_ref[...]
        if relu:
            y = jnp.maximum(y, 0.0)
        o_ref[...] = y


def pallas_matmul(x, w, b, relu=False, tm=256, tn=256, tk=256):
    """y = [relu](x @ w + b); x:(M,K) f32, w:(K,N) bf16, b:(1,N) f32 -> (M,N) f32."""
    M, K = x.shape
    N = w.shape[1]
    tm = _pick_tile(M, tm, 8)
    tn = _pick_tile(N, tn, 128)
    tk = _pick_tile(K, tk, 128)
    grid = (M // tm, N // tn, K // tk)
    return pl.pallas_call(
        functools.partial(_matmul_kernel, relu=relu),
        grid=grid,
        out_shape=jax.ShapeDtypeStruct((M, N), jnp.float32),
        in_specs=[pl.BlockSpec((tm, tk), lambda i, j, k: (i, k)),
                  pl.BlockSpec((tk, tn), lambda i, j, k: (k, j)),
                  pl.BlockSpec((1, tn), lambda i, j, k: (0, j))],
        out_specs=pl.BlockSpec((tm, tn), lambda i, j, k: (i, j)),
        scratch_shapes=[pltpu.VMEM((tm, tn), jnp.float32)],
        compiler_params=pltpu.CompilerParams(
            dimension_semantics=("parallel", "parallel", "arbitrary")),
    )(x, w, b)


def _layernorm(z, g, b):
    mu = jnp.mean(z, axis=-1, keepdims=True)
    var = jnp.mean((z - mu) ** 2, axis=-1, keepdims=True)
    return (z - mu) * jax.lax.rsqrt(var + LN_EPS) * g + b


def _proj_add_ln_kernel(a_ref, w_ref, b_ref, r_ref, g_ref, bl_ref, o_ref):
    # LayerNorm(residual + (a @ w + b))
    o = jnp.dot(a_ref[...].astype(jnp.bfloat16), w_ref[...],
                preferred_element_type=jnp.float32) + b_ref[...]
    o_ref[...] = _layernorm(r_ref[...] + o, g_ref[...], bl_ref[...])


def pallas_proj_add_ln(a, w, b, residual, g, bl, tm=256):
    M, D = a.shape
    tm = _pick_tile(M, tm, 8)
    return pl.pallas_call(
        _proj_add_ln_kernel,
        grid=(M // tm,),
        out_shape=jax.ShapeDtypeStruct((M, D), jnp.float32),
        in_specs=[pl.BlockSpec((tm, D), lambda i: (i, 0)),
                  pl.BlockSpec((D, D), lambda i: (0, 0)),
                  pl.BlockSpec((1, D), lambda i: (0, 0)),
                  pl.BlockSpec((tm, D), lambda i: (i, 0)),
                  pl.BlockSpec((1, D), lambda i: (0, 0)),
                  pl.BlockSpec((1, D), lambda i: (0, 0))],
        out_specs=pl.BlockSpec((tm, D), lambda i: (i, 0)),
        compiler_params=pltpu.CompilerParams(dimension_semantics=("parallel",)),
    )(a, w, b, residual, g, bl)


def _ffn_add_ln_kernel(x_ref, w1_ref, b1_ref, w2_ref, b2_ref, g_ref, bl_ref, o_ref):
    # LayerNorm(x + (relu(x@w1+b1) @ w2 + b2)); the (tm, FF) hidden stays in VMEM.
    x = x_ref[...]
    h = jnp.dot(x.astype(jnp.bfloat16), w1_ref[...],
                preferred_element_type=jnp.float32) + b1_ref[...]
    h = jnp.maximum(h, 0.0)
    y = jnp.dot(h.astype(jnp.bfloat16), w2_ref[...],
                preferred_element_type=jnp.float32) + b2_ref[...]
    o_ref[...] = _layernorm(x + y, g_ref[...], bl_ref[...])


def pallas_ffn_add_ln(x, w1, b1, w2, b2, g, bl, tm=256):
    # Weights kept fully resident per block (fine for d_model=512, ff=1024 even on
    # v7x's 64 MiB VMEM); for much larger FF the hidden axis would need tiling too.
    M, D = x.shape
    FF = w1.shape[1]
    tm = _pick_tile(M, tm, 8)
    return pl.pallas_call(
        _ffn_add_ln_kernel,
        grid=(M // tm,),
        out_shape=jax.ShapeDtypeStruct((M, D), jnp.float32),
        in_specs=[pl.BlockSpec((tm, D), lambda i: (i, 0)),
                  pl.BlockSpec((D, FF), lambda i: (0, 0)),
                  pl.BlockSpec((1, FF), lambda i: (0, 0)),
                  pl.BlockSpec((FF, D), lambda i: (0, 0)),
                  pl.BlockSpec((1, D), lambda i: (0, 0)),
                  pl.BlockSpec((1, D), lambda i: (0, 0)),
                  pl.BlockSpec((1, D), lambda i: (0, 0))],
        out_specs=pl.BlockSpec((tm, D), lambda i: (i, 0)),
        compiler_params=pltpu.CompilerParams(dimension_semantics=("parallel",)),
    )(x, w1, b1, w2, b2, g, bl)


def _ln_kernel(x_ref, g_ref, b_ref, o_ref):
    o_ref[...] = _layernorm(x_ref[...], g_ref[...], b_ref[...])


def pallas_layernorm(x, g, b, tm=256):
    M, D = x.shape
    tm = _pick_tile(M, tm, 8)
    return pl.pallas_call(
        _ln_kernel,
        grid=(M // tm,),
        out_shape=jax.ShapeDtypeStruct((M, D), jnp.float32),
        in_specs=[pl.BlockSpec((tm, D), lambda i: (i, 0)),
                  pl.BlockSpec((1, D), lambda i: (0, 0)),
                  pl.BlockSpec((1, D), lambda i: (0, 0))],
        out_specs=pl.BlockSpec((tm, D), lambda i: (i, 0)),
        compiler_params=pltpu.CompilerParams(dimension_semantics=("parallel",)),
    )(x, g, b)


# ------------------------------ attention kernels ----------------------------

def _mha_core(q_all, k_all, v_all, add_mask, nhead, dh):
    """q_all:(Lq,D) k_all/v_all:(Lk,D) f32; add_mask broadcastable to (Lq,Lk) or None."""
    scale = 1.0 / math.sqrt(dh)
    outs = []
    for h in range(nhead):
        q = q_all[:, h * dh:(h + 1) * dh].astype(jnp.bfloat16)
        k = k_all[:, h * dh:(h + 1) * dh].astype(jnp.bfloat16)
        v = v_all[:, h * dh:(h + 1) * dh].astype(jnp.bfloat16)
        s = jax.lax.dot_general(q, k, (((1,), (1,)), ((), ())),
                                preferred_element_type=jnp.float32) * scale
        if add_mask is not None:
            s = s + add_mask
        s = s - jnp.max(s, axis=-1, keepdims=True)
        p = jnp.exp(s)
        p = p * pl.reciprocal(jnp.sum(p, axis=-1, keepdims=True), approx=True)
        outs.append(jnp.dot(p.astype(jnp.bfloat16), v,
                            preferred_element_type=jnp.float32))
    return jnp.concatenate(outs, axis=-1)           # lane-dense (Lq, D)


def _self_attn_kernel(pad_ref, qkv_ref, o_ref, *, nhead, dh, causal):
    D = nhead * dh
    qkv = qkv_ref[0]                                # (L, 3D)
    L = qkv.shape[0]
    mask = pad_ref[0]                               # (1, L) additive key-padding
    if causal:
        r = jax.lax.broadcasted_iota(jnp.int32, (L, L), 0)
        c = jax.lax.broadcasted_iota(jnp.int32, (L, L), 1)
        mask = mask + jnp.where(c > r, NEG_INF, 0.0)
    o_ref[0] = _mha_core(qkv[:, :D], qkv[:, D:2 * D], qkv[:, 2 * D:],
                         mask, nhead, dh)


def pallas_self_attention(qkv, pad_add, nhead, causal):
    # qkv: (B, L, 3D) f32, pad_add: (B, 1, L) f32 additive key-padding mask.
    B, L, threeD = qkv.shape
    D = threeD // 3
    dh = D // nhead
    return pl.pallas_call(
        functools.partial(_self_attn_kernel, nhead=nhead, dh=dh, causal=causal),
        grid=(B,),
        out_shape=jax.ShapeDtypeStruct((B, L, D), jnp.float32),
        in_specs=[pl.BlockSpec((1, 1, L), lambda b: (b, 0, 0)),
                  pl.BlockSpec((1, L, threeD), lambda b: (b, 0, 0))],
        out_specs=pl.BlockSpec((1, L, D), lambda b: (b, 0, 0)),
        compiler_params=pltpu.CompilerParams(dimension_semantics=("parallel",)),
    )(pad_add, qkv)


def _cross_attn_kernel(q_ref, kv_ref, o_ref, *, nhead, dh):
    D = nhead * dh
    q = q_ref[0]                                    # (Lq, D)
    kv = kv_ref[0]                                  # (Lk, 2D)
    # reference decode() passes no memory_key_padding_mask -> no mask at all.
    o_ref[0] = _mha_core(q, kv[:, :D], kv[:, D:], None, nhead, dh)


def pallas_cross_attention(q, kv, nhead):
    B, Lq, D = q.shape
    Lk = kv.shape[1]
    dh = D // nhead
    return pl.pallas_call(
        functools.partial(_cross_attn_kernel, nhead=nhead, dh=dh),
        grid=(B,),
        out_shape=jax.ShapeDtypeStruct((B, Lq, D), jnp.float32),
        in_specs=[pl.BlockSpec((1, Lq, D), lambda b: (b, 0, 0)),
                  pl.BlockSpec((1, Lk, 2 * D), lambda b: (b, 0, 0))],
        out_specs=pl.BlockSpec((1, Lq, D), lambda b: (b, 0, 0)),
        compiler_params=pltpu.CompilerParams(dimension_semantics=("parallel",)),
    )(q, kv)


# ------------------------------ model (glue) ----------------------------------

def sinusoidal_pe(length, d_model):
    pos = jnp.arange(length, dtype=jnp.float32)[:, None]
    div = jnp.exp(jnp.arange(0, d_model, 2, dtype=jnp.float32)
                  * (-math.log(10000.0) / d_model))
    pe = jnp.zeros((length, d_model), jnp.float32)
    pe = pe.at[:, 0::2].set(jnp.sin(pos * div))
    pe = pe.at[:, 1::2].set(jnp.cos(pos * div))
    return pe


def embed(params, tokens, d_model):
    # tokens: (L, B) int32 -> (B, L, D) f32 activations (internal batch-first layout).
    L, _ = tokens.shape
    emb = params["embedding"][tokens.T]             # gather (plain-JAX glue)
    pe = sinusoidal_pe(L, d_model)[None, :, :]
    # NOTE: reference adds PE directly to the embedding (no sqrt(d_model) scale).
    # TODO(synk): dropout (p=0.1) omitted — eval-mode identity semantics.
    return emb + pe


def encoder_layer(x, p, pad_add, nhead):
    B, L, D = x.shape
    M = B * L
    x2 = x.reshape(M, D)
    qkv = pallas_matmul(x2, p["qkv_w"], p["qkv_b"]).reshape(B, L, 3 * D)
    sa = pallas_self_attention(qkv, pad_add, nhead, causal=False).reshape(M, D)
    x2 = pallas_proj_add_ln(sa, p["wo"], p["bo"], x2, p["ln1_g"], p["ln1_b"])
    x2 = pallas_ffn_add_ln(x2, p["w1"], p["b1"], p["w2"], p["b2"],
                           p["ln2_g"], p["ln2_b"])
    return x2.reshape(B, L, D)


def decoder_layer(y, memory, p, tgt_pad_add, nhead):
    B, Lt, D = y.shape
    Ls = memory.shape[1]
    M = B * Lt
    y2 = y.reshape(M, D)

    qkv = pallas_matmul(y2, p["qkv_w"], p["qkv_b"]).reshape(B, Lt, 3 * D)
    sa = pallas_self_attention(qkv, tgt_pad_add, nhead, causal=True).reshape(M, D)
    y2 = pallas_proj_add_ln(sa, p["wo"], p["bo"], y2, p["ln1_g"], p["ln1_b"])

    q = pallas_matmul(y2, p["cq_w"], p["cq_b"]).reshape(B, Lt, D)
    kv = pallas_matmul(memory.reshape(B * Ls, D),
                       p["ckv_w"], p["ckv_b"]).reshape(B, Ls, 2 * D)
    ca = pallas_cross_attention(q, kv, nhead).reshape(M, D)
    y2 = pallas_proj_add_ln(ca, p["cwo"], p["cbo"], y2, p["ln2_g"], p["ln2_b"])

    y2 = pallas_ffn_add_ln(y2, p["w1"], p["b1"], p["w2"], p["b2"],
                           p["ln3_g"], p["ln3_b"])
    return y2.reshape(B, Lt, D)


def transformer_forward(params, src, tgt, pad_idx, nhead):
    D = params["enc_norm_g"].shape[1]
    Ls, B = src.shape
    Lt = tgt.shape[0]

    # Tiny additive key-padding rows (B,1,L); the full (B,Lq,Lk) masks are built
    # in-kernel (causal via iota), never materialized in HBM.
    src_pad_add = jnp.where(src.T == pad_idx, NEG_INF, 0.0).astype(jnp.float32)[:, None, :]
    tgt_pad_add = jnp.where(tgt.T == pad_idx, NEG_INF, 0.0).astype(jnp.float32)[:, None, :]

    # ---- encoder ----
    x = embed(params, src, D)                       # (B, Ls, D)
    for lp in params["enc_layers"]:
        x = encoder_layer(x, lp, src_pad_add, nhead)
    memory = pallas_layernorm(x.reshape(B * Ls, D),
                              params["enc_norm_g"],
                              params["enc_norm_b"]).reshape(B, Ls, D)

    # ---- decoder ----
    y = embed(params, tgt, D)                       # (B, Lt, D)
    for lp in params["dec_layers"]:
        y = decoder_layer(y, memory, lp, tgt_pad_add, nhead)
    y2 = pallas_layernorm(y.reshape(B * Lt, D),
                          params["dec_norm_g"], params["dec_norm_b"])

    logits = pallas_matmul(y2, params["gen_w"], params["gen_b"])   # (B*Lt, V)
    V = params["gen_w"].shape[1]
    return logits.reshape(B, Lt, V).transpose(1, 0, 2)             # (Lt, B, V)


# ------------------------------ parameters ------------------------------------

def init_params(key, vocab, d_model, nhead, ff, nlayers):
    keys = iter(jax.random.split(key, 512))

    def w(shape, scale=0.05):
        # MXU operands stored bf16 (f32 accumulation inside the kernels).
        return (jax.random.normal(next(keys), shape, jnp.float32) * scale
                ).astype(jnp.bfloat16)

    zeros = lambda s: jnp.zeros(s, jnp.float32)
    ones = lambda s: jnp.ones(s, jnp.float32)

    def enc_layer():
        return dict(qkv_w=w((d_model, 3 * d_model)), qkv_b=zeros((1, 3 * d_model)),
                    wo=w((d_model, d_model)), bo=zeros((1, d_model)),
                    w1=w((d_model, ff)), b1=zeros((1, ff)),
                    w2=w((ff, d_model)), b2=zeros((1, d_model)),
                    ln1_g=ones((1, d_model)), ln1_b=zeros((1, d_model)),
                    ln2_g=ones((1, d_model)), ln2_b=zeros((1, d_model)))

    def dec_layer():
        d = enc_layer()
        d.update(cq_w=w((d_model, d_model)), cq_b=zeros((1, d_model)),
                 ckv_w=w((d_model, 2 * d_model)), ckv_b=zeros((1, 2 * d_model)),
                 cwo=w((d_model, d_model)), cbo=zeros((1, d_model)),
                 ln3_g=ones((1, d_model)), ln3_b=zeros((1, d_model)))
        return d

    return dict(
        embedding=jax.random.normal(next(keys), (vocab, d_model), jnp.float32) * 0.1,
        enc_layers=[enc_layer() for _ in range(nlayers)],
        enc_norm_g=ones((1, d_model)), enc_norm_b=zeros((1, d_model)),
        dec_layers=[dec_layer() for _ in range(nlayers)],
        dec_norm_g=ones((1, d_model)), dec_norm_b=zeros((1, d_model)),
        gen_w=w((d_model, vocab)), gen_b=zeros((1, vocab)),
    )


# --------------------------------- main ----------------------------------------

if __name__ == "__main__":
    VOCAB, PAD_IDX = 128, 0
    D_MODEL, NHEAD, FF, NLAYERS = 128, 8, 256, 1   # scaled-down d_model / ffn / vocab
    LS, LT, B = 8, 8, 2

    root = jax.random.PRNGKey(0)
    kp, ks, kt = jax.random.split(root, 3)
    params = init_params(kp, VOCAB, D_MODEL, NHEAD, FF, NLAYERS)

    src = jax.random.randint(ks, (LS, B), 1, VOCAB, dtype=jnp.int32)
    tgt = jax.random.randint(kt, (LT, B), 1, VOCAB, dtype=jnp.int32)
    src = src.at[-2:, 1].set(PAD_IDX)   # exercise src_key_padding_mask
    tgt = tgt.at[-3:, 0].set(PAD_IDX)   # exercise tgt_key_padding_mask

    fwd = jax.jit(functools.partial(transformer_forward,
                                    pad_idx=PAD_IDX, nhead=NHEAD))
    logits = fwd(params, src, tgt)
    jax.block_until_ready(logits)
    assert logits.shape == (LT, B, VOCAB), logits.shape
    assert bool(jnp.all(jnp.isfinite(logits)))
    print("KERNEL_OK")
</pallas_src>

<mosaic_0001>
module attributes {stable_mosaic.version = 11 : i64} {
  func.func @_matmul_kernel(%arg0: i32, %arg1: i32, %arg2: i32, %arg3: memref<16x128xf32, #tpu.memory_space<vmem>>, %arg4: memref<128x128xbf16, #tpu.memory_space<vmem>>, %arg5: memref<1x128xf32, #tpu.memory_space<vmem>>, %arg6: memref<16x128xf32, #tpu.memory_space<vmem>>, %arg7: memref<16x128xf32, #tpu.memory_space<vmem>>) attributes {dimension_semantics = [#tpu.dimension_semantics<parallel>, #tpu.dimension_semantics<parallel>, #tpu.dimension_semantics<arbitrary>], iteration_bounds = array<i64: 1, 3, 1>, scalar_prefetch = 0 : i64, scratch_operands = 1 : i64, tpu.core_type = #tpu.core_type<tc>, window_params = [{transform_indices = @transform_0, window_bounds = array<i64: 16, 128>}, {transform_indices = @transform_1, window_bounds = array<i64: 128, 128>}, {transform_indices = @transform_2, window_bounds = array<i64: 1, 128>}, {transform_indices = @transform_3, window_bounds = array<i64: 16, 128>}]} {
    %c0_i32 = arith.constant 0 : i32
    %0 = arith.cmpi eq, %arg2, %c0_i32 : i32
    %1 = arith.extui %0 : i1 to i32
    %c0_i32_0 = arith.constant 0 : i32
    %2 = arith.cmpi ne, %1, %c0_i32_0 : i32
    scf.if %2 {
      %cst_10 = arith.constant 0.000000e+00 : f32
      %13 = vector.broadcast %cst_10 : f32 to vector<16x128xf32>
      %c0_11 = arith.constant 0 : index
      %c0_12 = arith.constant 0 : index
      %14 = vector.load %arg7[%c0_11, %c0_12] : memref<16x128xf32, #tpu.memory_space<vmem>>, vector<16x128xf32>
      tpu.vector_store %arg7[%c0_11, %c0_12], %13 {strides = array<i32>} : memref<16x128xf32, #tpu.memory_space<vmem>>, vector<16x128xf32>,
    } else {
    }
    %c0 = arith.constant 0 : index
    %c0_1 = arith.constant 0 : index
    %3 = vector.load %arg7[%c0, %c0_1] : memref<16x128xf32, #tpu.memory_space<vmem>>, vector<16x128xf32>
    %c0_2 = arith.constant 0 : index
    %c0_3 = arith.constant 0 : index
    %4 = vector.load %arg3[%c0_2, %c0_3] : memref<16x128xf32, #tpu.memory_space<vmem>>, vector<16x128xf32>
    %5 = arith.truncf %4 : vector<16x128xf32> to vector<16x128xbf16>
    %c0_4 = arith.constant 0 : index
    %c0_5 = arith.constant 0 : index
    %6 = vector.load %arg4[%c0_4, %c0_5] : memref<128x128xbf16, #tpu.memory_space<vmem>>, vector<128x128xbf16>
    %cst = arith.constant dense<0.000000e+00> : vector<16x128xf32>
    %7 = tpu.matmul %5, %6, %cst {dimension_numbers = #tpu.dot_dimension_numbers<[1], [0], [0], [1], [0, 0, 1, 1], [], []>} : vector<16x128xbf16>, vector<128x128xbf16>, vector<16x128xf32> -> vector<16x128xf32>
    %8 = arith.addf %3, %7 : vector<16x128xf32>
    %c0_6 = arith.constant 0 : index
    %c0_7 = arith.constant 0 : index
    %9 = vector.load %arg7[%c0_6, %c0_7] : memref<16x128xf32, #tpu.memory_space<vmem>>, vector<16x128xf32>
    tpu.vector_store %arg7[%c0_6, %c0_7], %8 {strides = array<i32>} : memref<16x128xf32, #tpu.memory_space<vmem>>, vector<16x128xf32>,
    %c0_i32_8 = arith.constant 0 : i32
    %10 = arith.cmpi eq, %arg2, %c0_i32_8 : i32
    %11 = arith.extui %10 : i1 to i32
    %c0_i32_9 = arith.constant 0 : i32
    %12 = arith.cmpi ne, %11, %c0_i32_9 : i32
    scf.if %12 {
      %c0_10 = arith.constant 0 : index
      %c0_11 = arith.constant 0 : index
      %13 = vector.load %arg7[%c0_10, %c0_11] : memref<16x128xf32, #tpu.memory_space<vmem>>, vector<16x128xf32>
      %c0_12 = arith.constant 0 : index
      %c0_13 = arith.constant 0 : index
      %14 = vector.load %arg5[%c0_12, %c0_13] : memref<1x128xf32, #tpu.memory_space<vmem>>, vector<1x128xf32>
      %15 = vector.broadcast %14 : vector<1x128xf32> to vector<16x128xf32>
      %16 = arith.addf %13, %15 : vector<16x128xf32>
      %c0_14 = arith.constant 0 : index
      %c0_15 = arith.constant 0 : index
      %17 = vector.load %arg6[%c0_14, %c0_15] : memref<16x128xf32, #tpu.memory_space<vmem>>, vector<16x128xf32>
      tpu.vector_store %arg6[%c0_14, %c0_15], %16 {strides = array<i32>} : memref<16x128xf32, #tpu.memory_space<vmem>>, vector<16x128xf32>,
    } else {
    }
    return
  }
  func.func @transform_0(%arg0: i32, %arg1: i32, %arg2: i32) -> (i32, i32) {
    %c0_i32 = arith.constant 0 : i32
    return %arg0, %arg2 : i32, i32
  }
  func.func @transform_1(%arg0: i32, %arg1: i32, %arg2: i32) -> (i32, i32) {
    %c0_i32 = arith.constant 0 : i32
    return %arg2, %arg1 : i32, i32
  }
  func.func @transform_2(%arg0: i32, %arg1: i32, %arg2: i32) -> (i32, i32) {
    %c0_i32 = arith.constant 0 : i32
    %c0_i32_0 = arith.constant 0 : i32
    return %c0_i32, %arg1 : i32, i32
  }
  func.func @transform_3(%arg0: i32, %arg1: i32, %arg2: i32) -> (i32, i32) {
    %c0_i32 = arith.constant 0 : i32
    return %arg0, %arg1 : i32, i32
  }
}

module attributes {stable_mosaic.version = 11 : i64} {
  func.func @_self_attn_kernel(%arg0: i32, %arg1: memref<1x1x8xf32, #tpu.memory_space<vmem>>, %arg2: memref<1x8x384xf32, #tpu.memory_space<vmem>>, %arg3: memref<1x8x128xf32, #tpu.memory_space<vmem>>) attributes {dimension_semantics = [#tpu.dimension_semantics<parallel>], iteration_bounds = array<i64: 2>, scalar_prefetch = 0 : i64, scratch_operands = 0 : i64, tpu.core_type = #tpu.core_type<tc>, window_params = [{transform_indices = @transform_0, window_bounds = array<i64: 1, 1, 8>}, {transform_indices = @transform_1, window_bounds = array<i64: 1, 8, 384>}, {transform_indices = @transform_2, window_bounds = array<i64: 1, 8, 128>}]} {
    %c0 = arith.constant 0 : index
    %c0_0 = arith.constant 0 : index
    %c0_1 = arith.constant 0 : index
    %0 = vector.load %arg2[%c0, %c0_0, %c0_1] : memref<1x8x384xf32, #tpu.memory_space<vmem>>, vector<1x8x384xf32>
    %1 = vector.shape_cast %0 : vector<1x8x384xf32> to vector<8x384xf32>
    %c0_2 = arith.constant 0 : index
    %c0_3 = arith.constant 0 : index
    %c0_4 = arith.constant 0 : index
    %2 = vector.load %arg1[%c0_2, %c0_3, %c0_4] : memref<1x1x8xf32, #tpu.memory_space<vmem>>, vector<1x1x8xf32>
    %3 = vector.shape_cast %2 : vector<1x1x8xf32> to vector<1x8xf32>
    %4 = tpu.iota {dimensions = array<i32: 0>} : vector<8x8xi32>
    %5 = tpu.iota {dimensions = array<i32: 1>} : vector<8x8xi32>
    %6 = arith.cmpi sgt, %5, %4 : vector<8x8xi32>
    %cst = arith.constant -1.000000e+09 : f32
    %cst_5 = arith.constant 0.000000e+00 : f32
    %7 = vector.broadcast %cst : f32 to vector<8x8xf32>
    %8 = vector.broadcast %cst_5 : f32 to vector<8x8xf32>
    %9 = arith.select %6, %7, %8 : vector<8x8xi1>, vector<8x8xf32>
    %10 = vector.broadcast %3 : vector<1x8xf32> to vector<8x8xf32>
    %11 = arith.addf %10, %9 : vector<8x8xf32>
    %12 = vector.extract_strided_slice %1 {offsets = [0, 0], sizes = [8, 128], strides = [1, 1]} : vector<8x384xf32> to vector<8x128xf32>
    %13 = vector.extract_strided_slice %1 {offsets = [0, 128], sizes = [8, 128], strides = [1, 1]} : vector<8x384xf32> to vector<8x128xf32>
    %14 = vector.extract_strided_slice %1 {offsets = [0, 256], sizes = [8, 128], strides = [1, 1]} : vector<8x384xf32> to vector<8x128xf32>
    %15 = vector.extract_strided_slice %12 {offsets = [0, 0], sizes = [8, 16], strides = [1, 1]} : vector<8x128xf32> to vector<8x16xf32>
    %16 = arith.truncf %15 : vector<8x16xf32> to vector<8x16xbf16>
    %17 = vector.extract_strided_slice %13 {offsets = [0, 0], sizes = [8, 16], strides = [1, 1]} : vector<8x128xf32> to vector<8x16xf32>
    %18 = arith.truncf %17 : vector<8x16xf32> to vector<8x16xbf16>
    %19 = vector.extract_strided_slice %14 {offsets = [0, 0], sizes = [8, 16], strides = [1, 1]} : vector<8x128xf32> to vector<8x16xf32>
    %20 = arith.truncf %19 : vector<8x16xf32> to vector<8x16xbf16>
    %cst_6 = arith.constant dense<0.000000e+00> : vector<8x8xf32>
    %21 = tpu.matmul %16, %18, %cst_6 {dimension_numbers = #tpu.dot_dimension_numbers<[1], [1], [0], [0], [0, 0, 1, 0], [], []>} : vector<8x16xbf16>, vector<8x16xbf16>, vector<8x8xf32> -> vector<8x8xf32>
    %cst_7 = arith.constant 2.500000e-01 : f32
    %22 = vector.broadcast %cst_7 : f32 to vector<8x8xf32>
    %23 = arith.mulf %21, %22 : vector<8x8xf32>
    %24 = arith.addf %23, %11 : vector<8x8xf32>
    %cst_8 = arith.constant dense<0xFF800000> : vector<8xf32>
    %25 = vector.multi_reduction <maximumf>, %24, %cst_8 [1] : vector<8x8xf32> to vector<8xf32>
    %26 = vector.shape_cast %25 : vector<8xf32> to vector<8x1xf32>
    %27 = vector.broadcast %26 : vector<8x1xf32> to vector<8x8xf32>
    %28 = arith.subf %24, %27 : vector<8x8xf32>
    %29 = math.exp %28 : vector<8x8xf32>
    %cst_9 = arith.constant dense<0.000000e+00> : vector<8xf32>
    %30 = vector.multi_reduction <add>, %29, %cst_9 [1] : vector<8x8xf32> to vector<8xf32>
    %31 = vector.shape_cast %30 : vector<8xf32> to vector<8x1xf32>
    %32 = tpu.reciprocal %31 {approx = true} : vector<8x1xf32> -> vector<8x1xf32>
    %33 = vector.broadcast %32 : vector<8x1xf32> to vector<8x8xf32>
    %34 = arith.mulf %29, %33 : vector<8x8xf32>
    %35 = arith.truncf %34 : vector<8x8xf32> to vector<8x8xbf16>
    %cst_10 = arith.constant dense<0.000000e+00> : vector<8x16xf32>
    %36 = tpu.matmul %35, %20, %cst_10 {dimension_numbers = #tpu.dot_dimension_numbers<[1], [0], [0], [1], [0, 0, 1, 1], [], []>} : vector<8x8xbf16>, vector<8x16xbf16>, vector<8x16xf32> -> vector<8x16xf32>
    %37 = vector.extract_strided_slice %12 {offsets = [0, 16], sizes = [8, 16], strides = [1, 1]} : vector<8x128xf32> to vector<8x16xf32>
    %38 = arith.truncf %37 : vector<8x16xf32> to vector<8x16xbf16>
    %39 = vector.extract_strided_slice %13 {offsets = [0, 16], sizes = [8, 16], strides = [1, 1]} : vector<8x128xf32> to vector<8x16xf32>
    %40 = arith.truncf %39 : vector<8x16xf32> to vector<8x16xbf16>
    %41 = vector.extract_strided_slice %14 {offsets = [0, 16], sizes = [8, 16], strides = [1, 1]} : vector<8x128xf32> to vector<8x16xf32>
    %42 = arith.truncf %41 : vector<8x16xf32> to vector<8x16xbf16>
    %cst_11 = arith.constant dense<0.000000e+00> : vector<8x8xf32>
    %43 = tpu.matmul %38, %40, %cst_11 {dimension_numbers = #tpu.dot_dimension_numbers<[1], [1], [0], [0], [0, 0, 1, 0], [], []>} : vector<8x16xbf16>, vector<8x16xbf16>, vector<8x8xf32> -> vector<8x8xf32>
    %cst_12 = arith.constant 2.500000e-01 : f32
    %44 = vector.broadcast %cst_12 : f32 to vector<8x8xf32>
    %45 = arith.mulf %43, %44 : vector<8x8xf32>
    %46 = arith.addf %45, %11 : vector<8x8xf32>
    %cst_13 = arith.constant dense<0xFF800000> : vector<8xf32>
    %47 = vector.multi_reduction <maximumf>, %46, %cst_13 [1] : vector<8x8xf32> to vector<8xf32>
    %48 = vector.shape_cast %47 : vector<8xf32> to vector<8x1xf32>
    %49 = vector.broadcast %48 : vector<8x1xf32> to vector<8x8xf32>
    %50 = arith.subf %46, %49 : vector<8x8xf32>
    %51 = math.exp %50 : vector<8x8xf32>
    %cst_14 = arith.constant dense<0.000000e+00> : vector<8xf32>
    %52 = vector.multi_reduction <add>, %51, %cst_14 [1] : vector<8x8xf32> to vector<8xf32>
    %53 = vector.shape_cast %52 : vector<8xf32> to vector<8x1xf32>
    %54 = tpu.reciprocal %53 {approx = true} : vector<8x1xf32> -> vector<8x1xf32>
    %55 = vector.broadcast %54 : vector<8x1xf32> to vector<8x8xf32>
    %56 = arith.mulf %51, %55 : vector<8x8xf32>
    %57 = arith.truncf %56 : vector<8x8xf32> to vector<8x8xbf16>
    %cst_15 = arith.constant dense<0.000000e+00> : vector<8x16xf32>
    %58 = tpu.matmul %57, %42, %cst_15 {dimension_numbers = #tpu.dot_dimension_numbers<[1], [0], [0], [1], [0, 0, 1, 1], [], []>} : vector<8x8xbf16>, vector<8x16xbf16>, vector<8x16xf32> -> vector<8x16xf32>
    %59 = vector.extract_strided_slice %12 {offsets = [0, 32], sizes = [8, 16], strides = [1, 1]} : vector<8x128xf32> to vector<8x16xf32>
    %60 = arith.truncf %59 : vector<8x16xf32> to vector<8x16xbf16>
    %61 = vector.extract_strided_slice %13 {offsets = [0, 32], sizes = [8, 16], strides = [1, 1]} : vector<8x128xf32> to vector<8x16xf32>
    %62 = arith.truncf %61 : vector<8x16xf32> to vector<8x16xbf16>
    %63 = vector.extract_strided_slice %14 {offsets = [0, 32], sizes = [8, 16], strides = [1, 1]} : vector<8x128xf32> to vector<8x16xf32>
    %64 = arith.truncf %63 : vector<8x16xf32> to vector<8x16xbf16>
    %cst_16 = arith.constant dense<0.000000e+00> : vector<8x8xf32>
    %65 = tpu.matmul %60, %62, %cst_16 {dimension_numbers = #tpu.dot_dimension_numbers<[1], [1], [0], [0], [0, 0, 1, 0], [], []>} : vector<8x16xbf16>, vector<8x16xbf16>, vector<8x8xf32> -> vector<8x8xf32>
    %cst_17 = arith.constant 2.500000e-01 : f32
    %66 = vector.broadcast %cst_17 : f32 to vector<8x8xf32>
    %67 = arith.mulf %65, %66 : vector<8x8xf32>
    %68 = arith.addf %67, %11 : vector<8x8xf32>
    %cst_18 = arith.constant dense<0xFF800000> : vector<8xf32>
    %69 = vector.multi_reduction <maximumf>, %68, %cst_18 [1] : vector<8x8xf32> to vector<8xf32>
    %70 = vector.shape_cast %69 : vector<8xf32> to vector<8x1xf32>
    %71 = vector.broadcast %70 : vector<8x1xf32> to vector<8x8xf32>
    %72 = arith.subf %68, %71 : vector<8x8xf32>
    %73 = math.exp %72 : vector<8x8xf32>
    %cst_19 = arith.constant dense<0.000000e+00> : vector<8xf32>
    %74 = vector.multi_reduction <add>, %73, %cst_19 [1] : vector<8x8xf32> to vector<8xf32>
    %75 = vector.shape_cast %74 : vector<8xf32> to vector<8x1xf32>
    %76 = tpu.reciprocal %75 {approx = true} : vector<8x1xf32> -> vector<8x1xf32>
    %77 = vector.broadcast %76 : vector<8x1xf32> to vector<8x8xf32>
    %78 = arith.mulf %73, %77 : vector<8x8xf32>
    %79 = arith.truncf %78 : vector<8x8xf32> to vector<8x8xbf16>
    %cst_20 = arith.constant dense<0.000000e+00> : vector<8x16xf32>
    %80 = tpu.matmul %79, %64, %cst_20 {dimension_numbers = #tpu.dot_dimension_numbers<[1], [0], [0], [1], [0, 0, 1, 1], [], []>} : vector<8x8xbf16>, vector<8x16xbf16>, vector<8x16xf32> -> vector<8x16xf32>
    %81 = vector.extract_strided_slice %12 {offsets = [0, 48], sizes = [8, 16], strides = [1, 1]} : vector<8x128xf32> to vector<8x16xf32>
    %82 = arith.truncf %81 : vector<8x16xf32> to vector<8x16xbf16>
    %83 = vector.extract_strided_slice %13 {offsets = [0, 48], sizes = [8, 16], strides = [1, 1]} : vector<8x128xf32> to vector<8x16xf32>
    %84 = arith.truncf %83 : vector<8x16xf32> to vector<8x16xbf16>
    %85 = vector.extract_strided_slice %14 {offsets = [0, 48], sizes = [8, 16], strides = [1, 1]} : vector<8x128xf32> to vector<8x16xf32>
    %86 = arith.truncf %85 : vector<8x16xf32> to vector<8x16xbf16>
    %cst_21 = arith.constant dense<0.000000e+00> : vector<8x8xf32>
    %87 = tpu.matmul %82, %84, %cst_21 {dimension_numbers = #tpu.dot_dimension_numbers<[1], [1], [0], [0], [0, 0, 1, 0], [], []>} : vector<8x16xbf16>, vector<8x16xbf16>, vector<8x8xf32> -> vector<8x8xf32>
    %cst_22 = arith.constant 2.500000e-01 : f32
    %88 = vector.broadcast %cst_22 : f32 to vector<8x8xf32>
    %89 = arith.mulf %87, %88 : vector<8x8xf32>
    %90 = arith.addf %89, %11 : vector<8x8xf32>
    %cst_23 = arith.constant dense<0xFF800000> : vector<8xf32>
    %91 = vector.multi_reduction <maximumf>, %90, %cst_23 [1] : vector<8x8xf32> to vector<8xf32>
    %92 = vector.shape_cast %91 : vector<8xf32> to vector<8x1xf32>
    %93 = vector.broadcast %92 : vector<8x1xf32> to vector<8x8xf32>
    %94 = arith.subf %90, %93 : vector<8x8xf32>
    %95 = math.exp %94 : vector<8x8xf32>
    %cst_24 = arith.constant dense<0.000000e+00> : vector<8xf32>
    %96 = vector.multi_reduction <add>, %95, %cst_24 [1] : vector<8x8xf32> to vector<8xf32>
    %97 = vector.shape_cast %96 : vector<8xf32> to vector<8x1xf32>
    %98 = tpu.reciprocal %97 {approx = true} : vector<8x1xf32> -> vector<8x1xf32>
    %99 = vector.broadcast %98 : vector<8x1xf32> to vector<8x8xf32>
    %100 = arith.mulf %95, %99 : vector<8x8xf32>
    %101 = arith.truncf %100 : vector<8x8xf32> to vector<8x8xbf16>
    %cst_25 = arith.constant dense<0.000000e+00> : vector<8x16xf32>
    %102 = tpu.matmul %101, %86, %cst_25 {dimension_numbers = #tpu.dot_dimension_numbers<[1], [0], [0], [1], [0, 0, 1, 1], [], []>} : vector<8x8xbf16>, vector<8x16xbf16>, vector<8x16xf32> -> vector<8x16xf32>
    %103 = vector.extract_strided_slice %12 {offsets = [0, 64], sizes = [8, 16], strides = [1, 1]} : vector<8x128xf32> to vector<8x16xf32>
    %104 = arith.truncf %103 : vector<8x16xf32> to vector<8x16xbf16>
    %105 = vector.extract_strided_slice %13 {offsets = [0, 64], sizes = [8, 16], strides = [1, 1]} : vector<8x128xf32> to vector<8x16xf32>
    %106 = arith.truncf %105 : vector<8x16xf32> to vector<8x16xbf16>
    %107 = vector.extract_strided_slice %14 {offsets = [0, 64], sizes = [8, 16], strides = [1, 1]} : vector<8x128xf32> to vector<8x16xf32>
    %108 = arith.truncf %107 : vector<8x16xf32> to vector<8x16xbf16>
    %cst_26 = arith.constant dense<0.000000e+00> : vector<8x8xf32>
    %109 = tpu.matmul %104, %106, %cst_26 {dimension_numbers = #tpu.dot_dimension_numbers<[1], [1], [0], [0], [0, 0, 1, 0], [], []>} : vector<8x16xbf16>, vector<8x16xbf16>, vector<8x8xf32> -> vector<8x8xf32>
    %cst_27 = arith.constant 2.500000e-01 : f32
    %110 = vector.broadcast %cst_27 : f32 to vector<8x8xf32>
    %111 = arith.mulf %109, %110 : vector<8x8xf32>
    %112 = arith.addf %111, %11 : vector<8x8xf32>
    %cst_28 = arith.constant dense<0xFF800000> : vector<8xf32>
    %113 = vector.multi_reduction <maximumf>, %112, %cst_28 [1] : vector<8x8xf32> to vector<8xf32>
    %114 = vector.shape_cast %113 : vector<8xf32> to vector<8x1xf32>
    %115 = vector.broadcast %114 : vector<8x1xf32> to vector<8x8xf32>
    %116 = arith.subf %112, %115 : vector<8x8xf32>
    %117 = math.exp %116 : vector<8x8xf32>
    %cst_29 = arith.constant dense<0.000000e+00> : vector<8xf32>
    %118 = vector.multi_reduction <add>, %117, %cst_29 [1] : vector<8x8xf32> to vector<8xf32>
    %119 = vector.shape_cast %118 : vector<8xf32> to vector<8x1xf32>
    %120 = tpu.reciprocal %119 {approx = true} : vector<8x1xf32> -> vector<8x1xf32>
    %121 = vector.broadcast %120 : vector<8x1xf32> to vector<8x8xf32>
    %122 = arith.mulf %117, %121 : vector<8x8xf32>
    %123 = arith.truncf %122 : vector<8x8xf32> to vector<8x8xbf16>
    %cst_30 = arith.constant dense<0.000000e+00> : vector<8x16xf32>
    %124 = tpu.matmul %123, %108, %cst_30 {dimension_numbers = #tpu.dot_dimension_numbers<[1], [0], [0], [1], [0, 0, 1, 1], [], []>} : vector<8x8xbf16>, vector<8x16xbf16>, vector<8x16xf32> -> vector<8x16xf32>
    %125 = vector.extract_strided_slice %12 {offsets = [0, 80], sizes = [8, 16], strides = [1, 1]} : vector<8x128xf32> to vector<8x16xf32>
    %126 = arith.truncf %125 : vector<8x16xf32> to vector<8x16xbf16>
    %127 = vector.extract_strided_slice %13 {offsets = [0, 80], sizes = [8, 16], strides = [1, 1]} : vector<8x128xf32> to vector<8x16xf32>
    %128 = arith.truncf %127 : vector<8x16xf32> to vector<8x16xbf16>
    %129 = vector.extract_strided_slice %14 {offsets = [0, 80], sizes = [8, 16], strides = [1, 1]} : vector<8x128xf32> to vector<8x16xf32>
    %130 = arith.truncf %129 : vector<8x16xf32> to vector<8x16xbf16>
    %cst_31 = arith.constant dense<0.000000e+00> : vector<8x8xf32>
    %131 = tpu.matmul %126, %128, %cst_31 {dimension_numbers = #tpu.dot_dimension_numbers<[1], [1], [0], [0], [0, 0, 1, 0], [], []>} : vector<8x16xbf16>, vector<8x16xbf16>, vector<8x8xf32> -> vector<8x8xf32>
    %cst_32 = arith.constant 2.500000e-01 : f32
    %132 = vector.broadcast %cst_32 : f32 to vector<8x8xf32>
    %133 = arith.mulf %131, %132 : vector<8x8xf32>
    %134 = arith.addf %133, %11 : vector<8x8xf32>
    %cst_33 = arith.constant dense<0xFF800000> : vector<8xf32>
    %135 = vector.multi_reduction <maximumf>, %134, %cst_33 [1] : vector<8x8xf32> to vector<8xf32>
    %136 = vector.shape_cast %135 : vector<8xf32> to vector<8x1xf32>
    %137 = vector.broadcast %136 : vector<8x1xf32> to vector<8x8xf32>
    %138 = arith.subf %134, %137 : vector<8x8xf32>
    %139 = math.exp %138 : vector<8x8xf32>
    %cst_34 = arith.constant dense<0.000000e+00> : vector<8xf32>
    %140 = vector.multi_reduction <add>, %139, %cst_34 [1] : vector<8x8xf32> to vector<8xf32>
    %141 = vector.shape_cast %140 : vector<8xf32> to vector<8x1xf32>
    %142 = tpu.reciprocal %141 {approx = true} : vector<8x1xf32> -> vector<8x1xf32>
    %143 = vector.broadcast %142 : vector<8x1xf32> to vector<8x8xf32>
    %144 = arith.mulf %139, %143 : vector<8x8xf32>
    %145 = arith.truncf %144 : vector<8x8xf32> to vector<8x8xbf16>
    %cst_35 = arith.constant dense<0.000000e+00> : vector<8x16xf32>
    %146 = tpu.matmul %145, %130, %cst_35 {dimension_numbers = #tpu.dot_dimension_numbers<[1], [0], [0], [1], [0, 0, 1, 1], [], []>} : vector<8x8xbf16>, vector<8x16xbf16>, vector<8x16xf32> -> vector<8x16xf32>
    %147 = vector.extract_strided_slice %12 {offsets = [0, 96], sizes = [8, 16], strides = [1, 1]} : vector<8x128xf32> to vector<8x16xf32>
    %148 = arith.truncf %147 : vector<8x16xf32> to vector<8x16xbf16>
    %149 = vector.extract_strided_slice %13 {offsets = [0, 96], sizes = [8, 16], strides = [1, 1]} : vector<8x128xf32> to vector<8x16xf32>
    %150 = arith.truncf %149 : vector<8x16xf32> to vector<8x16xbf16>
    %151 = vector.extract_strided_slice %14 {offsets = [0, 96], sizes = [8, 16], strides = [1, 1]} : vector<8x128xf32> to vector<8x16xf32>
    %152 = arith.truncf %151 : vector<8x16xf32> to vector<8x16xbf16>
    %cst_36 = arith.constant dense<0.000000e+00> : vector<8x8xf32>
    %153 = tpu.matmul %148, %150, %cst_36 {dimension_numbers = #tpu.dot_dimension_numbers<[1], [1], [0], [0], [0, 0, 1, 0], [], []>} : vector<8x16xbf16>, vector<8x16xbf16>, vector<8x8xf32> -> vector<8x8xf32>
    %cst_37 = arith.constant 2.500000e-01 : f32
    %154 = vector.broadcast %cst_37 : f32 to vector<8x8xf32>
    %155 = arith.mulf %153, %154 : vector<8x8xf32>
    %156 = arith.addf %155, %11 : vector<8x8xf32>
    %cst_38 = arith.constant dense<0xFF800000> : vector<8xf32>
    %157 = vector.multi_reduction <maximumf>, %156, %cst_38 [1] : vector<8x8xf32> to vector<8xf32>
    %158 = vector.shape_cast %157 : vector<8xf32> to vector<8x1xf32>
    %159 = vector.broadcast %158 : vector<8x1xf32> to vector<8x8xf32>
    %160 = arith.subf %156, %159 : vector<8x8xf32>
    %161 = math.exp %160 : vector<8x8xf32>
    %cst_39 = arith.constant dense<0.000000e+00> : vector<8xf32>
    %162 = vector.multi_reduction <add>, %161, %cst_39 [1] : vector<8x8xf32> to vector<8xf32>
    %163 = vector.shape_cast %162 : vector<8xf32> to vector<8x1xf32>
    %164 = tpu.reciprocal %163 {approx = true} : vector<8x1xf32> -> vector<8x1xf32>
    %165 = vector.broadcast %164 : vector<8x1xf32> to vector<8x8xf32>
    %166 = arith.mulf %161, %165 : vector<8x8xf32>
    %167 = arith.truncf %166 : vector<8x8xf32> to vector<8x8xbf16>
    %cst_40 = arith.constant dense<0.000000e+00> : vector<8x16xf32>
    %168 = tpu.matmul %167, %152, %cst_40 {dimension_numbers = #tpu.dot_dimension_numbers<[1], [0], [0], [1], [0, 0, 1, 1], [], []>} : vector<8x8xbf16>, vector<8x16xbf16>, vector<8x16xf32> -> vector<8x16xf32>
    %169 = vector.extract_strided_slice %12 {offsets = [0, 112], sizes = [8, 16], strides = [1, 1]} : vector<8x128xf32> to vector<8x16xf32>
    %170 = arith.truncf %169 : vector<8x16xf32> to vector<8x16xbf16>
    %171 = vector.extract_strided_slice %13 {offsets = [0, 112], sizes = [8, 16], strides = [1, 1]} : vector<8x128xf32> to vector<8x16xf32>
    %172 = arith.truncf %171 : vector<8x16xf32> to vector<8x16xbf16>
    %173 = vector.extract_strided_slice %14 {offsets = [0, 112], sizes = [8, 16], strides = [1, 1]} : vector<8x128xf32> to vector<8x16xf32>
    %174 = arith.truncf %173 : vector<8x16xf32> to vector<8x16xbf16>
    %cst_41 = arith.constant dense<0.000000e+00> : vector<8x8xf32>
    %175 = tpu.matmul %170, %172, %cst_41 {dimension_numbers = #tpu.dot_dimension_numbers<[1], [1], [0], [0], [0, 0, 1, 0], [], []>} : vector<8x16xbf16>, vector<8x16xbf16>, vector<8x8xf32> -> vector<8x8xf32>
    %cst_42 = arith.constant 2.500000e-01 : f32
    %176 = vector.broadcast %cst_42 : f32 to vector<8x8xf32>
    %177 = arith.mulf %175, %176 : vector<8x8xf32>
    %178 = arith.addf %177, %11 : vector<8x8xf32>
    %cst_43 = arith.constant dense<0xFF800000> : vector<8xf32>
    %179 = vector.multi_reduction <maximumf>, %178, %cst_43 [1] : vector<8x8xf32> to vector<8xf32>
    %180 = vector.shape_cast %179 : vector<8xf32> to vector<8x1xf32>
    %181 = vector.broadcast %180 : vector<8x1xf32> to vector<8x8xf32>
    %182 = arith.subf %178, %181 : vector<8x8xf32>
    %183 = math.exp %182 : vector<8x8xf32>
    %cst_44 = arith.constant dense<0.000000e+00> : vector<8xf32>
    %184 = vector.multi_reduction <add>, %183, %cst_44 [1] : vector<8x8xf32> to vector<8xf32>
    %185 = vector.shape_cast %184 : vector<8xf32> to vector<8x1xf32>
    %186 = tpu.reciprocal %185 {approx = true} : vector<8x1xf32> -> vector<8x1xf32>
    %187 = vector.broadcast %186 : vector<8x1xf32> to vector<8x8xf32>
    %188 = arith.mulf %183, %187 : vector<8x8xf32>
    %189 = arith.truncf %188 : vector<8x8xf32> to vector<8x8xbf16>
    %cst_45 = arith.constant dense<0.000000e+00> : vector<8x16xf32>
    %190 = tpu.matmul %189, %174, %cst_45 {dimension_numbers = #tpu.dot_dimension_numbers<[1], [0], [0], [1], [0, 0, 1, 1], [], []>} : vector<8x8xbf16>, vector<8x16xbf16>, vector<8x16xf32> -> vector<8x16xf32>
    %191 = tpu.concatenate %36, %58, %80, %102, %124, %146, %168, %190 in 1 : vector<8x16xf32>, vector<8x16xf32>, vector<8x16xf32>, vector<8x16xf32>, vector<8x16xf32>, vector<8x16xf32>, vector<8x16xf32>, vector<8x16xf32> -> vector<8x128xf32>
    %c0_46 = arith.constant 0 : index
    %c0_47 = arith.constant 0 : index
    %c0_48 = arith.constant 0 : index
    %192 = vector.load %arg3[%c0_46, %c0_47, %c0_48] : memref<1x8x128xf32, #tpu.memory_space<vmem>>, vector<1x8x128xf32>
    %193 = vector.shape_cast %192 : vector<1x8x128xf32> to vector<8x128xf32>
    %194 = vector.shape_cast %191 : vector<8x128xf32> to vector<1x8x128xf32>
    tpu.vector_store %arg3[%c0_46, %c0_47, %c0_48], %194 {strides = array<i32>} : memref<1x8x128xf32, #tpu.memory_space<vmem>>, vector<1x8x128xf32>,
    return
  }
  func.func @transform_0(%arg0: i32) -> (i32, i32, i32) {
    %c0_i32 = arith.constant 0 : i32
    %c0_i32_0 = arith.constant 0 : i32
    %c0_i32_1 = arith.constant 0 : i32
    return %arg0, %c0_i32, %c0_i32_0 : i32, i32, i32
  }
  func.func @transform_1(%arg0: i32) -> (i32, i32, i32) {
    %c0_i32 = arith.constant 0 : i32
    %c0_i32_0 = arith.constant 0 : i32
    %c0_i32_1 = arith.constant 0 : i32
    return %arg0, %c0_i32, %c0_i32_0 : i32, i32, i32
  }
  func.func @transform_2(%arg0: i32) -> (i32, i32, i32) {
    %c0_i32 = arith.constant 0 : i32
    %c0_i32_0 = arith.constant 0 : i32
    %c0_i32_1 = arith.constant 0 : i32
    return %arg0, %c0_i32, %c0_i32_0 : i32, i32, i32
  }
}

module attributes {stable_mosaic.version = 11 : i64} {
  func.func @_proj_add_ln_kernel(%arg0: i32, %arg1: memref<16x128xf32, #tpu.memory_space<vmem>>, %arg2: memref<128x128xbf16, #tpu.memory_space<vmem>>, %arg3: memref<1x128xf32, #tpu.memory_space<vmem>>, %arg4: memref<16x128xf32, #tpu.memory_space<vmem>>, %arg5: memref<1x128xf32, #tpu.memory_space<vmem>>, %arg6: memref<1x128xf32, #tpu.memory_space<vmem>>, %arg7: memref<16x128xf32, #tpu.memory_space<vmem>>) attributes {dimension_semantics = [#tpu.dimension_semantics<parallel>], iteration_bounds = array<i64: 1>, scalar_prefetch = 0 : i64, scratch_operands = 0 : i64, tpu.core_type = #tpu.core_type<tc>, window_params = [{transform_indices = @transform_0, window_bounds = array<i64: 16, 128>}, {pipeline_mode = #tpu.pipeline_mode<synchronous>, transform_indices = @transform_1, window_bounds = array<i64: 128, 128>}, {pipeline_mode = #tpu.pipeline_mode<synchronous>, transform_indices = @transform_2, window_bounds = array<i64: 1, 128>}, {transform_indices = @transform_3, window_bounds = array<i64: 16, 128>}, {pipeline_mode = #tpu.pipeline_mode<synchronous>, transform_indices = @transform_4, window_bounds = array<i64: 1, 128>}, {pipeline_mode = #tpu.pipeline_mode<synchronous>, transform_indices = @transform_5, window_bounds = array<i64: 1, 128>}, {transform_indices = @transform_6, window_bounds = array<i64: 16, 128>}]} {
    %c0 = arith.constant 0 : index
    %c0_0 = arith.constant 0 : index
    %0 = vector.load %arg1[%c0, %c0_0] : memref<16x128xf32, #tpu.memory_space<vmem>>, vector<16x128xf32>
    %1 = arith.truncf %0 : vector<16x128xf32> to vector<16x128xbf16>
    %c0_1 = arith.constant 0 : index
    %c0_2 = arith.constant 0 : index
    %2 = vector.load %arg2[%c0_1, %c0_2] : memref<128x128xbf16, #tpu.memory_space<vmem>>, vector<128x128xbf16>
    %cst = arith.constant dense<0.000000e+00> : vector<16x128xf32>
    %3 = tpu.matmul %1, %2, %cst {dimension_numbers = #tpu.dot_dimension_numbers<[1], [0], [0], [1], [0, 0, 1, 1], [], []>} : vector<16x128xbf16>, vector<128x128xbf16>, vector<16x128xf32> -> vector<16x128xf32>
    %c0_3 = arith.constant 0 : index
    %c0_4 = arith.constant 0 : index
    %4 = vector.load %arg3[%c0_3, %c0_4] : memref<1x128xf32, #tpu.memory_space<vmem>>, vector<1x128xf32>
    %5 = vector.broadcast %4 : vector<1x128xf32> to vector<16x128xf32>
    %6 = arith.addf %3, %5 : vector<16x128xf32>
    %c0_5 = arith.constant 0 : index
    %c0_6 = arith.constant 0 : index
    %7 = vector.load %arg4[%c0_5, %c0_6] : memref<16x128xf32, #tpu.memory_space<vmem>>, vector<16x128xf32>
    %8 = arith.addf %7, %6 : vector<16x128xf32>
    %c0_7 = arith.constant 0 : index
    %c0_8 = arith.constant 0 : index
    %9 = vector.load %arg5[%c0_7, %c0_8] : memref<1x128xf32, #tpu.memory_space<vmem>>, vector<1x128xf32>
    %c0_9 = arith.constant 0 : index
    %c0_10 = arith.constant 0 : index
    %10 = vector.load %arg6[%c0_9, %c0_10] : memref<1x128xf32, #tpu.memory_space<vmem>>, vector<1x128xf32>
    %cst_11 = arith.constant dense<0.000000e+00> : vector<16xf32>
    %11 = vector.multi_reduction <add>, %8, %cst_11 [1] : vector<16x128xf32> to vector<16xf32>
    %12 = vector.shape_cast %11 : vector<16xf32> to vector<16x1xf32>
    %cst_12 = arith.constant 1.280000e+02 : f32
    %13 = vector.broadcast %cst_12 : f32 to vector<16x1xf32>
    %14 = arith.divf %12, %13 : vector<16x1xf32>
    %15 = vector.broadcast %14 : vector<16x1xf32> to vector<16x128xf32>
    %16 = arith.subf %8, %15 : vector<16x128xf32>
    %17 = arith.mulf %16, %16 : vector<16x128xf32>
    %cst_13 = arith.constant dense<0.000000e+00> : vector<16xf32>
    %18 = vector.multi_reduction <add>, %17, %cst_13 [1] : vector<16x128xf32> to vector<16xf32>
    %19 = vector.shape_cast %18 : vector<16xf32> to vector<16x1xf32>
    %cst_14 = arith.constant 1.280000e+02 : f32
    %20 = vector.broadcast %cst_14 : f32 to vector<16x1xf32>
    %21 = arith.divf %19, %20 : vector<16x1xf32>
    %22 = vector.broadcast %14 : vector<16x1xf32> to vector<16x128xf32>
    %23 = arith.subf %8, %22 : vector<16x128xf32>
    %cst_15 = arith.constant 9.99999974E-6 : f32
    %24 = vector.broadcast %cst_15 : f32 to vector<16x1xf32>
    %25 = arith.addf %21, %24 : vector<16x1xf32>
    %26 = math.rsqrt %25 : vector<16x1xf32>
    %27 = vector.broadcast %26 : vector<16x1xf32> to vector<16x128xf32>
    %28 = arith.mulf %23, %27 : vector<16x128xf32>
    %29 = vector.broadcast %9 : vector<1x128xf32> to vector<16x128xf32>
    %30 = arith.mulf %28, %29 : vector<16x128xf32>
    %31 = vector.broadcast %10 : vector<1x128xf32> to vector<16x128xf32>
    %32 = arith.addf %30, %31 : vector<16x128xf32>
    %c0_16 = arith.constant 0 : index
    %c0_17 = arith.constant 0 : index
    %33 = vector.load %arg7[%c0_16, %c0_17] : memref<16x128xf32, #tpu.memory_space<vmem>>, vector<16x128xf32>
    tpu.vector_store %arg7[%c0_16, %c0_17], %32 {strides = array<i32>} : memref<16x128xf32, #tpu.memory_space<vmem>>, vector<16x128xf32>,
    return
  }
  func.func @transform_0(%arg0: i32) -> (i32, i32) {
    %c0_i32 = arith.constant 0 : i32
    %c0_i32_0 = arith.constant 0 : i32
    return %arg0, %c0_i32 : i32, i32
  }
  func.func @transform_1(%arg0: i32) -> (i32, i32) {
    %c0_i32 = arith.constant 0 : i32
    %c0_i32_0 = arith.constant 0 : i32
    %c0_i32_1 = arith.constant 0 : i32
    return %c0_i32, %c0_i32_0 : i32, i32
  }
  func.func @transform_2(%arg0: i32) -> (i32, i32) {
    %c0_i32 = arith.constant 0 : i32
    %c0_i32_0 = arith.constant 0 : i32
    %c0_i32_1 = arith.constant 0 : i32
    return %c0_i32, %c0_i32_0 : i32, i32
  }
  func.func @transform_3(%arg0: i32) -> (i32, i32) {
    %c0_i32 = arith.constant 0 : i32
    %c0_i32_0 = arith.constant 0 : i32
    return %arg0, %c0_i32 : i32, i32
  }
  func.func @transform_4(%arg0: i32) -> (i32, i32) {
    %c0_i32 = arith.constant 0 : i32
    %c0_i32_0 = arith.constant 0 : i32
    %c0_i32_1 = arith.constant 0 : i32
    return %c0_i32, %c0_i32_0 : i32, i32
  }
  func.func @transform_5(%arg0: i32) -> (i32, i32) {
    %c0_i32 = arith.constant 0 : i32
    %c0_i32_0 = arith.constant 0 : i32
    %c0_i32_1 = arith.constant 0 : i32
    return %c0_i32, %c0_i32_0 : i32, i32
  }
  func.func @transform_6(%arg0: i32) -> (i32, i32) {
    %c0_i32 = arith.constant 0 : i32
    %c0_i32_0 = arith.constant 0 : i32
    return %arg0, %c0_i32 : i32, i32
  }
}

module attributes {stable_mosaic.version = 11 : i64} {
  func.func @_matmul_kernel(%arg0: i32, %arg1: i32, %arg2: i32, %arg3: memref<16x128xf32, #tpu.memory_space<vmem>>, %arg4: memref<128x128xbf16, #tpu.memory_space<vmem>>, %arg5: memref<1x128xf32, #tpu.memory_space<vmem>>, %arg6: memref<16x128xf32, #tpu.memory_space<vmem>>, %arg7: memref<16x128xf32, #tpu.memory_space<vmem>>) attributes {dimension_semantics = [#tpu.dimension_semantics<parallel>, #tpu.dimension_semantics<parallel>, #tpu.dimension_semantics<arbitrary>], iteration_bounds = array<i64: 1, 1, 1>, scalar_prefetch = 0 : i64, scratch_operands = 1 : i64, tpu.core_type = #tpu.core_type<tc>, window_params = [{transform_indices = @transform_0, window_bounds = array<i64: 16, 128>}, {transform_indices = @transform_1, window_bounds = array<i64: 128, 128>}, {transform_indices = @transform_2, window_bounds = array<i64: 1, 128>}, {transform_indices = @transform_3, window_bounds = array<i64: 16, 128>}]} {
    %c0_i32 = arith.constant 0 : i32
    %0 = arith.cmpi eq, %arg2, %c0_i32 : i32
    %1 = arith.extui %0 : i1 to i32
    %c0_i32_0 = arith.constant 0 : i32
    %2 = arith.cmpi ne, %1, %c0_i32_0 : i32
    scf.if %2 {
      %cst_10 = arith.constant 0.000000e+00 : f32
      %13 = vector.broadcast %cst_10 : f32 to vector<16x128xf32>
      %c0_11 = arith.constant 0 : index
      %c0_12 = arith.constant 0 : index
      %14 = vector.load %arg7[%c0_11, %c0_12] : memref<16x128xf32, #tpu.memory_space<vmem>>, vector<16x128xf32>
      tpu.vector_store %arg7[%c0_11, %c0_12], %13 {strides = array<i32>} : memref<16x128xf32, #tpu.memory_space<vmem>>, vector<16x128xf32>,
    } else {
    }
    %c0 = arith.constant 0 : index
    %c0_1 = arith.constant 0 : index
    %3 = vector.load %arg7[%c0, %c0_1] : memref<16x128xf32, #tpu.memory_space<vmem>>, vector<16x128xf32>
    %c0_2 = arith.constant 0 : index
    %c0_3 = arith.constant 0 : index
    %4 = vector.load %arg3[%c0_2, %c0_3] : memref<16x128xf32, #tpu.memory_space<vmem>>, vector<16x128xf32>
    %5 = arith.truncf %4 : vector<16x128xf32> to vector<16x128xbf16>
    %c0_4 = arith.constant 0 : index
    %c0_5 = arith.constant 0 : index
    %6 = vector.load %arg4[%c0_4, %c0_5] : memref<128x128xbf16, #tpu.memory_space<vmem>>, vector<128x128xbf16>
    %cst = arith.constant dense<0.000000e+00> : vector<16x128xf32>
    %7 = tpu.matmul %5, %6, %cst {dimension_numbers = #tpu.dot_dimension_numbers<[1], [0], [0], [1], [0, 0, 1, 1], [], []>} : vector<16x128xbf16>, vector<128x128xbf16>, vector<16x128xf32> -> vector<16x128xf32>
    %8 = arith.addf %3, %7 : vector<16x128xf32>
    %c0_6 = arith.constant 0 : index
    %c0_7 = arith.constant 0 : index
    %9 = vector.load %arg7[%c0_6, %c0_7] : memref<16x128xf32, #tpu.memory_space<vmem>>, vector<16x128xf32>
    tpu.vector_store %arg7[%c0_6, %c0_7], %8 {strides = array<i32>} : memref<16x128xf32, #tpu.memory_space<vmem>>, vector<16x128xf32>,
    %c0_i32_8 = arith.constant 0 : i32
    %10 = arith.cmpi eq, %arg2, %c0_i32_8 : i32
    %11 = arith.extui %10 : i1 to i32
    %c0_i32_9 = arith.constant 0 : i32
    %12 = arith.cmpi ne, %11, %c0_i32_9 : i32
    scf.if %12 {
      %c0_10 = arith.constant 0 : index
      %c0_11 = arith.constant 0 : index
      %13 = vector.load %arg7[%c0_10, %c0_11] : memref<16x128xf32, #tpu.memory_space<vmem>>, vector<16x128xf32>
      %c0_12 = arith.constant 0 : index
      %c0_13 = arith.constant 0 : index
      %14 = vector.load %arg5[%c0_12, %c0_13] : memref<1x128xf32, #tpu.memory_space<vmem>>, vector<1x128xf32>
      %15 = vector.broadcast %14 : vector<1x128xf32> to vector<16x128xf32>
      %16 = arith.addf %13, %15 : vector<16x128xf32>
      %c0_14 = arith.constant 0 : index
      %c0_15 = arith.constant 0 : index
      %17 = vector.load %arg6[%c0_14, %c0_15] : memref<16x128xf32, #tpu.memory_space<vmem>>, vector<16x128xf32>
      tpu.vector_store %arg6[%c0_14, %c0_15], %16 {strides = array<i32>} : memref<16x128xf32, #tpu.memory_space<vmem>>, vector<16x128xf32>,
    } else {
    }
    return
  }
  func.func @transform_0(%arg0: i32, %arg1: i32, %arg2: i32) -> (i32, i32) {
    %c0_i32 = arith.constant 0 : i32
    return %arg0, %arg2 : i32, i32
  }
  func.func @transform_1(%arg0: i32, %arg1: i32, %arg2: i32) -> (i32, i32) {
    %c0_i32 = arith.constant 0 : i32
    return %arg2, %arg1 : i32, i32
  }
  func.func @transform_2(%arg0: i32, %arg1: i32, %arg2: i32) -> (i32, i32) {
    %c0_i32 = arith.constant 0 : i32
    %c0_i32_0 = arith.constant 0 : i32
    return %c0_i32, %arg1 : i32, i32
  }
  func.func @transform_3(%arg0: i32, %arg1: i32, %arg2: i32) -> (i32, i32) {
    %c0_i32 = arith.constant 0 : i32
    return %arg0, %arg1 : i32, i32
  }
}

module attributes {stable_mosaic.version = 11 : i64} {
  func.func @_self_attn_kernel(%arg0: i32, %arg1: memref<1x1x8xf32, #tpu.memory_space<vmem>>, %arg2: memref<1x8x384xf32, #tpu.memory_space<vmem>>, %arg3: memref<1x8x128xf32, #tpu.memory_space<vmem>>) attributes {dimension_semantics = [#tpu.dimension_semantics<parallel>], iteration_bounds = array<i64: 2>, scalar_prefetch = 0 : i64, scratch_operands = 0 : i64, tpu.core_type = #tpu.core_type<tc>, window_params = [{transform_indices = @transform_0, window_bounds = array<i64: 1, 1, 8>}, {transform_indices = @transform_1, window_bounds = array<i64: 1, 8, 384>}, {transform_indices = @transform_2, window_bounds = array<i64: 1, 8, 128>}]} {
    %c0 = arith.constant 0 : index
    %c0_0 = arith.constant 0 : index
    %c0_1 = arith.constant 0 : index
    %0 = vector.load %arg2[%c0, %c0_0, %c0_1] : memref<1x8x384xf32, #tpu.memory_space<vmem>>, vector<1x8x384xf32>
    %1 = vector.shape_cast %0 : vector<1x8x384xf32> to vector<8x384xf32>
    %c0_2 = arith.constant 0 : index
    %c0_3 = arith.constant 0 : index
    %c0_4 = arith.constant 0 : index
    %2 = vector.load %arg1[%c0_2, %c0_3, %c0_4] : memref<1x1x8xf32, #tpu.memory_space<vmem>>, vector<1x1x8xf32>
    %3 = vector.shape_cast %2 : vector<1x1x8xf32> to vector<1x8xf32>
    %4 = vector.extract_strided_slice %1 {offsets = [0, 0], sizes = [8, 128], strides = [1, 1]} : vector<8x384xf32> to vector<8x128xf32>
    %5 = vector.extract_strided_slice %1 {offsets = [0, 128], sizes = [8, 128], strides = [1, 1]} : vector<8x384xf32> to vector<8x128xf32>
    %6 = vector.extract_strided_slice %1 {offsets = [0, 256], sizes = [8, 128], strides = [1, 1]} : vector<8x384xf32> to vector<8x128xf32>
    %7 = vector.extract_strided_slice %4 {offsets = [0, 0], sizes = [8, 16], strides = [1, 1]} : vector<8x128xf32> to vector<8x16xf32>
    %8 = arith.truncf %7 : vector<8x16xf32> to vector<8x16xbf16>
    %9 = vector.extract_strided_slice %5 {offsets = [0, 0], sizes = [8, 16], strides = [1, 1]} : vector<8x128xf32> to vector<8x16xf32>
    %10 = arith.truncf %9 : vector<8x16xf32> to vector<8x16xbf16>
    %11 = vector.extract_strided_slice %6 {offsets = [0, 0], sizes = [8, 16], strides = [1, 1]} : vector<8x128xf32> to vector<8x16xf32>
    %12 = arith.truncf %11 : vector<8x16xf32> to vector<8x16xbf16>
    %cst = arith.constant dense<0.000000e+00> : vector<8x8xf32>
    %13 = tpu.matmul %8, %10, %cst {dimension_numbers = #tpu.dot_dimension_numbers<[1], [1], [0], [0], [0, 0, 1, 0], [], []>} : vector<8x16xbf16>, vector<8x16xbf16>, vector<8x8xf32> -> vector<8x8xf32>
    %cst_5 = arith.constant 2.500000e-01 : f32
    %14 = vector.broadcast %cst_5 : f32 to vector<8x8xf32>
    %15 = arith.mulf %13, %14 : vector<8x8xf32>
    %16 = vector.broadcast %3 : vector<1x8xf32> to vector<8x8xf32>
    %17 = arith.addf %15, %16 : vector<8x8xf32>
    %cst_6 = arith.constant dense<0xFF800000> : vector<8xf32>
    %18 = vector.multi_reduction <maximumf>, %17, %cst_6 [1] : vector<8x8xf32> to vector<8xf32>
    %19 = vector.shape_cast %18 : vector<8xf32> to vector<8x1xf32>
    %20 = vector.broadcast %19 : vector<8x1xf32> to vector<8x8xf32>
    %21 = arith.subf %17, %20 : vector<8x8xf32>
    %22 = math.exp %21 : vector<8x8xf32>
    %cst_7 = arith.constant dense<0.000000e+00> : vector<8xf32>
    %23 = vector.multi_reduction <add>, %22, %cst_7 [1] : vector<8x8xf32> to vector<8xf32>
    %24 = vector.shape_cast %23 : vector<8xf32> to vector<8x1xf32>
    %25 = tpu.reciprocal %24 {approx = true} : vector<8x1xf32> -> vector<8x1xf32>
    %26 = vector.broadcast %25 : vector<8x1xf32> to vector<8x8xf32>
    %27 = arith.mulf %22, %26 : vector<8x8xf32>
    %28 = arith.truncf %27 : vector<8x8xf32> to vector<8x8xbf16>
    %cst_8 = arith.constant dense<0.000000e+00> : vector<8x16xf32>
    %29 = tpu.matmul %28, %12, %cst_8 {dimension_numbers = #tpu.dot_dimension_numbers<[1], [0], [0], [1], [0, 0, 1, 1], [], []>} : vector<8x8xbf16>, vector<8x16xbf16>, vector<8x16xf32> -> vector<8x16xf32>
    %30 = vector.extract_strided_slice %4 {offsets = [0, 16], sizes = [8, 16], strides = [1, 1]} : vector<8x128xf32> to vector<8x16xf32>
    %31 = arith.truncf %30 : vector<8x16xf32> to vector<8x16xbf16>
    %32 = vector.extract_strided_slice %5 {offsets = [0, 16], sizes = [8, 16], strides = [1, 1]} : vector<8x128xf32> to vector<8x16xf32>
    %33 = arith.truncf %32 : vector<8x16xf32> to vector<8x16xbf16>
    %34 = vector.extract_strided_slice %6 {offsets = [0, 16], sizes = [8, 16], strides = [1, 1]} : vector<8x128xf32> to vector<8x16xf32>
    %35 = arith.truncf %34 : vector<8x16xf32> to vector<8x16xbf16>
    %cst_9 = arith.constant dense<0.000000e+00> : vector<8x8xf32>
    %36 = tpu.matmul %31, %33, %cst_9 {dimension_numbers = #tpu.dot_dimension_numbers<[1], [1], [0], [0], [0, 0, 1, 0], [], []>} : vector<8x16xbf16>, vector<8x16xbf16>, vector<8x8xf32> -> vector<8x8xf32>
    %cst_10 = arith.constant 2.500000e-01 : f32
    %37 = vector.broadcast %cst_10 : f32 to vector<8x8xf32>
    %38 = arith.mulf %36, %37 : vector<8x8xf32>
    %39 = vector.broadcast %3 : vector<1x8xf32> to vector<8x8xf32>
    %40 = arith.addf %38, %39 : vector<8x8xf32>
    %cst_11 = arith.constant dense<0xFF800000> : vector<8xf32>
    %41 = vector.multi_reduction <maximumf>, %40, %cst_11 [1] : vector<8x8xf32> to vector<8xf32>
    %42 = vector.shape_cast %41 : vector<8xf32> to vector<8x1xf32>
    %43 = vector.broadcast %42 : vector<8x1xf32> to vector<8x8xf32>
    %44 = arith.subf %40, %43 : vector<8x8xf32>
    %45 = math.exp %44 : vector<8x8xf32>
    %cst_12 = arith.constant dense<0.000000e+00> : vector<8xf32>
    %46 = vector.multi_reduction <add>, %45, %cst_12 [1] : vector<8x8xf32> to vector<8xf32>
    %47 = vector.shape_cast %46 : vector<8xf32> to vector<8x1xf32>
    %48 = tpu.reciprocal %47 {approx = true} : vector<8x1xf32> -> vector<8x1xf32>
    %49 = vector.broadcast %48 : vector<8x1xf32> to vector<8x8xf32>
    %50 = arith.mulf %45, %49 : vector<8x8xf32>
    %51 = arith.truncf %50 : vector<8x8xf32> to vector<8x8xbf16>
    %cst_13 = arith.constant dense<0.000000e+00> : vector<8x16xf32>
    %52 = tpu.matmul %51, %35, %cst_13 {dimension_numbers = #tpu.dot_dimension_numbers<[1], [0], [0], [1], [0, 0, 1, 1], [], []>} : vector<8x8xbf16>, vector<8x16xbf16>, vector<8x16xf32> -> vector<8x16xf32>
    %53 = vector.extract_strided_slice %4 {offsets = [0, 32], sizes = [8, 16], strides = [1, 1]} : vector<8x128xf32> to vector<8x16xf32>
    %54 = arith.truncf %53 : vector<8x16xf32> to vector<8x16xbf16>
    %55 = vector.extract_strided_slice %5 {offsets = [0, 32], sizes = [8, 16], strides = [1, 1]} : vector<8x128xf32> to vector<8x16xf32>
    %56 = arith.truncf %55 : vector<8x16xf32> to vector<8x16xbf16>
    %57 = vector.extract_strided_slice %6 {offsets = [0, 32], sizes = [8, 16], strides = [1, 1]} : vector<8x128xf32> to vector<8x16xf32>
    %58 = arith.truncf %57 : vector<8x16xf32> to vector<8x16xbf16>
    %cst_14 = arith.constant dense<0.000000e+00> : vector<8x8xf32>
    %59 = tpu.matmul %54, %56, %cst_14 {dimension_numbers = #tpu.dot_dimension_numbers<[1], [1], [0], [0], [0, 0, 1, 0], [], []>} : vector<8x16xbf16>, vector<8x16xbf16>, vector<8x8xf32> -> vector<8x8xf32>
    %cst_15 = arith.constant 2.500000e-01 : f32
    %60 = vector.broadcast %cst_15 : f32 to vector<8x8xf32>
    %61 = arith.mulf %59, %60 : vector<8x8xf32>
    %62 = vector.broadcast %3 : vector<1x8xf32> to vector<8x8xf32>
    %63 = arith.addf %61, %62 : vector<8x8xf32>
    %cst_16 = arith.constant dense<0xFF800000> : vector<8xf32>
    %64 = vector.multi_reduction <maximumf>, %63, %cst_16 [1] : vector<8x8xf32> to vector<8xf32>
    %65 = vector.shape_cast %64 : vector<8xf32> to vector<8x1xf32>
    %66 = vector.broadcast %65 : vector<8x1xf32> to vector<8x8xf32>
    %67 = arith.subf %63, %66 : vector<8x8xf32>
    %68 = math.exp %67 : vector<8x8xf32>
    %cst_17 = arith.constant dense<0.000000e+00> : vector<8xf32>
    %69 = vector.multi_reduction <add>, %68, %cst_17 [1] : vector<8x8xf32> to vector<8xf32>
    %70 = vector.shape_cast %69 : vector<8xf32> to vector<8x1xf32>
    %71 = tpu.reciprocal %70 {approx = true} : vector<8x1xf32> -> vector<8x1xf32>
    %72 = vector.broadcast %71 : vector<8x1xf32> to vector<8x8xf32>
    %73 = arith.mulf %68, %72 : vector<8x8xf32>
    %74 = arith.truncf %73 : vector<8x8xf32> to vector<8x8xbf16>
    %cst_18 = arith.constant dense<0.000000e+00> : vector<8x16xf32>
    %75 = tpu.matmul %74, %58, %cst_18 {dimension_numbers = #tpu.dot_dimension_numbers<[1], [0], [0], [1], [0, 0, 1, 1], [], []>} : vector<8x8xbf16>, vector<8x16xbf16>, vector<8x16xf32> -> vector<8x16xf32>
    %76 = vector.extract_strided_slice %4 {offsets = [0, 48], sizes = [8, 16], strides = [1, 1]} : vector<8x128xf32> to vector<8x16xf32>
    %77 = arith.truncf %76 : vector<8x16xf32> to vector<8x16xbf16>
    %78 = vector.extract_strided_slice %5 {offsets = [0, 48], sizes = [8, 16], strides = [1, 1]} : vector<8x128xf32> to vector<8x16xf32>
    %79 = arith.truncf %78 : vector<8x16xf32> to vector<8x16xbf16>
    %80 = vector.extract_strided_slice %6 {offsets = [0, 48], sizes = [8, 16], strides = [1, 1]} : vector<8x128xf32> to vector<8x16xf32>
    %81 = arith.truncf %80 : vector<8x16xf32> to vector<8x16xbf16>
    %cst_19 = arith.constant dense<0.000000e+00> : vector<8x8xf32>
    %82 = tpu.matmul %77, %79, %cst_19 {dimension_numbers = #tpu.dot_dimension_numbers<[1], [1], [0], [0], [0, 0, 1, 0], [], []>} : vector<8x16xbf16>, vector<8x16xbf16>, vector<8x8xf32> -> vector<8x8xf32>
    %cst_20 = arith.constant 2.500000e-01 : f32
    %83 = vector.broadcast %cst_20 : f32 to vector<8x8xf32>
    %84 = arith.mulf %82, %83 : vector<8x8xf32>
    %85 = vector.broadcast %3 : vector<1x8xf32> to vector<8x8xf32>
    %86 = arith.addf %84, %85 : vector<8x8xf32>
    %cst_21 = arith.constant dense<0xFF800000> : vector<8xf32>
    %87 = vector.multi_reduction <maximumf>, %86, %cst_21 [1] : vector<8x8xf32> to vector<8xf32>
    %88 = vector.shape_cast %87 : vector<8xf32> to vector<8x1xf32>
    %89 = vector.broadcast %88 : vector<8x1xf32> to vector<8x8xf32>
    %90 = arith.subf %86, %89 : vector<8x8xf32>
    %91 = math.exp %90 : vector<8x8xf32>
    %cst_22 = arith.constant dense<0.000000e+00> : vector<8xf32>
    %92 = vector.multi_reduction <add>, %91, %cst_22 [1] : vector<8x8xf32> to vector<8xf32>
    %93 = vector.shape_cast %92 : vector<8xf32> to vector<8x1xf32>
    %94 = tpu.reciprocal %93 {approx = true} : vector<8x1xf32> -> vector<8x1xf32>
    %95 = vector.broadcast %94 : vector<8x1xf32> to vector<8x8xf32>
    %96 = arith.mulf %91, %95 : vector<8x8xf32>
    %97 = arith.truncf %96 : vector<8x8xf32> to vector<8x8xbf16>
    %cst_23 = arith.constant dense<0.000000e+00> : vector<8x16xf32>
    %98 = tpu.matmul %97, %81, %cst_23 {dimension_numbers = #tpu.dot_dimension_numbers<[1], [0], [0], [1], [0, 0, 1, 1], [], []>} : vector<8x8xbf16>, vector<8x16xbf16>, vector<8x16xf32> -> vector<8x16xf32>
    %99 = vector.extract_strided_slice %4 {offsets = [0, 64], sizes = [8, 16], strides = [1, 1]} : vector<8x128xf32> to vector<8x16xf32>
    %100 = arith.truncf %99 : vector<8x16xf32> to vector<8x16xbf16>
    %101 = vector.extract_strided_slice %5 {offsets = [0, 64], sizes = [8, 16], strides = [1, 1]} : vector<8x128xf32> to vector<8x16xf32>
    %102 = arith.truncf %101 : vector<8x16xf32> to vector<8x16xbf16>
    %103 = vector.extract_strided_slice %6 {offsets = [0, 64], sizes = [8, 16], strides = [1, 1]} : vector<8x128xf32> to vector<8x16xf32>
    %104 = arith.truncf %103 : vector<8x16xf32> to vector<8x16xbf16>
    %cst_24 = arith.constant dense<0.000000e+00> : vector<8x8xf32>
    %105 = tpu.matmul %100, %102, %cst_24 {dimension_numbers = #tpu.dot_dimension_numbers<[1], [1], [0], [0], [0, 0, 1, 0], [], []>} : vector<8x16xbf16>, vector<8x16xbf16>, vector<8x8xf32> -> vector<8x8xf32>
    %cst_25 = arith.constant 2.500000e-01 : f32
    %106 = vector.broadcast %cst_25 : f32 to vector<8x8xf32>
    %107 = arith.mulf %105, %106 : vector<8x8xf32>
    %108 = vector.broadcast %3 : vector<1x8xf32> to vector<8x8xf32>
    %109 = arith.addf %107, %108 : vector<8x8xf32>
    %cst_26 = arith.constant dense<0xFF800000> : vector<8xf32>
    %110 = vector.multi_reduction <maximumf>, %109, %cst_26 [1] : vector<8x8xf32> to vector<8xf32>
    %111 = vector.shape_cast %110 : vector<8xf32> to vector<8x1xf32>
    %112 = vector.broadcast %111 : vector<8x1xf32> to vector<8x8xf32>
    %113 = arith.subf %109, %112 : vector<8x8xf32>
    %114 = math.exp %113 : vector<8x8xf32>
    %cst_27 = arith.constant dense<0.000000e+00> : vector<8xf32>
    %115 = vector.multi_reduction <add>, %114, %cst_27 [1] : vector<8x8xf32> to vector<8xf32>
    %116 = vector.shape_cast %115 : vector<8xf32> to vector<8x1xf32>
    %117 = tpu.reciprocal %116 {approx = true} : vector<8x1xf32> -> vector<8x1xf32>
    %118 = vector.broadcast %117 : vector<8x1xf32> to vector<8x8xf32>
    %119 = arith.mulf %114, %118 : vector<8x8xf32>
    %120 = arith.truncf %119 : vector<8x8xf32> to vector<8x8xbf16>
    %cst_28 = arith.constant dense<0.000000e+00> : vector<8x16xf32>
    %121 = tpu.matmul %120, %104, %cst_28 {dimension_numbers = #tpu.dot_dimension_numbers<[1], [0], [0], [1], [0, 0, 1, 1], [], []>} : vector<8x8xbf16>, vector<8x16xbf16>, vector<8x16xf32> -> vector<8x16xf32>
    %122 = vector.extract_strided_slice %4 {offsets = [0, 80], sizes = [8, 16], strides = [1, 1]} : vector<8x128xf32> to vector<8x16xf32>
    %123 = arith.truncf %122 : vector<8x16xf32> to vector<8x16xbf16>
    %124 = vector.extract_strided_slice %5 {offsets = [0, 80], sizes = [8, 16], strides = [1, 1]} : vector<8x128xf32> to vector<8x16xf32>
    %125 = arith.truncf %124 : vector<8x16xf32> to vector<8x16xbf16>
    %126 = vector.extract_strided_slice %6 {offsets = [0, 80], sizes = [8, 16], strides = [1, 1]} : vector<8x128xf32> to vector<8x16xf32>
    %127 = arith.truncf %126 : vector<8x16xf32> to vector<8x16xbf16>
    %cst_29 = arith.constant dense<0.000000e+00> : vector<8x8xf32>
    %128 = tpu.matmul %123, %125, %cst_29 {dimension_numbers = #tpu.dot_dimension_numbers<[1], [1], [0], [0], [0, 0, 1, 0], [], []>} : vector<8x16xbf16>, vector<8x16xbf16>, vector<8x8xf32> -> vector<8x8xf32>
    %cst_30 = arith.constant 2.500000e-01 : f32
    %129 = vector.broadcast %cst_30 : f32 to vector<8x8xf32>
    %130 = arith.mulf %128, %129 : vector<8x8xf32>
    %131 = vector.broadcast %3 : vector<1x8xf32> to vector<8x8xf32>
    %132 = arith.addf %130, %131 : vector<8x8xf32>
    %cst_31 = arith.constant dense<0xFF800000> : vector<8xf32>
    %133 = vector.multi_reduction <maximumf>, %132, %cst_31 [1] : vector<8x8xf32> to vector<8xf32>
    %134 = vector.shape_cast %133 : vector<8xf32> to vector<8x1xf32>
    %135 = vector.broadcast %134 : vector<8x1xf32> to vector<8x8xf32>
    %136 = arith.subf %132, %135 : vector<8x8xf32>
    %137 = math.exp %136 : vector<8x8xf32>
    %cst_32 = arith.constant dense<0.000000e+00> : vector<8xf32>
    %138 = vector.multi_reduction <add>, %137, %cst_32 [1] : vector<8x8xf32> to vector<8xf32>
    %139 = vector.shape_cast %138 : vector<8xf32> to vector<8x1xf32>
    %140 = tpu.reciprocal %139 {approx = true} : vector<8x1xf32> -> vector<8x1xf32>
    %141 = vector.broadcast %140 : vector<8x1xf32> to vector<8x8xf32>
    %142 = arith.mulf %137, %141 : vector<8x8xf32>
    %143 = arith.truncf %142 : vector<8x8xf32> to vector<8x8xbf16>
    %cst_33 = arith.constant dense<0.000000e+00> : vector<8x16xf32>
    %144 = tpu.matmul %143, %127, %cst_33 {dimension_numbers = #tpu.dot_dimension_numbers<[1], [0], [0], [1], [0, 0, 1, 1], [], []>} : vector<8x8xbf16>, vector<8x16xbf16>, vector<8x16xf32> -> vector<8x16xf32>
    %145 = vector.extract_strided_slice %4 {offsets = [0, 96], sizes = [8, 16], strides = [1, 1]} : vector<8x128xf32> to vector<8x16xf32>
    %146 = arith.truncf %145 : vector<8x16xf32> to vector<8x16xbf16>
    %147 = vector.extract_strided_slice %5 {offsets = [0, 96], sizes = [8, 16], strides = [1, 1]} : vector<8x128xf32> to vector<8x16xf32>
    %148 = arith.truncf %147 : vector<8x16xf32> to vector<8x16xbf16>
    %149 = vector.extract_strided_slice %6 {offsets = [0, 96], sizes = [8, 16], strides = [1, 1]} : vector<8x128xf32> to vector<8x16xf32>
    %150 = arith.truncf %149 : vector<8x16xf32> to vector<8x16xbf16>
    %cst_34 = arith.constant dense<0.000000e+00> : vector<8x8xf32>
    %151 = tpu.matmul %146, %148, %cst_34 {dimension_numbers = #tpu.dot_dimension_numbers<[1], [1], [0], [0], [0, 0, 1, 0], [], []>} : vector<8x16xbf16>, vector<8x16xbf16>, vector<8x8xf32> -> vector<8x8xf32>
    %cst_35 = arith.constant 2.500000e-01 : f32
    %152 = vector.broadcast %cst_35 : f32 to vector<8x8xf32>
    %153 = arith.mulf %151, %152 : vector<8x8xf32>
    %154 = vector.broadcast %3 : vector<1x8xf32> to vector<8x8xf32>
    %155 = arith.addf %153, %154 : vector<8x8xf32>
    %cst_36 = arith.constant dense<0xFF800000> : vector<8xf32>
    %156 = vector.multi_reduction <maximumf>, %155, %cst_36 [1] : vector<8x8xf32> to vector<8xf32>
    %157 = vector.shape_cast %156 : vector<8xf32> to vector<8x1xf32>
    %158 = vector.broadcast %157 : vector<8x1xf32> to vector<8x8xf32>
    %159 = arith.subf %155, %158 : vector<8x8xf32>
    %160 = math.exp %159 : vector<8x8xf32>
    %cst_37 = arith.constant dense<0.000000e+00> : vector<8xf32>
    %161 = vector.multi_reduction <add>, %160, %cst_37 [1] : vector<8x8xf32> to vector<8xf32>
    %162 = vector.shape_cast %161 : vector<8xf32> to vector<8x1xf32>
    %163 = tpu.reciprocal %162 {approx = true} : vector<8x1xf32> -> vector<8x1xf32>
    %164 = vector.broadcast %163 : vector<8x1xf32> to vector<8x8xf32>
    %165 = arith.mulf %160, %164 : vector<8x8xf32>
    %166 = arith.truncf %165 : vector<8x8xf32> to vector<8x8xbf16>
    %cst_38 = arith.constant dense<0.000000e+00> : vector<8x16xf32>
    %167 = tpu.matmul %166, %150, %cst_38 {dimension_numbers = #tpu.dot_dimension_numbers<[1], [0], [0], [1], [0, 0, 1, 1], [], []>} : vector<8x8xbf16>, vector<8x16xbf16>, vector<8x16xf32> -> vector<8x16xf32>
    %168 = vector.extract_strided_slice %4 {offsets = [0, 112], sizes = [8, 16], strides = [1, 1]} : vector<8x128xf32> to vector<8x16xf32>
    %169 = arith.truncf %168 : vector<8x16xf32> to vector<8x16xbf16>
    %170 = vector.extract_strided_slice %5 {offsets = [0, 112], sizes = [8, 16], strides = [1, 1]} : vector<8x128xf32> to vector<8x16xf32>
    %171 = arith.truncf %170 : vector<8x16xf32> to vector<8x16xbf16>
    %172 = vector.extract_strided_slice %6 {offsets = [0, 112], sizes = [8, 16], strides = [1, 1]} : vector<8x128xf32> to vector<8x16xf32>
    %173 = arith.truncf %172 : vector<8x16xf32> to vector<8x16xbf16>
    %cst_39 = arith.constant dense<0.000000e+00> : vector<8x8xf32>
    %174 = tpu.matmul %169, %171, %cst_39 {dimension_numbers = #tpu.dot_dimension_numbers<[1], [1], [0], [0], [0, 0, 1, 0], [], []>} : vector<8x16xbf16>, vector<8x16xbf16>, vector<8x8xf32> -> vector<8x8xf32>
    %cst_40 = arith.constant 2.500000e-01 : f32
    %175 = vector.broadcast %cst_40 : f32 to vector<8x8xf32>
    %176 = arith.mulf %174, %175 : vector<8x8xf32>
    %177 = vector.broadcast %3 : vector<1x8xf32> to vector<8x8xf32>
    %178 = arith.addf %176, %177 : vector<8x8xf32>
    %cst_41 = arith.constant dense<0xFF800000> : vector<8xf32>
    %179 = vector.multi_reduction <maximumf>, %178, %cst_41 [1] : vector<8x8xf32> to vector<8xf32>
    %180 = vector.shape_cast %179 : vector<8xf32> to vector<8x1xf32>
    %181 = vector.broadcast %180 : vector<8x1xf32> to vector<8x8xf32>
    %182 = arith.subf %178, %181 : vector<8x8xf32>
    %183 = math.exp %182 : vector<8x8xf32>
    %cst_42 = arith.constant dense<0.000000e+00> : vector<8xf32>
    %184 = vector.multi_reduction <add>, %183, %cst_42 [1] : vector<8x8xf32> to vector<8xf32>
    %185 = vector.shape_cast %184 : vector<8xf32> to vector<8x1xf32>
    %186 = tpu.reciprocal %185 {approx = true} : vector<8x1xf32> -> vector<8x1xf32>
    %187 = vector.broadcast %186 : vector<8x1xf32> to vector<8x8xf32>
    %188 = arith.mulf %183, %187 : vector<8x8xf32>
    %189 = arith.truncf %188 : vector<8x8xf32> to vector<8x8xbf16>
    %cst_43 = arith.constant dense<0.000000e+00> : vector<8x16xf32>
    %190 = tpu.matmul %189, %173, %cst_43 {dimension_numbers = #tpu.dot_dimension_numbers<[1], [0], [0], [1], [0, 0, 1, 1], [], []>} : vector<8x8xbf16>, vector<8x16xbf16>, vector<8x16xf32> -> vector<8x16xf32>
    %191 = tpu.concatenate %29, %52, %75, %98, %121, %144, %167, %190 in 1 : vector<8x16xf32>, vector<8x16xf32>, vector<8x16xf32>, vector<8x16xf32>, vector<8x16xf32>, vector<8x16xf32>, vector<8x16xf32>, vector<8x16xf32> -> vector<8x128xf32>
    %c0_44 = arith.constant 0 : index
    %c0_45 = arith.constant 0 : index
    %c0_46 = arith.constant 0 : index
    %192 = vector.load %arg3[%c0_44, %c0_45, %c0_46] : memref<1x8x128xf32, #tpu.memory_space<vmem>>, vector<1x8x128xf32>
    %193 = vector.shape_cast %192 : vector<1x8x128xf32> to vector<8x128xf32>
    %194 = vector.shape_cast %191 : vector<8x128xf32> to vector<1x8x128xf32>
    tpu.vector_store %arg3[%c0_44, %c0_45, %c0_46], %194 {strides = array<i32>} : memref<1x8x128xf32, #tpu.memory_space<vmem>>, vector<1x8x128xf32>,
    return
  }
  func.func @transform_0(%arg0: i32) -> (i32, i32, i32) {
    %c0_i32 = arith.constant 0 : i32
    %c0_i32_0 = arith.constant 0 : i32
    %c0_i32_1 = arith.constant 0 : i32
    return %arg0, %c0_i32, %c0_i32_0 : i32, i32, i32
  }
  func.func @transform_1(%arg0: i32) -> (i32, i32, i32) {
    %c0_i32 = arith.constant 0 : i32
    %c0_i32_0 = arith.constant 0 : i32
    %c0_i32_1 = arith.constant 0 : i32
    return %arg0, %c0_i32, %c0_i32_0 : i32, i32, i32
  }
  func.func @transform_2(%arg0: i32) -> (i32, i32, i32) {
    %c0_i32 = arith.constant 0 : i32
    %c0_i32_0 = arith.constant 0 : i32
    %c0_i32_1 = arith.constant 0 : i32
    return %arg0, %c0_i32, %c0_i32_0 : i32, i32, i32
  }
}

module attributes {stable_mosaic.version = 11 : i64} {
  func.func @_ffn_add_ln_kernel(%arg0: i32, %arg1: memref<16x128xf32, #tpu.memory_space<vmem>>, %arg2: memref<128x256xbf16, #tpu.memory_space<vmem>>, %arg3: memref<1x256xf32, #tpu.memory_space<vmem>>, %arg4: memref<256x128xbf16, #tpu.memory_space<vmem>>, %arg5: memref<1x128xf32, #tpu.memory_space<vmem>>, %arg6: memref<1x128xf32, #tpu.memory_space<vmem>>, %arg7: memref<1x128xf32, #tpu.memory_space<vmem>>, %arg8: memref<16x128xf32, #tpu.memory_space<vmem>>) attributes {dimension_semantics = [#tpu.dimension_semantics<parallel>], iteration_bounds = array<i64: 1>, scalar_prefetch = 0 : i64, scratch_operands = 0 : i64, tpu.core_type = #tpu.core_type<tc>, window_params = [{transform_indices = @transform_0, window_bounds = array<i64: 16, 128>}, {pipeline_mode = #tpu.pipeline_mode<synchronous>, transform_indices = @transform_1, window_bounds = array<i64: 128, 256>}, {pipeline_mode = #tpu.pipeline_mode<synchronous>, transform_indices = @transform_2, window_bounds = array<i64: 1, 256>}, {pipeline_mode = #tpu.pipeline_mode<synchronous>, transform_indices = @transform_3, window_bounds = array<i64: 256, 128>}, {pipeline_mode = #tpu.pipeline_mode<synchronous>, transform_indices = @transform_4, window_bounds = array<i64: 1, 128>}, {pipeline_mode = #tpu.pipeline_mode<synchronous>, transform_indices = @transform_5, window_bounds = array<i64: 1, 128>}, {pipeline_mode = #tpu.pipeline_mode<synchronous>, transform_indices = @transform_6, window_bounds = array<i64: 1, 128>}, {transform_indices = @transform_7, window_bounds = array<i64: 16, 128>}]} {
    %c0 = arith.constant 0 : index
    %c0_0 = arith.constant 0 : index
    %0 = vector.load %arg1[%c0, %c0_0] : memref<16x128xf32, #tpu.memory_space<vmem>>, vector<16x128xf32>
    %1 = arith.truncf %0 : vector<16x128xf32> to vector<16x128xbf16>
    %c0_1 = arith.constant 0 : index
    %c0_2 = arith.constant 0 : index
    %2 = vector.load %arg2[%c0_1, %c0_2] : memref<128x256xbf16, #tpu.memory_space<vmem>>, vector<128x256xbf16>
    %cst = arith.constant dense<0.000000e+00> : vector<16x256xf32>
    %3 = tpu.matmul %1, %2, %cst {dimension_numbers = #tpu.dot_dimension_numbers<[1], [0], [0], [1], [0, 0, 1, 1], [], []>} : vector<16x128xbf16>, vector<128x256xbf16>, vector<16x256xf32> -> vector<16x256xf32>
    %c0_3 = arith.constant 0 : index
    %c0_4 = arith.constant 0 : index
    %4 = vector.load %arg3[%c0_3, %c0_4] : memref<1x256xf32, #tpu.memory_space<vmem>>, vector<1x256xf32>
    %5 = vector.broadcast %4 : vector<1x256xf32> to vector<16x256xf32>
    %6 = arith.addf %3, %5 : vector<16x256xf32>
    %cst_5 = arith.constant 0.000000e+00 : f32
    %7 = vector.broadcast %cst_5 : f32 to vector<16x256xf32>
    %8 = arith.maximumf %6, %7 : vector<16x256xf32>
    %9 = arith.truncf %8 : vector<16x256xf32> to vector<16x256xbf16>
    %c0_6 = arith.constant 0 : index
    %c0_7 = arith.constant 0 : index
    %10 = vector.load %arg4[%c0_6, %c0_7] : memref<256x128xbf16, #tpu.memory_space<vmem>>, vector<256x128xbf16>
    %cst_8 = arith.constant dense<0.000000e+00> : vector<16x128xf32>
    %11 = tpu.matmul %9, %10, %cst_8 {dimension_numbers = #tpu.dot_dimension_numbers<[1], [0], [0], [1], [0, 0, 1, 1], [], []>} : vector<16x256xbf16>, vector<256x128xbf16>, vector<16x128xf32> -> vector<16x128xf32>
    %c0_9 = arith.constant 0 : index
    %c0_10 = arith.constant 0 : index
    %12 = vector.load %arg5[%c0_9, %c0_10] : memref<1x128xf32, #tpu.memory_space<vmem>>, vector<1x128xf32>
    %13 = vector.broadcast %12 : vector<1x128xf32> to vector<16x128xf32>
    %14 = arith.addf %11, %13 : vector<16x128xf32>
    %15 = arith.addf %0, %14 : vector<16x128xf32>
    %c0_11 = arith.constant 0 : index
    %c0_12 = arith.constant 0 : index
    %16 = vector.load %arg6[%c0_11, %c0_12] : memref<1x128xf32, #tpu.memory_space<vmem>>, vector<1x128xf32>
    %c0_13 = arith.constant 0 : index
    %c0_14 = arith.constant 0 : index
    %17 = vector.load %arg7[%c0_13, %c0_14] : memref<1x128xf32, #tpu.memory_space<vmem>>, vector<1x128xf32>
    %cst_15 = arith.constant dense<0.000000e+00> : vector<16xf32>
    %18 = vector.multi_reduction <add>, %15, %cst_15 [1] : vector<16x128xf32> to vector<16xf32>
    %19 = vector.shape_cast %18 : vector<16xf32> to vector<16x1xf32>
    %cst_16 = arith.constant 1.280000e+02 : f32
    %20 = vector.broadcast %cst_16 : f32 to vector<16x1xf32>
    %21 = arith.divf %19, %20 : vector<16x1xf32>
    %22 = vector.broadcast %21 : vector<16x1xf32> to vector<16x128xf32>
    %23 = arith.subf %15, %22 : vector<16x128xf32>
    %24 = arith.mulf %23, %23 : vector<16x128xf32>
    %cst_17 = arith.constant dense<0.000000e+00> : vector<16xf32>
    %25 = vector.multi_reduction <add>, %24, %cst_17 [1] : vector<16x128xf32> to vector<16xf32>
    %26 = vector.shape_cast %25 : vector<16xf32> to vector<16x1xf32>
    %cst_18 = arith.constant 1.280000e+02 : f32
    %27 = vector.broadcast %cst_18 : f32 to vector<16x1xf32>
    %28 = arith.divf %26, %27 : vector<16x1xf32>
    %29 = vector.broadcast %21 : vector<16x1xf32> to vector<16x128xf32>
    %30 = arith.subf %15, %29 : vector<16x128xf32>
    %cst_19 = arith.constant 9.99999974E-6 : f32
    %31 = vector.broadcast %cst_19 : f32 to vector<16x1xf32>
    %32 = arith.addf %28, %31 : vector<16x1xf32>
    %33 = math.rsqrt %32 : vector<16x1xf32>
    %34 = vector.broadcast %33 : vector<16x1xf32> to vector<16x128xf32>
    %35 = arith.mulf %30, %34 : vector<16x128xf32>
    %36 = vector.broadcast %16 : vector<1x128xf32> to vector<16x128xf32>
    %37 = arith.mulf %35, %36 : vector<16x128xf32>
    %38 = vector.broadcast %17 : vector<1x128xf32> to vector<16x128xf32>
    %39 = arith.addf %37, %38 : vector<16x128xf32>
    %c0_20 = arith.constant 0 : index
    %c0_21 = arith.constant 0 : index
    %40 = vector.load %arg8[%c0_20, %c0_21] : memref<16x128xf32, #tpu.memory_space<vmem>>, vector<16x128xf32>
    tpu.vector_store %arg8[%c0_20, %c0_21], %39 {strides = array<i32>} : memref<16x128xf32, #tpu.memory_space<vmem>>, vector<16x128xf32>,
    return
  }
  func.func @transform_0(%arg0: i32) -> (i32, i32) {
    %c0_i32 = arith.constant 0 : i32
    %c0_i32_0 = arith.constant 0 : i32
    return %arg0, %c0_i32 : i32, i32
  }
  func.func @transform_1(%arg0: i32) -> (i32, i32) {
    %c0_i32 = arith.constant 0 : i32
    %c0_i32_0 = arith.constant 0 : i32
    %c0_i32_1 = arith.constant 0 : i32
    return %c0_i32, %c0_i32_0 : i32, i32
  }
  func.func @transform_2(%arg0: i32) -> (i32, i32) {
    %c0_i32 = arith.constant 0 : i32
    %c0_i32_0 = arith.constant 0 : i32
    %c0_i32_1 = arith.constant 0 : i32
    return %c0_i32, %c0_i32_0 : i32, i32
  }
  func.func @transform_3(%arg0: i32) -> (i32, i32) {
    %c0_i32 = arith.constant 0 : i32
    %c0_i32_0 = arith.constant 0 : i32
    %c0_i32_1 = arith.constant 0 : i32
    return %c0_i32, %c0_i32_0 : i32, i32
  }
  func.func @transform_4(%arg0: i32) -> (i32, i32) {
    %c0_i32 = arith.constant 0 : i32
    %c0_i32_0 = arith.constant 0 : i32
    %c0_i32_1 = arith.constant 0 : i32
    return %c0_i32, %c0_i32_0 : i32, i32
  }
  func.func @transform_5(%arg0: i32) -> (i32, i32) {
    %c0_i32 = arith.constant 0 : i32
    %c0_i32_0 = arith.constant 0 : i32
    %c0_i32_1 = arith.constant 0 : i32
    return %c0_i32, %c0_i32_0 : i32, i32
  }
  func.func @transform_6(%arg0: i32) -> (i32, i32) {
    %c0_i32 = arith.constant 0 : i32
    %c0_i32_0 = arith.constant 0 : i32
    %c0_i32_1 = arith.constant 0 : i32
    return %c0_i32, %c0_i32_0 : i32, i32
  }
  func.func @transform_7(%arg0: i32) -> (i32, i32) {
    %c0_i32 = arith.constant 0 : i32
    %c0_i32_0 = arith.constant 0 : i32
    return %arg0, %c0_i32 : i32, i32
  }
}

module attributes {stable_mosaic.version = 11 : i64} {
  func.func @_matmul_kernel(%arg0: i32, %arg1: i32, %arg2: i32, %arg3: memref<16x128xf32, #tpu.memory_space<vmem>>, %arg4: memref<128x256xbf16, #tpu.memory_space<vmem>>, %arg5: memref<1x256xf32, #tpu.memory_space<vmem>>, %arg6: memref<16x256xf32, #tpu.memory_space<vmem>>, %arg7: memref<16x256xf32, #tpu.memory_space<vmem>>) attributes {dimension_semantics = [#tpu.dimension_semantics<parallel>, #tpu.dimension_semantics<parallel>, #tpu.dimension_semantics<arbitrary>], iteration_bounds = array<i64: 1, 1, 1>, scalar_prefetch = 0 : i64, scratch_operands = 1 : i64, tpu.core_type = #tpu.core_type<tc>, window_params = [{transform_indices = @transform_0, window_bounds = array<i64: 16, 128>}, {transform_indices = @transform_1, window_bounds = array<i64: 128, 256>}, {transform_indices = @transform_2, window_bounds = array<i64: 1, 256>}, {transform_indices = @transform_3, window_bounds = array<i64: 16, 256>}]} {
    %c0_i32 = arith.constant 0 : i32
    %0 = arith.cmpi eq, %arg2, %c0_i32 : i32
    %1 = arith.extui %0 : i1 to i32
    %c0_i32_0 = arith.constant 0 : i32
    %2 = arith.cmpi ne, %1, %c0_i32_0 : i32
    scf.if %2 {
      %cst_10 = arith.constant 0.000000e+00 : f32
      %13 = vector.broadcast %cst_10 : f32 to vector<16x256xf32>
      %c0_11 = arith.constant 0 : index
      %c0_12 = arith.constant 0 : index
      %14 = vector.load %arg7[%c0_11, %c0_12] : memref<16x256xf32, #tpu.memory_space<vmem>>, vector<16x256xf32>
      tpu.vector_store %arg7[%c0_11, %c0_12], %13 {strides = array<i32>} : memref<16x256xf32, #tpu.memory_space<vmem>>, vector<16x256xf32>,
    } else {
    }
    %c0 = arith.constant 0 : index
    %c0_1 = arith.constant 0 : index
    %3 = vector.load %arg7[%c0, %c0_1] : memref<16x256xf32, #tpu.memory_space<vmem>>, vector<16x256xf32>
    %c0_2 = arith.constant 0 : index
    %c0_3 = arith.constant 0 : index
    %4 = vector.load %arg3[%c0_2, %c0_3] : memref<16x128xf32, #tpu.memory_space<vmem>>, vector<16x128xf32>
    %5 = arith.truncf %4 : vector<16x128xf32> to vector<16x128xbf16>
    %c0_4 = arith.constant 0 : index
    %c0_5 = arith.constant 0 : index
    %6 = vector.load %arg4[%c0_4, %c0_5] : memref<128x256xbf16, #tpu.memory_space<vmem>>, vector<128x256xbf16>
    %cst = arith.constant dense<0.000000e+00> : vector<16x256xf32>
    %7 = tpu.matmul %5, %6, %cst {dimension_numbers = #tpu.dot_dimension_numbers<[1], [0], [0], [1], [0, 0, 1, 1], [], []>} : vector<16x128xbf16>, vector<128x256xbf16>, vector<16x256xf32> -> vector<16x256xf32>
    %8 = arith.addf %3, %7 : vector<16x256xf32>
    %c0_6 = arith.constant 0 : index
    %c0_7 = arith.constant 0 : index
    %9 = vector.load %arg7[%c0_6, %c0_7] : memref<16x256xf32, #tpu.memory_space<vmem>>, vector<16x256xf32>
    tpu.vector_store %arg7[%c0_6, %c0_7], %8 {strides = array<i32>} : memref<16x256xf32, #tpu.memory_space<vmem>>, vector<16x256xf32>,
    %c0_i32_8 = arith.constant 0 : i32
    %10 = arith.cmpi eq, %arg2, %c0_i32_8 : i32
    %11 = arith.extui %10 : i1 to i32
    %c0_i32_9 = arith.constant 0 : i32
    %12 = arith.cmpi ne, %11, %c0_i32_9 : i32
    scf.if %12 {
      %c0_10 = arith.constant 0 : index
      %c0_11 = arith.constant 0 : index
      %13 = vector.load %arg7[%c0_10, %c0_11] : memref<16x256xf32, #tpu.memory_space<vmem>>, vector<16x256xf32>
      %c0_12 = arith.constant 0 : index
      %c0_13 = arith.constant 0 : index
      %14 = vector.load %arg5[%c0_12, %c0_13] : memref<1x256xf32, #tpu.memory_space<vmem>>, vector<1x256xf32>
      %15 = vector.broadcast %14 : vector<1x256xf32> to vector<16x256xf32>
      %16 = arith.addf %13, %15 : vector<16x256xf32>
      %c0_14 = arith.constant 0 : index
      %c0_15 = arith.constant 0 : index
      %17 = vector.load %arg6[%c0_14, %c0_15] : memref<16x256xf32, #tpu.memory_space<vmem>>, vector<16x256xf32>
      tpu.vector_store %arg6[%c0_14, %c0_15], %16 {strides = array<i32>} : memref<16x256xf32, #tpu.memory_space<vmem>>, vector<16x256xf32>,
    } else {
    }
    return
  }
  func.func @transform_0(%arg0: i32, %arg1: i32, %arg2: i32) -> (i32, i32) {
    %c0_i32 = arith.constant 0 : i32
    return %arg0, %arg2 : i32, i32
  }
  func.func @transform_1(%arg0: i32, %arg1: i32, %arg2: i32) -> (i32, i32) {
    %c0_i32 = arith.constant 0 : i32
    return %arg2, %arg1 : i32, i32
  }
  func.func @transform_2(%arg0: i32, %arg1: i32, %arg2: i32) -> (i32, i32) {
    %c0_i32 = arith.constant 0 : i32
    %c0_i32_0 = arith.constant 0 : i32
    return %c0_i32, %arg1 : i32, i32
  }
  func.func @transform_3(%arg0: i32, %arg1: i32, %arg2: i32) -> (i32, i32) {
    %c0_i32 = arith.constant 0 : i32
    return %arg0, %arg1 : i32, i32
  }
}

module attributes {stable_mosaic.version = 11 : i64} {
  func.func @_ln_kernel(%arg0: i32, %arg1: memref<16x128xf32, #tpu.memory_space<vmem>>, %arg2: memref<1x128xf32, #tpu.memory_space<vmem>>, %arg3: memref<1x128xf32, #tpu.memory_space<vmem>>, %arg4: memref<16x128xf32, #tpu.memory_space<vmem>>) attributes {dimension_semantics = [#tpu.dimension_semantics<parallel>], iteration_bounds = array<i64: 1>, scalar_prefetch = 0 : i64, scratch_operands = 0 : i64, tpu.core_type = #tpu.core_type<tc>, window_params = [{transform_indices = @transform_0, window_bounds = array<i64: 16, 128>}, {pipeline_mode = #tpu.pipeline_mode<synchronous>, transform_indices = @transform_1, window_bounds = array<i64: 1, 128>}, {pipeline_mode = #tpu.pipeline_mode<synchronous>, transform_indices = @transform_2, window_bounds = array<i64: 1, 128>}, {transform_indices = @transform_3, window_bounds = array<i64: 16, 128>}]} {
    %c0 = arith.constant 0 : index
    %c0_0 = arith.constant 0 : index
    %0 = vector.load %arg1[%c0, %c0_0] : memref<16x128xf32, #tpu.memory_space<vmem>>, vector<16x128xf32>
    %c0_1 = arith.constant 0 : index
    %c0_2 = arith.constant 0 : index
    %1 = vector.load %arg2[%c0_1, %c0_2] : memref<1x128xf32, #tpu.memory_space<vmem>>, vector<1x128xf32>
    %c0_3 = arith.constant 0 : index
    %c0_4 = arith.constant 0 : index
    %2 = vector.load %arg3[%c0_3, %c0_4] : memref<1x128xf32, #tpu.memory_space<vmem>>, vector<1x128xf32>
    %cst = arith.constant dense<0.000000e+00> : vector<16xf32>
    %3 = vector.multi_reduction <add>, %0, %cst [1] : vector<16x128xf32> to vector<16xf32>
    %4 = vector.shape_cast %3 : vector<16xf32> to vector<16x1xf32>
    %cst_5 = arith.constant 1.280000e+02 : f32
    %5 = vector.broadcast %cst_5 : f32 to vector<16x1xf32>
    %6 = arith.divf %4, %5 : vector<16x1xf32>
    %7 = vector.broadcast %6 : vector<16x1xf32> to vector<16x128xf32>
    %8 = arith.subf %0, %7 : vector<16x128xf32>
    %9 = arith.mulf %8, %8 : vector<16x128xf32>
    %cst_6 = arith.constant dense<0.000000e+00> : vector<16xf32>
    %10 = vector.multi_reduction <add>, %9, %cst_6 [1] : vector<16x128xf32> to vector<16xf32>
    %11 = vector.shape_cast %10 : vector<16xf32> to vector<16x1xf32>
    %cst_7 = arith.constant 1.280000e+02 : f32
    %12 = vector.broadcast %cst_7 : f32 to vector<16x1xf32>
    %13 = arith.divf %11, %12 : vector<16x1xf32>
    %14 = vector.broadcast %6 : vector<16x1xf32> to vector<16x128xf32>
    %15 = arith.subf %0, %14 : vector<16x128xf32>
    %cst_8 = arith.constant 9.99999974E-6 : f32
    %16 = vector.broadcast %cst_8 : f32 to vector<16x1xf32>
    %17 = arith.addf %13, %16 : vector<16x1xf32>
    %18 = math.rsqrt %17 : vector<16x1xf32>
    %19 = vector.broadcast %18 : vector<16x1xf32> to vector<16x128xf32>
    %20 = arith.mulf %15, %19 : vector<16x128xf32>
    %21 = vector.broadcast %1 : vector<1x128xf32> to vector<16x128xf32>
    %22 = arith.mulf %20, %21 : vector<16x128xf32>
    %23 = vector.broadcast %2 : vector<1x128xf32> to vector<16x128xf32>
    %24 = arith.addf %22, %23 : vector<16x128xf32>
    %c0_9 = arith.constant 0 : index
    %c0_10 = arith.constant 0 : index
    %25 = vector.load %arg4[%c0_9, %c0_10] : memref<16x128xf32, #tpu.memory_space<vmem>>, vector<16x128xf32>
    tpu.vector_store %arg4[%c0_9, %c0_10], %24 {strides = array<i32>} : memref<16x128xf32, #tpu.memory_space<vmem>>, vector<16x128xf32>,
    return
  }
  func.func @transform_0(%arg0: i32) -> (i32, i32) {
    %c0_i32 = arith.constant 0 : i32
    %c0_i32_0 = arith.constant 0 : i32
    return %arg0, %c0_i32 : i32, i32
  }
  func.func @transform_1(%arg0: i32) -> (i32, i32) {
    %c0_i32 = arith.constant 0 : i32
    %c0_i32_0 = arith.constant 0 : i32
    %c0_i32_1 = arith.constant 0 : i32
    return %c0_i32, %c0_i32_0 : i32, i32
  }
  func.func @transform_2(%arg0: i32) -> (i32, i32) {
    %c0_i32 = arith.constant 0 : i32
    %c0_i32_0 = arith.constant 0 : i32
    %c0_i32_1 = arith.constant 0 : i32
    return %c0_i32, %c0_i32_0 : i32, i32
  }
  func.func @transform_3(%arg0: i32) -> (i32, i32) {
    %c0_i32 = arith.constant 0 : i32
    %c0_i32_0 = arith.constant 0 : i32
    return %arg0, %c0_i32 : i32, i32
  }
}

module attributes {stable_mosaic.version = 11 : i64} {
  func.func @_cross_attn_kernel(%arg0: i32, %arg1: memref<1x8x128xf32, #tpu.memory_space<vmem>>, %arg2: memref<1x8x256xf32, #tpu.memory_space<vmem>>, %arg3: memref<1x8x128xf32, #tpu.memory_space<vmem>>) attributes {dimension_semantics = [#tpu.dimension_semantics<parallel>], iteration_bounds = array<i64: 2>, scalar_prefetch = 0 : i64, scratch_operands = 0 : i64, tpu.core_type = #tpu.core_type<tc>, window_params = [{transform_indices = @transform_0, window_bounds = array<i64: 1, 8, 128>}, {transform_indices = @transform_1, window_bounds = array<i64: 1, 8, 256>}, {transform_indices = @transform_2, window_bounds = array<i64: 1, 8, 128>}]} {
    %c0 = arith.constant 0 : index
    %c0_0 = arith.constant 0 : index
    %c0_1 = arith.constant 0 : index
    %0 = vector.load %arg1[%c0, %c0_0, %c0_1] : memref<1x8x128xf32, #tpu.memory_space<vmem>>, vector<1x8x128xf32>
    %1 = vector.shape_cast %0 : vector<1x8x128xf32> to vector<8x128xf32>
    %c0_2 = arith.constant 0 : index
    %c0_3 = arith.constant 0 : index
    %c0_4 = arith.constant 0 : index
    %2 = vector.load %arg2[%c0_2, %c0_3, %c0_4] : memref<1x8x256xf32, #tpu.memory_space<vmem>>, vector<1x8x256xf32>
    %3 = vector.shape_cast %2 : vector<1x8x256xf32> to vector<8x256xf32>
    %4 = vector.extract_strided_slice %3 {offsets = [0, 0], sizes = [8, 128], strides = [1, 1]} : vector<8x256xf32> to vector<8x128xf32>
    %5 = vector.extract_strided_slice %3 {offsets = [0, 128], sizes = [8, 128], strides = [1, 1]} : vector<8x256xf32> to vector<8x128xf32>
    %6 = vector.extract_strided_slice %1 {offsets = [0, 0], sizes = [8, 16], strides = [1, 1]} : vector<8x128xf32> to vector<8x16xf32>
    %7 = arith.truncf %6 : vector<8x16xf32> to vector<8x16xbf16>
    %8 = vector.extract_strided_slice %4 {offsets = [0, 0], sizes = [8, 16], strides = [1, 1]} : vector<8x128xf32> to vector<8x16xf32>
    %9 = arith.truncf %8 : vector<8x16xf32> to vector<8x16xbf16>
    %10 = vector.extract_strided_slice %5 {offsets = [0, 0], sizes = [8, 16], strides = [1, 1]} : vector<8x128xf32> to vector<8x16xf32>
    %11 = arith.truncf %10 : vector<8x16xf32> to vector<8x16xbf16>
    %cst = arith.constant dense<0.000000e+00> : vector<8x8xf32>
    %12 = tpu.matmul %7, %9, %cst {dimension_numbers = #tpu.dot_dimension_numbers<[1], [1], [0], [0], [0, 0, 1, 0], [], []>} : vector<8x16xbf16>, vector<8x16xbf16>, vector<8x8xf32> -> vector<8x8xf32>
    %cst_5 = arith.constant 2.500000e-01 : f32
    %13 = vector.broadcast %cst_5 : f32 to vector<8x8xf32>
    %14 = arith.mulf %12, %13 : vector<8x8xf32>
    %cst_6 = arith.constant dense<0xFF800000> : vector<8xf32>
    %15 = vector.multi_reduction <maximumf>, %14, %cst_6 [1] : vector<8x8xf32> to vector<8xf32>
    %16 = vector.shape_cast %15 : vector<8xf32> to vector<8x1xf32>
    %17 = vector.broadcast %16 : vector<8x1xf32> to vector<8x8xf32>
    %18 = arith.subf %14, %17 : vector<8x8xf32>
    %19 = math.exp %18 : vector<8x8xf32>
    %cst_7 = arith.constant dense<0.000000e+00> : vector<8xf32>
    %20 = vector.multi_reduction <add>, %19, %cst_7 [1] : vector<8x8xf32> to vector<8xf32>
    %21 = vector.shape_cast %20 : vector<8xf32> to vector<8x1xf32>
    %22 = tpu.reciprocal %21 {approx = true} : vector<8x1xf32> -> vector<8x1xf32>
    %23 = vector.broadcast %22 : vector<8x1xf32> to vector<8x8xf32>
    %24 = arith.mulf %19, %23 : vector<8x8xf32>
    %25 = arith.truncf %24 : vector<8x8xf32> to vector<8x8xbf16>
    %cst_8 = arith.constant dense<0.000000e+00> : vector<8x16xf32>
    %26 = tpu.matmul %25, %11, %cst_8 {dimension_numbers = #tpu.dot_dimension_numbers<[1], [0], [0], [1], [0, 0, 1, 1], [], []>} : vector<8x8xbf16>, vector<8x16xbf16>, vector<8x16xf32> -> vector<8x16xf32>
    %27 = vector.extract_strided_slice %1 {offsets = [0, 16], sizes = [8, 16], strides = [1, 1]} : vector<8x128xf32> to vector<8x16xf32>
    %28 = arith.truncf %27 : vector<8x16xf32> to vector<8x16xbf16>
    %29 = vector.extract_strided_slice %4 {offsets = [0, 16], sizes = [8, 16], strides = [1, 1]} : vector<8x128xf32> to vector<8x16xf32>
    %30 = arith.truncf %29 : vector<8x16xf32> to vector<8x16xbf16>
    %31 = vector.extract_strided_slice %5 {offsets = [0, 16], sizes = [8, 16], strides = [1, 1]} : vector<8x128xf32> to vector<8x16xf32>
    %32 = arith.truncf %31 : vector<8x16xf32> to vector<8x16xbf16>
    %cst_9 = arith.constant dense<0.000000e+00> : vector<8x8xf32>
    %33 = tpu.matmul %28, %30, %cst_9 {dimension_numbers = #tpu.dot_dimension_numbers<[1], [1], [0], [0], [0, 0, 1, 0], [], []>} : vector<8x16xbf16>, vector<8x16xbf16>, vector<8x8xf32> -> vector<8x8xf32>
    %cst_10 = arith.constant 2.500000e-01 : f32
    %34 = vector.broadcast %cst_10 : f32 to vector<8x8xf32>
    %35 = arith.mulf %33, %34 : vector<8x8xf32>
    %cst_11 = arith.constant dense<0xFF800000> : vector<8xf32>
    %36 = vector.multi_reduction <maximumf>, %35, %cst_11 [1] : vector<8x8xf32> to vector<8xf32>
    %37 = vector.shape_cast %36 : vector<8xf32> to vector<8x1xf32>
    %38 = vector.broadcast %37 : vector<8x1xf32> to vector<8x8xf32>
    %39 = arith.subf %35, %38 : vector<8x8xf32>
    %40 = math.exp %39 : vector<8x8xf32>
    %cst_12 = arith.constant dense<0.000000e+00> : vector<8xf32>
    %41 = vector.multi_reduction <add>, %40, %cst_12 [1] : vector<8x8xf32> to vector<8xf32>
    %42 = vector.shape_cast %41 : vector<8xf32> to vector<8x1xf32>
    %43 = tpu.reciprocal %42 {approx = true} : vector<8x1xf32> -> vector<8x1xf32>
    %44 = vector.broadcast %43 : vector<8x1xf32> to vector<8x8xf32>
    %45 = arith.mulf %40, %44 : vector<8x8xf32>
    %46 = arith.truncf %45 : vector<8x8xf32> to vector<8x8xbf16>
    %cst_13 = arith.constant dense<0.000000e+00> : vector<8x16xf32>
    %47 = tpu.matmul %46, %32, %cst_13 {dimension_numbers = #tpu.dot_dimension_numbers<[1], [0], [0], [1], [0, 0, 1, 1], [], []>} : vector<8x8xbf16>, vector<8x16xbf16>, vector<8x16xf32> -> vector<8x16xf32>
    %48 = vector.extract_strided_slice %1 {offsets = [0, 32], sizes = [8, 16], strides = [1, 1]} : vector<8x128xf32> to vector<8x16xf32>
    %49 = arith.truncf %48 : vector<8x16xf32> to vector<8x16xbf16>
    %50 = vector.extract_strided_slice %4 {offsets = [0, 32], sizes = [8, 16], strides = [1, 1]} : vector<8x128xf32> to vector<8x16xf32>
    %51 = arith.truncf %50 : vector<8x16xf32> to vector<8x16xbf16>
    %52 = vector.extract_strided_slice %5 {offsets = [0, 32], sizes = [8, 16], strides = [1, 1]} : vector<8x128xf32> to vector<8x16xf32>
    %53 = arith.truncf %52 : vector<8x16xf32> to vector<8x16xbf16>
    %cst_14 = arith.constant dense<0.000000e+00> : vector<8x8xf32>
    %54 = tpu.matmul %49, %51, %cst_14 {dimension_numbers = #tpu.dot_dimension_numbers<[1], [1], [0], [0], [0, 0, 1, 0], [], []>} : vector<8x16xbf16>, vector<8x16xbf16>, vector<8x8xf32> -> vector<8x8xf32>
    %cst_15 = arith.constant 2.500000e-01 : f32
    %55 = vector.broadcast %cst_15 : f32 to vector<8x8xf32>
    %56 = arith.mulf %54, %55 : vector<8x8xf32>
    %cst_16 = arith.constant dense<0xFF800000> : vector<8xf32>
    %57 = vector.multi_reduction <maximumf>, %56, %cst_16 [1] : vector<8x8xf32> to vector<8xf32>
    %58 = vector.shape_cast %57 : vector<8xf32> to vector<8x1xf32>
    %59 = vector.broadcast %58 : vector<8x1xf32> to vector<8x8xf32>
    %60 = arith.subf %56, %59 : vector<8x8xf32>
    %61 = math.exp %60 : vector<8x8xf32>
    %cst_17 = arith.constant dense<0.000000e+00> : vector<8xf32>
    %62 = vector.multi_reduction <add>, %61, %cst_17 [1] : vector<8x8xf32> to vector<8xf32>
    %63 = vector.shape_cast %62 : vector<8xf32> to vector<8x1xf32>
    %64 = tpu.reciprocal %63 {approx = true} : vector<8x1xf32> -> vector<8x1xf32>
    %65 = vector.broadcast %64 : vector<8x1xf32> to vector<8x8xf32>
    %66 = arith.mulf %61, %65 : vector<8x8xf32>
    %67 = arith.truncf %66 : vector<8x8xf32> to vector<8x8xbf16>
    %cst_18 = arith.constant dense<0.000000e+00> : vector<8x16xf32>
    %68 = tpu.matmul %67, %53, %cst_18 {dimension_numbers = #tpu.dot_dimension_numbers<[1], [0], [0], [1], [0, 0, 1, 1], [], []>} : vector<8x8xbf16>, vector<8x16xbf16>, vector<8x16xf32> -> vector<8x16xf32>
    %69 = vector.extract_strided_slice %1 {offsets = [0, 48], sizes = [8, 16], strides = [1, 1]} : vector<8x128xf32> to vector<8x16xf32>
    %70 = arith.truncf %69 : vector<8x16xf32> to vector<8x16xbf16>
    %71 = vector.extract_strided_slice %4 {offsets = [0, 48], sizes = [8, 16], strides = [1, 1]} : vector<8x128xf32> to vector<8x16xf32>
    %72 = arith.truncf %71 : vector<8x16xf32> to vector<8x16xbf16>
    %73 = vector.extract_strided_slice %5 {offsets = [0, 48], sizes = [8, 16], strides = [1, 1]} : vector<8x128xf32> to vector<8x16xf32>
    %74 = arith.truncf %73 : vector<8x16xf32> to vector<8x16xbf16>
    %cst_19 = arith.constant dense<0.000000e+00> : vector<8x8xf32>
    %75 = tpu.matmul %70, %72, %cst_19 {dimension_numbers = #tpu.dot_dimension_numbers<[1], [1], [0], [0], [0, 0, 1, 0], [], []>} : vector<8x16xbf16>, vector<8x16xbf16>, vector<8x8xf32> -> vector<8x8xf32>
    %cst_20 = arith.constant 2.500000e-01 : f32
    %76 = vector.broadcast %cst_20 : f32 to vector<8x8xf32>
    %77 = arith.mulf %75, %76 : vector<8x8xf32>
    %cst_21 = arith.constant dense<0xFF800000> : vector<8xf32>
    %78 = vector.multi_reduction <maximumf>, %77, %cst_21 [1] : vector<8x8xf32> to vector<8xf32>
    %79 = vector.shape_cast %78 : vector<8xf32> to vector<8x1xf32>
    %80 = vector.broadcast %79 : vector<8x1xf32> to vector<8x8xf32>
    %81 = arith.subf %77, %80 : vector<8x8xf32>
    %82 = math.exp %81 : vector<8x8xf32>
    %cst_22 = arith.constant dense<0.000000e+00> : vector<8xf32>
    %83 = vector.multi_reduction <add>, %82, %cst_22 [1] : vector<8x8xf32> to vector<8xf32>
    %84 = vector.shape_cast %83 : vector<8xf32> to vector<8x1xf32>
    %85 = tpu.reciprocal %84 {approx = true} : vector<8x1xf32> -> vector<8x1xf32>
    %86 = vector.broadcast %85 : vector<8x1xf32> to vector<8x8xf32>
    %87 = arith.mulf %82, %86 : vector<8x8xf32>
    %88 = arith.truncf %87 : vector<8x8xf32> to vector<8x8xbf16>
    %cst_23 = arith.constant dense<0.000000e+00> : vector<8x16xf32>
    %89 = tpu.matmul %88, %74, %cst_23 {dimension_numbers = #tpu.dot_dimension_numbers<[1], [0], [0], [1], [0, 0, 1, 1], [], []>} : vector<8x8xbf16>, vector<8x16xbf16>, vector<8x16xf32> -> vector<8x16xf32>
    %90 = vector.extract_strided_slice %1 {offsets = [0, 64], sizes = [8, 16], strides = [1, 1]} : vector<8x128xf32> to vector<8x16xf32>
    %91 = arith.truncf %90 : vector<8x16xf32> to vector<8x16xbf16>
    %92 = vector.extract_strided_slice %4 {offsets = [0, 64], sizes = [8, 16], strides = [1, 1]} : vector<8x128xf32> to vector<8x16xf32>
    %93 = arith.truncf %92 : vector<8x16xf32> to vector<8x16xbf16>
    %94 = vector.extract_strided_slice %5 {offsets = [0, 64], sizes = [8, 16], strides = [1, 1]} : vector<8x128xf32> to vector<8x16xf32>
    %95 = arith.truncf %94 : vector<8x16xf32> to vector<8x16xbf16>
    %cst_24 = arith.constant dense<0.000000e+00> : vector<8x8xf32>
    %96 = tpu.matmul %91, %93, %cst_24 {dimension_numbers = #tpu.dot_dimension_numbers<[1], [1], [0], [0], [0, 0, 1, 0], [], []>} : vector<8x16xbf16>, vector<8x16xbf16>, vector<8x8xf32> -> vector<8x8xf32>
    %cst_25 = arith.constant 2.500000e-01 : f32
    %97 = vector.broadcast %cst_25 : f32 to vector<8x8xf32>
    %98 = arith.mulf %96, %97 : vector<8x8xf32>
    %cst_26 = arith.constant dense<0xFF800000> : vector<8xf32>
    %99 = vector.multi_reduction <maximumf>, %98, %cst_26 [1] : vector<8x8xf32> to vector<8xf32>
    %100 = vector.shape_cast %99 : vector<8xf32> to vector<8x1xf32>
    %101 = vector.broadcast %100 : vector<8x1xf32> to vector<8x8xf32>
    %102 = arith.subf %98, %101 : vector<8x8xf32>
    %103 = math.exp %102 : vector<8x8xf32>
    %cst_27 = arith.constant dense<0.000000e+00> : vector<8xf32>
    %104 = vector.multi_reduction <add>, %103, %cst_27 [1] : vector<8x8xf32> to vector<8xf32>
    %105 = vector.shape_cast %104 : vector<8xf32> to vector<8x1xf32>
    %106 = tpu.reciprocal %105 {approx = true} : vector<8x1xf32> -> vector<8x1xf32>
    %107 = vector.broadcast %106 : vector<8x1xf32> to vector<8x8xf32>
    %108 = arith.mulf %103, %107 : vector<8x8xf32>
    %109 = arith.truncf %108 : vector<8x8xf32> to vector<8x8xbf16>
    %cst_28 = arith.constant dense<0.000000e+00> : vector<8x16xf32>
    %110 = tpu.matmul %109, %95, %cst_28 {dimension_numbers = #tpu.dot_dimension_numbers<[1], [0], [0], [1], [0, 0, 1, 1], [], []>} : vector<8x8xbf16>, vector<8x16xbf16>, vector<8x16xf32> -> vector<8x16xf32>
    %111 = vector.extract_strided_slice %1 {offsets = [0, 80], sizes = [8, 16], strides = [1, 1]} : vector<8x128xf32> to vector<8x16xf32>
    %112 = arith.truncf %111 : vector<8x16xf32> to vector<8x16xbf16>
    %113 = vector.extract_strided_slice %4 {offsets = [0, 80], sizes = [8, 16], strides = [1, 1]} : vector<8x128xf32> to vector<8x16xf32>
    %114 = arith.truncf %113 : vector<8x16xf32> to vector<8x16xbf16>
    %115 = vector.extract_strided_slice %5 {offsets = [0, 80], sizes = [8, 16], strides = [1, 1]} : vector<8x128xf32> to vector<8x16xf32>
    %116 = arith.truncf %115 : vector<8x16xf32> to vector<8x16xbf16>
    %cst_29 = arith.constant dense<0.000000e+00> : vector<8x8xf32>
    %117 = tpu.matmul %112, %114, %cst_29 {dimension_numbers = #tpu.dot_dimension_numbers<[1], [1], [0], [0], [0, 0, 1, 0], [], []>} : vector<8x16xbf16>, vector<8x16xbf16>, vector<8x8xf32> -> vector<8x8xf32>
    %cst_30 = arith.constant 2.500000e-01 : f32
    %118 = vector.broadcast %cst_30 : f32 to vector<8x8xf32>
    %119 = arith.mulf %117, %118 : vector<8x8xf32>
    %cst_31 = arith.constant dense<0xFF800000> : vector<8xf32>
    %120 = vector.multi_reduction <maximumf>, %119, %cst_31 [1] : vector<8x8xf32> to vector<8xf32>
    %121 = vector.shape_cast %120 : vector<8xf32> to vector<8x1xf32>
    %122 = vector.broadcast %121 : vector<8x1xf32> to vector<8x8xf32>
    %123 = arith.subf %119, %122 : vector<8x8xf32>
    %124 = math.exp %123 : vector<8x8xf32>
    %cst_32 = arith.constant dense<0.000000e+00> : vector<8xf32>
    %125 = vector.multi_reduction <add>, %124, %cst_32 [1] : vector<8x8xf32> to vector<8xf32>
    %126 = vector.shape_cast %125 : vector<8xf32> to vector<8x1xf32>
    %127 = tpu.reciprocal %126 {approx = true} : vector<8x1xf32> -> vector<8x1xf32>
    %128 = vector.broadcast %127 : vector<8x1xf32> to vector<8x8xf32>
    %129 = arith.mulf %124, %128 : vector<8x8xf32>
    %130 = arith.truncf %129 : vector<8x8xf32> to vector<8x8xbf16>
    %cst_33 = arith.constant dense<0.000000e+00> : vector<8x16xf32>
    %131 = tpu.matmul %130, %116, %cst_33 {dimension_numbers = #tpu.dot_dimension_numbers<[1], [0], [0], [1], [0, 0, 1, 1], [], []>} : vector<8x8xbf16>, vector<8x16xbf16>, vector<8x16xf32> -> vector<8x16xf32>
    %132 = vector.extract_strided_slice %1 {offsets = [0, 96], sizes = [8, 16], strides = [1, 1]} : vector<8x128xf32> to vector<8x16xf32>
    %133 = arith.truncf %132 : vector<8x16xf32> to vector<8x16xbf16>
    %134 = vector.extract_strided_slice %4 {offsets = [0, 96], sizes = [8, 16], strides = [1, 1]} : vector<8x128xf32> to vector<8x16xf32>
    %135 = arith.truncf %134 : vector<8x16xf32> to vector<8x16xbf16>
    %136 = vector.extract_strided_slice %5 {offsets = [0, 96], sizes = [8, 16], strides = [1, 1]} : vector<8x128xf32> to vector<8x16xf32>
    %137 = arith.truncf %136 : vector<8x16xf32> to vector<8x16xbf16>
    %cst_34 = arith.constant dense<0.000000e+00> : vector<8x8xf32>
    %138 = tpu.matmul %133, %135, %cst_34 {dimension_numbers = #tpu.dot_dimension_numbers<[1], [1], [0], [0], [0, 0, 1, 0], [], []>} : vector<8x16xbf16>, vector<8x16xbf16>, vector<8x8xf32> -> vector<8x8xf32>
    %cst_35 = arith.constant 2.500000e-01 : f32
    %139 = vector.broadcast %cst_35 : f32 to vector<8x8xf32>
    %140 = arith.mulf %138, %139 : vector<8x8xf32>
    %cst_36 = arith.constant dense<0xFF800000> : vector<8xf32>
    %141 = vector.multi_reduction <maximumf>, %140, %cst_36 [1] : vector<8x8xf32> to vector<8xf32>
    %142 = vector.shape_cast %141 : vector<8xf32> to vector<8x1xf32>
    %143 = vector.broadcast %142 : vector<8x1xf32> to vector<8x8xf32>
    %144 = arith.subf %140, %143 : vector<8x8xf32>
    %145 = math.exp %144 : vector<8x8xf32>
    %cst_37 = arith.constant dense<0.000000e+00> : vector<8xf32>
    %146 = vector.multi_reduction <add>, %145, %cst_37 [1] : vector<8x8xf32> to vector<8xf32>
    %147 = vector.shape_cast %146 : vector<8xf32> to vector<8x1xf32>
    %148 = tpu.reciprocal %147 {approx = true} : vector<8x1xf32> -> vector<8x1xf32>
    %149 = vector.broadcast %148 : vector<8x1xf32> to vector<8x8xf32>
    %150 = arith.mulf %145, %149 : vector<8x8xf32>
    %151 = arith.truncf %150 : vector<8x8xf32> to vector<8x8xbf16>
    %cst_38 = arith.constant dense<0.000000e+00> : vector<8x16xf32>
    %152 = tpu.matmul %151, %137, %cst_38 {dimension_numbers = #tpu.dot_dimension_numbers<[1], [0], [0], [1], [0, 0, 1, 1], [], []>} : vector<8x8xbf16>, vector<8x16xbf16>, vector<8x16xf32> -> vector<8x16xf32>
    %153 = vector.extract_strided_slice %1 {offsets = [0, 112], sizes = [8, 16], strides = [1, 1]} : vector<8x128xf32> to vector<8x16xf32>
    %154 = arith.truncf %153 : vector<8x16xf32> to vector<8x16xbf16>
    %155 = vector.extract_strided_slice %4 {offsets = [0, 112], sizes = [8, 16], strides = [1, 1]} : vector<8x128xf32> to vector<8x16xf32>
    %156 = arith.truncf %155 : vector<8x16xf32> to vector<8x16xbf16>
    %157 = vector.extract_strided_slice %5 {offsets = [0, 112], sizes = [8, 16], strides = [1, 1]} : vector<8x128xf32> to vector<8x16xf32>
    %158 = arith.truncf %157 : vector<8x16xf32> to vector<8x16xbf16>
    %cst_39 = arith.constant dense<0.000000e+00> : vector<8x8xf32>
    %159 = tpu.matmul %154, %156, %cst_39 {dimension_numbers = #tpu.dot_dimension_numbers<[1], [1], [0], [0], [0, 0, 1, 0], [], []>} : vector<8x16xbf16>, vector<8x16xbf16>, vector<8x8xf32> -> vector<8x8xf32>
    %cst_40 = arith.constant 2.500000e-01 : f32
    %160 = vector.broadcast %cst_40 : f32 to vector<8x8xf32>
    %161 = arith.mulf %159, %160 : vector<8x8xf32>
    %cst_41 = arith.constant dense<0xFF800000> : vector<8xf32>
    %162 = vector.multi_reduction <maximumf>, %161, %cst_41 [1] : vector<8x8xf32> to vector<8xf32>
    %163 = vector.shape_cast %162 : vector<8xf32> to vector<8x1xf32>
    %164 = vector.broadcast %163 : vector<8x1xf32> to vector<8x8xf32>
    %165 = arith.subf %161, %164 : vector<8x8xf32>
    %166 = math.exp %165 : vector<8x8xf32>
    %cst_42 = arith.constant dense<0.000000e+00> : vector<8xf32>
    %167 = vector.multi_reduction <add>, %166, %cst_42 [1] : vector<8x8xf32> to vector<8xf32>
    %168 = vector.shape_cast %167 : vector<8xf32> to vector<8x1xf32>
    %169 = tpu.reciprocal %168 {approx = true} : vector<8x1xf32> -> vector<8x1xf32>
    %170 = vector.broadcast %169 : vector<8x1xf32> to vector<8x8xf32>
    %171 = arith.mulf %166, %170 : vector<8x8xf32>
    %172 = arith.truncf %171 : vector<8x8xf32> to vector<8x8xbf16>
    %cst_43 = arith.constant dense<0.000000e+00> : vector<8x16xf32>
    %173 = tpu.matmul %172, %158, %cst_43 {dimension_numbers = #tpu.dot_dimension_numbers<[1], [0], [0], [1], [0, 0, 1, 1], [], []>} : vector<8x8xbf16>, vector<8x16xbf16>, vector<8x16xf32> -> vector<8x16xf32>
    %174 = tpu.concatenate %26, %47, %68, %89, %110, %131, %152, %173 in 1 : vector<8x16xf32>, vector<8x16xf32>, vector<8x16xf32>, vector<8x16xf32>, vector<8x16xf32>, vector<8x16xf32>, vector<8x16xf32>, vector<8x16xf32> -> vector<8x128xf32>
    %c0_44 = arith.constant 0 : index
    %c0_45 = arith.constant 0 : index
    %c0_46 = arith.constant 0 : index
    %175 = vector.load %arg3[%c0_44, %c0_45, %c0_46] : memref<1x8x128xf32, #tpu.memory_space<vmem>>, vector<1x8x128xf32>
    %176 = vector.shape_cast %175 : vector<1x8x128xf32> to vector<8x128xf32>
    %177 = vector.shape_cast %174 : vector<8x128xf32> to vector<1x8x128xf32>
    tpu.vector_store %arg3[%c0_44, %c0_45, %c0_46], %177 {strides = array<i32>} : memref<1x8x128xf32, #tpu.memory_space<vmem>>, vector<1x8x128xf32>,
    return
  }
  func.func @transform_0(%arg0: i32) -> (i32, i32, i32) {
    %c0_i32 = arith.constant 0 : i32
    %c0_i32_0 = arith.constant 0 : i32
    %c0_i32_1 = arith.constant 0 : i32
    return %arg0, %c0_i32, %c0_i32_0 : i32, i32, i32
  }
  func.func @transform_1(%arg0: i32) -> (i32, i32, i32) {
    %c0_i32 = arith.constant 0 : i32
    %c0_i32_0 = arith.constant 0 : i32
    %c0_i32_1 = arith.constant 0 : i32
    return %arg0, %c0_i32, %c0_i32_0 : i32, i32, i32
  }
  func.func @transform_2(%arg0: i32) -> (i32, i32, i32) {
    %c0_i32 = arith.constant 0 : i32
    %c0_i32_0 = arith.constant 0 : i32
    %c0_i32_1 = arith.constant 0 : i32
    return %arg0, %c0_i32, %c0_i32_0 : i32, i32, i32
  }
}

</mosaic_0001>

<bundles_post_ra>
// kernel: transformer_forward.20
= control target key start
LH: loop header
LB: loop body
LE: loop exit
PB: predicated region body
PF: predicated region fallthrough
CT: control target
= control target key end

     0   :  { %s792_s12 = smov 0   ;;  %s794_s13 = smov 0   ;;  %s897_s0 = inlined_call_operand.vmem [shape: f32[16,128], index: 0, kind: input, shape index: {}]   ;;  %s898_s1 = inlined_call_operand.vmem [shape: bf16[128,384], index: 1, kind: input, shape index: {}]   ;;  %s899_s2 = inlined_call_operand.vmem [shape: f32[1,384], index: 2, kind: input, shape index: {}]   ;;  %s900_s3 = inlined_call_operand.vmem [shape: f32[16,384], index: 3, kind: output, shape index: {}]  }
   0x1   :  { %s796_s14 = smov 0   ;;  %s798_s15 = smov 0  }
   0x2   :  { %s800_s16 = smov 0  }
   0x3 LB: > { %s28_s17 = sadd.s32 1, %s764_s15  ;;  %s628_s18 = sadd.s32 4294967295, %s768_s16   ;;  %s768_s16 = sphi %s800_s16, %s13_s16   ;;  %s764_s15 = sphi %s798_s15, %s905_s15   ;;  %s760_s14 = sphi %s796_s14, %s904_s14   ;;  %s756_s13 = sphi %s794_s13, %s903_s13   ;;  %s752_s12 = sphi %s792_s12, %s902_s12  }
   0x4   : > { %p30_p0 = scmp.ge.s32.totalorder %s28_s17, 3  ;;  %p76_p1 = scmp.ne.s32.totalorder %s756_s13, %s752_s12 }
   0x5   : > { %p77_p2 = scmp.eq.s32.totalorder %s768_s16, 0  ;;  %p134_p4 = scmp.eq.s32.totalorder %s628_s18, 2 }
   0x6   : > { %s907_s17 = smov (%p30_p0, %s28_s17), 0  ;;  %s69_s20 = sadd.s32 1, %s756_s13 }
   0x7   : > { %p78_p3 = por %p77_p2, %p76_p1  ;;  %s65_s19 = ssub.s32 %s764_s15, %s907_s17 }
   0x8   : > { %p67_p5 = scmp.eq.s32.totalorder %s65_s19, 0  ;;  %p827_p6 = por %p134_p4, %p76_p1 }
   0x9   : > { %p632_p7 = scmp.ge.s32.totalorder %s768_s16, 3 }
   0xa   : > { %s832_s22 = scalar_select %p67_p5, %s756_s13, %s69_s20  }
   0xb   : > { %168 = sbr.rel (%p632_p7) target bundleno = 30 (0x1e), region = 20 }
  0x10   : > { %171 = sbr.rel (!%p78_p3) target bundleno = 30 (0x1e), region = 24  ;;  %s173_s23 = sand.u32 (%p78_p3), 1, %s756_s13  }
  0x11   : > { %s634_s24 = sshll.u32 (%p78_p3), %s764_s15, 2  ;;  %s633_s25 = sshll.u32 (%p78_p3), %s173_s23, 6 }
  0x12   : > { %s840_s28 = scalar_lea.vmem (%p78_p3), %s898_s1, %s634_s24  ;;  %s175_s29 = scalar_lea.vmem (%p78_p3), [#allocation3], %s633_s25 }
  0x13   : > { %v197_v0 = vld [vmem:[%s840_s28] sm:$0xf] (%p78_p3)  ;;  %v199_v1 = vld [vmem:[%s840_s28 + $0xc] sm:$0xf] (%p78_p3)  ;;  %v201_v2 = vld [vmem:[%s840_s28 + $0x18] sm:$0xf] (%p78_p3) }
  0x14   : > { %198 = vst [vmem:[%s175_s29] sm:$0xf] (%p78_p3), %v197_v0  ;;  %200 = vst [vmem:[%s175_s29 + $0x4] sm:$0xf] (%p78_p3), %v199_v1  ;;  %v203_v3 = vld [vmem:[%s840_s28 + $0x24] sm:$0xf] (%p78_p3) }
  0x15   : > { %v205_v4 = vld [vmem:[%s840_s28 + $0x30] sm:$0xf]  ;;  %202 = vst [vmem:[%s175_s29 + $0x8] sm:$0xf] %v201_v2  ;;  %204 = vst [vmem:[%s175_s29 + $0xc] sm:$0xf] %v203_v3 }
  0x16   : > { %206 = vst [vmem:[%s175_s29 + $0x10] sm:$0xf] %v205_v4  ;;  %v207_v5 = vld [vmem:[%s840_s28 + $0x3c] sm:$0xf]  ;;  %v209_v6 = vld [vmem:[%s840_s28 + $0x48] sm:$0xf] }
  0x17   : > { %v211_v7 = vld [vmem:[%s840_s28 + $0x54] sm:$0xf]  ;;  %208 = vst [vmem:[%s175_s29 + $0x14] sm:$0xf] %v207_v5  ;;  %210 = vst [vmem:[%s175_s29 + $0x18] sm:$0xf] %v209_v6 }
  0x18   : > { %212 = vst [vmem:[%s175_s29 + $0x1c] sm:$0xf] %v211_v7  ;;  %v213_v8 = vld [vmem:[%s840_s28 + $0x60] sm:$0xf]  ;;  %v215_v9 = vld [vmem:[%s840_s28 + $0x6c] sm:$0xf] }
  0x19   : > { %v217_v10 = vld [vmem:[%s840_s28 + $0x78] sm:$0xf]  ;;  %214 = vst [vmem:[%s175_s29 + $0x20] sm:$0xf] %v213_v8  ;;  %216 = vst [vmem:[%s175_s29 + $0x24] sm:$0xf] %v215_v9 }
  0x1a   : > { %218 = vst [vmem:[%s175_s29 + $0x28] sm:$0xf] %v217_v10  ;;  %v219_v11 = vld [vmem:[%s840_s28 + $0x84] sm:$0xf]  ;;  %v221_v12 = vld [vmem:[%s840_s28 + $0x90] sm:$0xf] }
  0x1b   : > { %v223_v13 = vld [vmem:[%s840_s28 + $0x9c] sm:$0xf]  ;;  %220 = vst [vmem:[%s175_s29 + $0x2c] sm:$0xf] %v219_v11  ;;  %222 = vst [vmem:[%s175_s29 + $0x30] sm:$0xf] %v221_v12 }
  0x1c   : > { %224 = vst [vmem:[%s175_s29 + $0x34] sm:$0xf] %v223_v13  ;;  %v225_v14 = vld [vmem:[%s840_s28 + $0xa8] sm:$0xf]  ;;  %v227_v15 = vld [vmem:[%s840_s28 + $0xb4] sm:$0xf] }
  0x1d   : > { %226 = vst [vmem:[%s175_s29 + $0x38] sm:$0xf] %v225_v14  ;;  %228 = vst [vmem:[%s175_s29 + $0x3c] sm:$0xf] %v227_v15 }
  0x1e PF: > { %p635_p8 = scmp.ge.s32.totalorder %s768_s16, 1  ;;  %p289_p9 = scmp.lt.s32.totalorder %s768_s16, 4 }
  0x20   : > { %p290_p10 = pnand %p635_p8, %p289_p9 }
  0x21   : > { %s296_s30 = sand.u32 (!%p290_p10), 1, %s752_s12   ;;  %p339_p11 = scmp.lt.s32.totalorder (!%p290_p10), %s760_s14, 2 }
  0x22   : > { %293 = sbr.rel (%p290_p10) target bundleno = 280 (0x118), region = 69  ;;  %s636_s4 = sshll.u32 (!%p290_p10), %s296_s30, 6 }
  0x23   : > { %s298_s5 = scalar_lea.vmem (!%p290_p10), [#allocation3], %s636_s4  ;;  %s637_s20 = sshll.u32 (!%p290_p10), %s296_s30, 4 }
  0x24   : > { %s328_s23 = scalar_lea.vmem (!%p290_p10), [#allocation4], %s637_s20 }
  0x27   : > { %v770_v16 = vmov 0.0   ;;  %vm771_vm0 = vmmov 0   ;;  %v722_v17 = vld [vmem:[%s298_s5 + $0x38] sm:$0xff]   ;;  %v723_v18 = vld [vmem:[%s298_s5 + $0x30] sm:$0xff]   ;;  %v724_v19 = vld [vmem:[%s298_s5 + $0x28] sm:$0xff]   ;;  %s340_s10 = scalar_select %p339_p11, %s760_s14, 2 }
  0x28   : > { %660 = vmatprep.subr.bf16.mxu0 %v770_v16  ;;  %676 = vmatprep.mubr.msk.bf16.mxu0 %vm771_vm0, %v770_v16  ;;  %v725_v20 = vld [vmem:[%s298_s5 + $0x20] sm:$0xff]   ;;  %v726_v21 = vld [vmem:[%s298_s5 + $0x18] sm:$0xff]   ;;  %v727_v22 = vld [vmem:[%s298_s5 + $0x10] sm:$0xff]   ;;  %s648_s24 = sshll.u32 (%p827_p6), %s760_s14, 3 }
  0x29   : > { %661 = vmatpush3.bf16.msra.mxu0 %v722_v17  ;;  %v728_v23 = vld [vmem:[%s298_s5 + $0x8] sm:$0xff]   ;;  %v729_v24 = vld [vmem:[%s298_s5] sm:$0xff]   ;;  %s341_s19 = scalar_lea.vmem %s899_s2, %s340_s10  ;;  %s491_s26 = scalar_lea.vmem (%p827_p6), %s900_s3, %s648_s24 }
  0x2a   : > { %662 = vmatprep.subr.bf16.mxu0 %v770_v16  ;;  %v352_v25 = vld [vmem:[%s897_s0] sm:$0xff]  ;;  %v353_v26 = vld [vmem:[%s897_s0 + $0x8] sm:$0xff] }
  0x2b   : > { %v354_v27 = vpack.c.bf16 %v353_v26, %v352_v25  ;;  %v646_v28 = vld [vmem:[%s341_s19] ss:$0 sm:$0xff] }
  0x2d   : > { %663 = vmatpush3.bf16.msra.mxu0 %v723_v18 }
  0x2e   : > { %664 = vmatprep.subr.bf16.mxu0 %v770_v16 }
  0x31   : > { %665 = vmatpush3.bf16.msra.mxu0 %v724_v19 }
  0x32   : > { %666 = vmatprep.subr.bf16.mxu0 %v770_v16 }
  0x35   : > { %667 = vmatpush3.bf16.msra.mxu0 %v725_v20 }
  0x36   : > { %668 = vmatprep.subr.bf16.mxu0 %v770_v16 }
  0x39   : > { %669 = vmatpush3.bf16.msra.mxu0 %v726_v21 }
  0x3a   : > { %670 = vmatprep.subr.bf16.mxu0 %v770_v16 }
  0x3d   : > { %671 = vmatpush3.bf16.msra.mxu0 %v727_v22 }
  0x3e   : > { %672 = vmatprep.subr.bf16.mxu0 %v770_v16 }
  0x41   : > { %673 = vmatpush3.bf16.msra.mxu0 %v728_v23 }
  0x42   : > { %674 = vmatprep.subr.bf16.mxu0 %v770_v16 }
  0x45   : > { %675 = vmatpush3.bf16.msra.mxu0 %v729_v24 }
  0x48   : > { %677 = vmatmul.mubr.bf16.vlgmr.msra.gmra.mxu0 %v354_v27 }
 0x108   : > { %v453_v29 = vpop.f32.mrf.mxu0 }
 0x109   : > { %v476_v30 = vadd.f32 %v646_v28, %v453_v29 }
 0x10a   : > { %v678_v31 = vpop.f32.mrf.mxu0 }
 0x10b   : > { %478 = vst [vmem:[%s328_s23] sm:$0xff] %v476_v30  ;;  %486 = sbr.rel (!%p827_p6) target bundleno = 280 (0x118), region = 85 }
 0x10c   : > { %v456_v32 = vpop.f32.mrf.mxu0 }
 0x10d   : > { %v477_v33 = vadd.f32 %v646_v28, %v456_v32 }
 0x10e   : > { %v679_v34 = vpop.f32.mrf.mxu0 }
 0x10f   : > { %479 = vst [vmem:[%s328_s23 + $0x8] sm:$0xff] %v477_v33 }
 0x112   : > { %v522_v35 = vld [vmem:[%s328_s23] sm:$0xff] }
 0x113   : > { %523 = vst [vmem:[%s491_s26] sm:$0xff] %v522_v35 }
 0x116   : > { %v524_v36 = vld [vmem:[%s328_s23 + $0x8] sm:$0xff] }
 0x117   : > { %525 = vst [vmem:[%s491_s26 + $0x18] sm:$0xff] %v524_v36 }
 0x118 PF: > { %s13_s16 = sadd.s32 1, %s768_s16   ;;  %s902_s12 = smov %s756_s13 }
 0x119   : > { %p10_p12 = scmp.ge.s32.totalorder %s13_s16, 5   ;;  %s903_s13 = smov %s832_s22 }
 0x11a   : > { %s904_s14 = smov %s764_s15  ;;  %s905_s15 = smov %s907_s17 }
 0x11b   :  { %12 = sbr.rel (!%p10_p12) target bundleno = 3 (0x3), region = 160 }

// kernel: transformer_forward.21
= control target key start
LH: loop header
LB: loop body
LE: loop exit
PB: predicated region body
PF: predicated region fallthrough
CT: control target
= control target key end

     0   :  { %s1413_s9 = smov 0   ;;  %s1608_s0 = inlined_call_operand.vmem [shape: f32[2,1,8], index: 0, kind: input, shape index: {}]   ;;  %s1609_s1 = inlined_call_operand.vmem [shape: f32[2,8,384], index: 1, kind: input, shape index: {}]   ;;  %s1610_s2 = inlined_call_operand.vmem [shape: f32[2,8,128], index: 2, kind: output, shape index: {}]  }
   0x1 LB: > { %s1177_s10 = sadd.s32 4294967295, %s1387_s9   ;;  %p1181_p0 = scmp.ge.s32.totalorder %s1387_s9, 1  ;;  %s1387_s9 = sphi %s1413_s9, %s12_s9  }
   0x2   : > { %p120_p1 = scmp.lt.s32.totalorder %s1387_s9, 3 }
   0x4   : > { %p121_p2 = pnand %p1181_p0, %p120_p1 }
   0x5   : > { %p144_p3 = scmp.lt.s32.totalorder (!%p121_p2), %s1177_s10, 1  ;;  %s1391_s18 = smov (!%p121_p2), 112  }
   0x6   : > { %124 = sbr.rel (%p121_p2) target bundleno = 1451 (0x5ab), region = 28  ;;  %s1392_s19 = smov (!%p121_p2), 96  }
   0x7   : > { %s1393_s20 = smov (!%p121_p2), 80   ;;  %s1394_s21 = smov (!%p121_p2), 64  }
   0x8   : > { %s1395_s22 = smov (!%p121_p2), 48   ;;  %s1396_s23 = smov (!%p121_p2), 32  }
   0x9   : > { %s1397_s24 = smov (!%p121_p2), 16  }
   0xb   : > { %v1389_v0 = vmov 0.0   ;;  %vm1390_vm0 = vmmov 0   ;;  %s1612_s10 = smov (!%p144_p3, %s1177_s10), 1  ;;  %vm177_vm1 = vcmask 130048   ;;  %v161_v6 = vlaneseq }
   0xc   : > { %1235 = vmatprep.subr.bf16.mxu0 %v1389_v0  ;;  %1237 = vmatprep.mubr.msk.bf16.mxu0 %vm1390_vm0, %v1389_v0  ;;  %s1331_s11 = smul.u32 24, %s1612_s10  ;;  %s146_s17 = scalar_lea.vmem %s1608_s0, %s1612_s10  ;;  %vm226_vm3 = vcmask 64512   ;;  %vm242_vm4 = vcmask 1043456   ;;  %vm1102_vm5 = vcmask 261120   ;;  %vm1104_vm6 = vcmask 392192  }
   0xd   : > { %1241 = vmatprep.subr.bf16.mxu1 %v1389_v0  ;;  %1243 = vmatprep.mubr.msk.bf16.mxu1 %vm1390_vm0, %v1389_v0  ;;  %v162_v7 = vshrl.u32 %v161_v6, 7  ;;  %v164_v8 = vand.u32 127, %v161_v6  ;;  %v1184_v9 = vld [vmem:[%s146_s17] ss:$0 sm:$0xff]  ;;  %vm1106_vm7 = vcmask 523264   ;;  %vm1108_vm8 = vcmask 654336  }
   0xe   : > { %s1433_s14 = scalar_lea.vmem %s1609_s1, %s1331_s11  ;;  %s1183_s25 = sshll.u32 %s1612_s10, 3  ;;  %vm1110_vm9 = vcmask 785408   ;;  %vm1112_vm10 = vcmask 916480  }
   0xf   : > { %v158_v1 = vld [vmem:[%s1433_s14 + $0x8] sm:$0xff]  ;;  %v157_v4 = vld [vmem:[%s1433_s14] sm:$0xff]  ;;  %vm165_vm2 = vcmp.gt.s32.totalorder %v164_v8, %v162_v7  ;;  %v159_v24 = vld [vmem:[%s1433_s14 + $0x10] sm:$0xff]  ;;  %s155_s28 = scalar_lea.vmem %s1610_s2, %s1183_s25 }
  0x10   : > { %v175_v2 = vpack.c.bf16 %v158_v1, %v158_v1  ;;  %v174_v5 = vpack.c.bf16 %v157_v4, %v157_v4  ;;  %v166_v10 = vsel %vm165_vm2, -1e+09, %v1389_v0  ;;  %v1463_v25 = vpack.c.bf16 %v159_v24, %v159_v24 }
  0x11   : > { %v1447_v11 = vadd.f32 %v1184_v9, %v166_v10 }
  0x12   : > { %v182_v3 = vsel %vm177_vm1, %v175_v2, 0  ;;  %290 = vrot.lane.b32.xlu1 %v175_v2, %s1391_s18  ;;  %v244_v26 = vsel %vm242_vm4, %v1463_v25, 0 }
  0x13   : > { %1236 = vmatpush3.bf16.xpose.msra.mxu0 %v182_v3  ;;  %1242 = vmatpush3.bf16.msra.mxu1 %v244_v26 }
  0x14   : > { %1253 = vmatprep.subr.bf16.mxu0 %v1389_v0  ;;  %1247 = vmatprep.subr.bf16.mxu1 %v1389_v0 }
  0x16   : > { %287 = vrot.lane.b32.xlu1 %v174_v5, %s1391_s18 }
  0x1a   : > { %1238 = vmatmul.mubr.msk.bf16.vlgmr.msra.gmra.mxu0 %vm177_vm1, %v174_v5  ;;  %401 = vrot.lane.b32.xlu1 %v174_v5, %s1392_s19 }
  0x1b   : > { %1255 = vmatprep.mubr.msk.bf16.mxu0 %vm1390_vm0, %v1389_v0 }
  0x1e   : > { %515 = vrot.lane.b32.xlu1 %v175_v2, %s1393_s20 }
  0x22   : > { %513 = vrot.lane.b32.xlu1 %v174_v5, %s1393_s20 }
  0x26   : > { %627 = vrot.lane.b32.xlu1 %v175_v2, %s1394_s21 }
  0x2a   : > { %625 = vrot.lane.b32.xlu1 %v174_v5, %s1394_s21 }
  0x2e   : > { %739 = vrot.lane.b32.xlu1 %v175_v2, %s1395_s22 }
  0x32   : > { %851 = vrot.lane.b32.xlu1 %v175_v2, %s1396_s23 }
  0x36   : > { %963 = vrot.lane.b32.xlu1 %v175_v2, %s1397_s24 }
  0x84   : > { %v291_v28 = vpop.permute.xlu1 %290 }
  0x85   : > { %v296_v33 = vsel %vm177_vm1, %v291_v28, 0 }
  0x88   : > { %v288_v29 = vpop.permute.xlu1 %287 }
  0x8c   : > { %v402_v32 = vpop.permute.xlu1 %401 }
  0x90   : > { %v516_v36 = vpop.permute.xlu1 %515 }
  0x91   : > { %v521_v39 = vsel %vm177_vm1, %v516_v36, 0 }
  0x94   : > { %v514_v38 = vpop.permute.xlu1 %513 }
  0x98   : > { %v628_v40 = vpop.permute.xlu1 %627 }
  0x99   : > { %v633_v42 = vsel %vm177_vm1, %v628_v40, 0 }
  0x9c   : > { %v626_v41 = vpop.permute.xlu1 %625 }
  0xa0   : > { %v740_v43 = vpop.permute.xlu1 %739 }
  0xa1   : > { %v745_v44 = vsel %vm177_vm1, %v740_v43, 0 }
  0xa4   : > { %v852_v45 = vpop.permute.xlu1 %851 }
  0xa5   : > { %v857_v47 = vsel %vm177_vm1, %v852_v45, 0 }
  0xa8   : > { %v964_v48 = vpop.permute.xlu1 %963 }
  0xa9   : > { %v969_v50 = vsel %vm177_vm1, %v964_v48, 0 }
  0xda   : > { %v218_v12 = vpop.f32.mrf.mxu0 }
  0xdb   : > { %v224_v13 = vmul.f32 0.25, %v218_v12 }
  0xdc   : > { %v1239_v14 = vpop.f32.mrf.mxu0 }
  0xdd   : > { %v225_v15 = vadd.f32 %v224_v13, %v1447_v11 }
  0xde   : > { %v221_v16 = vpop.f32.mrf.mxu0 }
  0xdf   : > { %v227_v17 = vsel %vm226_vm3, %v225_v15, -inf }
  0xe0   : > { %v1240_v18 = vpop.f32.mrf.mxu0  ;;  %228 = vmax.xlane.f32.xlu0 %v227_v17 }
 0x169   : > { %v229_v19 = vpop.xlane.xlu0 %228 }
 0x16a   : > { %v230_v20 = vsub.f32 %v225_v15, %v229_v19 }
 0x16c   : > { %v231_v21 = vmul.f32 1.442695, %v230_v20 }
 0x16e   : > { %1349 = vpow2.f32 %v231_v21 }
 0x17b   : > { %v1350_v22 = vpop.eup %1349 }
 0x17c   : > { %v233_v23 = vsel %vm226_vm3, %v1350_v22, 0.0 }
 0x17d   : > { %234 = vadd.xlane.f32.xlu0 %v233_v23 }
 0x193   : > { %403 = vrot.lane.b32.xlu0 %v175_v2, %s1392_s19 }
 0x197   : > { %737 = vrot.lane.b32.xlu0 %v174_v5, %s1395_s22 }
 0x19b   : > { %849 = vrot.lane.b32.xlu0 %v174_v5, %s1396_s23 }
 0x19f   : > { %961 = vrot.lane.b32.xlu0 %v174_v5, %s1397_s24 }
 0x206   : > { %v235_v27 = vpop.xlane.xlu0 %234 }
 0x207   : > { %1351 = vrcp.f32 %v235_v27 }
 0x20a   : > { %v404_v35 = vpop.permute.xlu0 %403 }
 0x20b   : > { %v409_v37 = vsel %vm177_vm1, %v404_v35, 0 }
 0x20e   : > { %v738_v46 = vpop.permute.xlu0 %737 }
 0x212   : > { %v850_v49 = vpop.permute.xlu0 %849 }
 0x214   : > { %v1352_v30 = vpop.eup %1351 }
 0x215   : > { %v237_v31 = vmul.f32 %v1352_v30, %v1350_v22 }
 0x216   : > { %v962_v51 = vpop.permute.xlu0 %961 }
 0x217   : > { %v238_v34 = vpack.c.bf16 %v237_v31, %v237_v31 }
 0x219   : > { %1244 = vmatmul.mubr.msk.bf16.vlgmr.msra.gmra.mxu1 %vm226_vm3, %v238_v34 }
 0x21a   : > { %1248 = vmatpush3.bf16.xpose.msra.mxu1 %v296_v33  ;;  %1249 = vmatprep.mubr.msk.bf16.mxu1 %vm1390_vm0, %v1389_v0 }
 0x21b   : > { %1259 = vmatprep.subr.bf16.mxu1 %v1389_v0 }
 0x221   : > { %1250 = vmatmul.mubr.msk.bf16.vlgmr.msra.gmra.mxu1 %vm177_vm1, %v288_v29 }
 0x222   : > { %1260 = vmatpush3.bf16.xpose.msra.mxu1 %v409_v37  ;;  %1261 = vmatprep.mubr.msk.bf16.mxu1 %vm1390_vm0, %v1389_v0 }
 0x223   : > { %1271 = vmatprep.subr.bf16.mxu1 %v1389_v0 }
 0x229   : > { %1262 = vmatmul.mubr.msk.bf16.vlgmr.msra.gmra.mxu1 %vm177_vm1, %v402_v32 }
 0x22a   : > { %1272 = vmatpush3.bf16.xpose.msra.mxu1 %v521_v39  ;;  %1273 = vmatprep.mubr.msk.bf16.mxu1 %vm1390_vm0, %v1389_v0 }
 0x22b   : > { %1283 = vmatprep.subr.bf16.mxu1 %v1389_v0 }
 0x231   : > { %1274 = vmatmul.mubr.msk.bf16.vlgmr.msra.gmra.mxu1 %vm177_vm1, %v514_v38 }
 0x232   : > { %1284 = vmatpush3.bf16.xpose.msra.mxu1 %v633_v42  ;;  %1285 = vmatprep.mubr.msk.bf16.mxu1 %vm1390_vm0, %v1389_v0 }
 0x233   : > { %1295 = vmatprep.subr.bf16.mxu1 %v1389_v0 }
 0x239   : > { %1286 = vmatmul.mubr.msk.bf16.vlgmr.msra.gmra.mxu1 %vm177_vm1, %v626_v41 }
 0x23a   : > { %1296 = vmatpush3.bf16.xpose.msra.mxu1 %v745_v44  ;;  %1297 = vmatprep.mubr.msk.bf16.mxu1 %vm1390_vm0, %v1389_v0 }
 0x23b   : > { %1307 = vmatprep.subr.bf16.mxu1 %v1389_v0 }
 0x241   : > { %1298 = vmatmul.mubr.msk.bf16.vlgmr.msra.gmra.mxu1 %vm177_vm1, %v738_v46 }
 0x242   : > { %1308 = vmatpush3.bf16.xpose.msra.mxu1 %v857_v47  ;;  %1309 = vmatprep.mubr.msk.bf16.mxu1 %vm1390_vm0, %v1389_v0 }
 0x243   : > { %1319 = vmatprep.subr.bf16.mxu1 %v1389_v0 }
 0x249   : > { %1310 = vmatmul.mubr.msk.bf16.vlgmr.msra.gmra.mxu1 %vm177_vm1, %v850_v49 }
 0x24a   : > { %1320 = vmatpush3.bf16.xpose.msra.mxu1 %v969_v50  ;;  %1321 = vmatprep.mubr.msk.bf16.mxu1 %vm1390_vm0, %v1389_v0 }
 0x251   : > { %1322 = vmatmul.mubr.msk.bf16.vlgmr.msra.gmra.mxu1 %vm177_vm1, %v962_v51 }
 0x2d9   : > { %v1507_v52 = vpop.f32.mrf.mxu1 }
 0x2db   : > { %v1245_v53 = vpop.f32.mrf.mxu1 }
 0x2dd   : > { %v283_v54 = vpop.f32.mrf.mxu1 }
 0x2df   : > { %v1246_v55 = vpop.f32.mrf.mxu1 }
 0x2e1   : > { %v332_v56 = vpop.f32.mrf.mxu1 }
 0x2e2   : > { %v338_v57 = vmul.f32 0.25, %v332_v56 }
 0x2e3   : > { %v1251_v58 = vpop.f32.mrf.mxu1 }
 0x2e4   : > { %v339_v59 = vadd.f32 %v338_v57, %v1447_v11 }
 0x2e5   : > { %v335_v60 = vpop.f32.mrf.mxu1 }
 0x2e6   : > { %v340_v61 = vsel %vm226_vm3, %v339_v59, -inf }
 0x2e7   : > { %341 = vmax.xlane.f32.xlu1 %v340_v61  ;;  %v1252_v62 = vpop.f32.mrf.mxu1 }
 0x2e9   : > { %v445_v63 = vpop.f32.mrf.mxu1 }
 0x2ea   : > { %v451_v1 = vmul.f32 0.25, %v445_v63 }
 0x2eb   : > { %v1263_v2 = vpop.f32.mrf.mxu1 }
 0x2ec   : > { %v452_v3 = vadd.f32 %v451_v1, %v1447_v11 }
 0x2ed   : > { %v448_v4 = vpop.f32.mrf.mxu1 }
 0x2ee   : > { %v453_v5 = vsel %vm226_vm3, %v452_v3, -inf }
 0x2ef   : > { %454 = vmax.xlane.f32.xlu0 %v453_v5  ;;  %v1264_v6 = vpop.f32.mrf.mxu1 }
 0x2f1   : > { %v557_v7 = vpop.f32.mrf.mxu1 }
 0x2f2   : > { %v563_v8 = vmul.f32 0.25, %v557_v7 }
 0x2f3   : > { %v1275_v9 = vpop.f32.mrf.mxu1 }
 0x2f4   : > { %v564_v10 = vadd.f32 %v563_v8, %v1447_v11 }
 0x2f5   : > { %v560_v12 = vpop.f32.mrf.mxu1 }
 0x2f6   : > { %v565_v13 = vsel %vm226_vm3, %v564_v10, -inf }
 0x2f7   : > { %566 = vmax.xlane.f32.xlu0 %v565_v13  ;;  %v1276_v14 = vpop.f32.mrf.mxu1 }
 0x2f9   : > { %v669_v15 = vpop.f32.mrf.mxu1 }
 0x2fa   : > { %v675_v16 = vmul.f32 0.25, %v669_v15 }
 0x2fb   : > { %v1287_v17 = vpop.f32.mrf.mxu1 }
 0x2fc   : > { %v676_v18 = vadd.f32 %v675_v16, %v1447_v11 }
 0x2fd   : > { %v672_v19 = vpop.f32.mrf.mxu1 }
 0x2fe   : > { %v677_v20 = vsel %vm226_vm3, %v676_v18, -inf }
 0x2ff   : > { %678 = vmax.xlane.f32.xlu1 %v677_v20  ;;  %v1288_v21 = vpop.f32.mrf.mxu1 }
 0x301   : > { %v781_v22 = vpop.f32.mrf.mxu1 }
 0x302   : > { %v787_v23 = vmul.f32 0.25, %v781_v22 }
 0x303   : > { %v1299_v24 = vpop.f32.mrf.mxu1 }
 0x304   : > { %v788_v26 = vadd.f32 %v787_v23, %v1447_v11 }
 0x305   : > { %v784_v27 = vpop.f32.mrf.mxu1 }
 0x306   : > { %v789_v28 = vsel %vm226_vm3, %v788_v26, -inf }
 0x307   : > { %790 = vmax.xlane.f32.xlu0 %v789_v28  ;;  %v1300_v29 = vpop.f32.mrf.mxu1 }
 0x309   : > { %v893_v30 = vpop.f32.mrf.mxu1 }
 0x30a   : > { %v899_v31 = vmul.f32 0.25, %v893_v30 }
 0x30b   : > { %v1311_v32 = vpop.f32.mrf.mxu1 }
 0x30c   : > { %v900_v33 = vadd.f32 %v899_v31, %v1447_v11 }
 0x30d   : > { %v896_v34 = vpop.f32.mrf.mxu1 }
 0x30e   : > { %v901_v35 = vsel %vm226_vm3, %v900_v33, -inf }
 0x30f   : > { %902 = vmax.xlane.f32.xlu1 %v901_v35  ;;  %v1312_v36 = vpop.f32.mrf.mxu1 }
 0x311   : > { %v1005_v37 = vpop.f32.mrf.mxu1 }
 0x312   : > { %v1011_v38 = vmul.f32 0.25, %v1005_v37 }
 0x313   : > { %v1323_v39 = vpop.f32.mrf.mxu1 }
 0x314   : > { %v1012_v40 = vadd.f32 %v1011_v38, %v1447_v11 }
 0x315   : > { %v1008_v41 = vpop.f32.mrf.mxu1 }
 0x316   : > { %v1013_v42 = vsel %vm226_vm3, %v1012_v40, -inf }
 0x317   : > { %1014 = vmax.xlane.f32.xlu0 %v1013_v42  ;;  %v1324_v43 = vpop.f32.mrf.mxu1 }
 0x320   : > { %353 = vrot.lane.b32.xlu1 %v1463_v25, %s1391_s18 }
 0x32d   : > { %465 = vrot.lane.b32.xlu0 %v1463_v25, %s1392_s19 }
 0x370   : > { %v342_v44 = vpop.xlane.xlu1 %341 }
 0x371   : > { %v343_v45 = vsub.f32 %v339_v59, %v342_v44 }
 0x373   : > { %v344_v46 = vmul.f32 1.442695, %v343_v45 }
 0x375   : > { %1353 = vpow2.f32 %v344_v46 }
 0x378   : > { %v455_v47 = vpop.xlane.xlu0 %454 }
 0x379   : > { %v456_v48 = vsub.f32 %v452_v3, %v455_v47 }
 0x37b   : > { %v457_v49 = vmul.f32 1.442695, %v456_v48 }
 0x37d   : > { %1355 = vpow2.f32 %v457_v49 }
 0x380   : > { %v567_v11 = vpop.xlane.xlu0 %566 }
 0x381   : > { %v568_v50 = vsub.f32 %v564_v10, %v567_v11 }
 0x382   : > { %v1354_v51 = vpop.eup %1353 }
 0x383   : > { %v569_v53 = vmul.f32 1.442695, %v568_v50  ;;  %v346_v54 = vsel %vm226_vm3, %v1354_v51, 0.0 }
 0x384   : > { %347 = vadd.xlane.f32.xlu1 %v346_v54 }
 0x385   : > { %1357 = vpow2.f32 %v569_v53 }
 0x388   : > { %v679_v59 = vpop.xlane.xlu1 %678 }
 0x389   : > { %v680_v63 = vsub.f32 %v676_v18, %v679_v59 }
 0x38a   : > { %v1356_v55 = vpop.eup %1355 }
 0x38b   : > { %v459_v56 = vsel %vm226_vm3, %v1356_v55, 0.0  ;;  %v681_v2 = vmul.f32 1.442695, %v680_v63 }
 0x38c   : > { %460 = vadd.xlane.f32.xlu0 %v459_v56 }
 0x38d   : > { %1359 = vpow2.f32 %v681_v2 }
 0x390   : > { %v791_v1 = vpop.xlane.xlu0 %790 }
 0x391   : > { %v792_v3 = vsub.f32 %v788_v26, %v791_v1 }
 0x392   : > { %v1529_v57 = vpop.eup %1357 }
 0x393   : > { %v571_v58 = vsel %vm226_vm3, %v1529_v57, 0.0  ;;  %v793_v6 = vmul.f32 1.442695, %v792_v3 }
 0x394   : > { %572 = vadd.xlane.f32.xlu1 %v571_v58 }
 0x395   : > { %1361 = vpow2.f32 %v793_v6 }
 0x398   : > { %v903_v60 = vpop.xlane.xlu1 %902 }
 0x399   : > { %v904_v5 = vsub.f32 %v900_v33, %v903_v60 }
 0x39a   : > { %v1360_v10 = vpop.eup %1359 }
 0x39b   : > { %v905_v8 = vmul.f32 1.442695, %v904_v5  ;;  %v683_v12 = vsel %vm226_vm3, %v1360_v10, 0.0 }
 0x39c   : > { %v354_v61 = vpop.permute.xlu1 %353 }
 0x39d   : > { %v359_v62 = vsel %vm242_vm4, %v354_v61, 0  ;;  %1363 = vpow2.f32 %v905_v8 }
 0x39e   : > { %1254 = vmatpush3.bf16.msra.mxu0 %v359_v62 }
 0x39f   : > { %1265 = vmatprep.subr.bf16.mxu0 %v1389_v0 }
 0x3a0   : > { %v1015_v4 = vpop.xlane.xlu0 %1014 }
 0x3a1   : > { %v1016_v7 = vsub.f32 %v1012_v40, %v1015_v4 }
 0x3a2   : > { %577 = vrot.lane.b32.xlu0 %v1463_v25, %s1393_s20  ;;  %v1540_v13 = vpop.eup %1361 }
 0x3a3   : > { %v1017_v9 = vmul.f32 1.442695, %v1016_v7  ;;  %v795_v15 = vsel %vm226_vm3, %v1540_v13, 0.0 }
 0x3a4   : > { %v466_v20 = vpop.permute.xlu0 %465 }
 0x3a5   : > { %689 = vrot.lane.b32.xlu1 %v1463_v25, %s1394_s21  ;;  %1365 = vpow2.f32 %v1017_v9  ;;  %v471_v27 = vsel %vm242_vm4, %v466_v20, 0 }
 0x3aa   : > { %v1542_v14 = vpop.eup %1363 }
 0x3ab   : > { %v907_v17 = vsel %vm226_vm3, %v1542_v14, 0.0 }
 0x3b2   : > { %v1546_v16 = vpop.eup %1365 }
 0x3b3   : > { %v1019_v18 = vsel %vm226_vm3, %v1546_v16, 0.0 }
 0x3c1   : > { %684 = vadd.xlane.f32.xlu0 %v683_v12 }
 0x3c5   : > { %796 = vadd.xlane.f32.xlu0 %v795_v15 }
 0x3c9   : > { %908 = vadd.xlane.f32.xlu1 %v907_v17  ;;  %1020 = vadd.xlane.f32.xlu0 %v1019_v18 }
 0x3da   : > { %913 = vrot.lane.b32.xlu1 %v1463_v25, %s1396_s23 }
 0x3de   : > { %1025 = vrot.lane.b32.xlu1 %v1463_v25, %s1397_s24 }
 0x3df   : > { %801 = vrot.lane.b32.xlu0 %v1463_v25, %s1395_s22 }
 0x40d   : > { %v348_v19 = vpop.xlane.xlu1 %347 }
 0x40e   : > { %1367 = vrcp.f32 %v348_v19 }
 0x415   : > { %v461_v21 = vpop.xlane.xlu0 %460 }
 0x416   : > { %1369 = vrcp.f32 %v461_v21 }
 0x419   : > { %v578_v29 = vpop.permute.xlu0 %577 }
 0x41a   : > { %v583_v31 = vsel %vm242_vm4, %v578_v29, 0 }
 0x41b   : > { %v1368_v22 = vpop.eup %1367 }
 0x41c   : > { %v350_v23 = vmul.f32 %v1368_v22, %v1354_v51 }
 0x41d   : > { %v573_v24 = vpop.xlane.xlu1 %572 }
 0x41e   : > { %1371 = vrcp.f32 %v573_v24  ;;  %v351_v26 = vpack.c.bf16 %v350_v23, %v350_v23 }
 0x420   : > { %1256 = vmatmul.mubr.msk.bf16.vlgmr.msra.gmra.mxu0 %vm226_vm3, %v351_v26 }
 0x421   : > { %1266 = vmatpush3.bf16.msra.mxu0 %v471_v27  ;;  %1267 = vmatprep.mubr.msk.bf16.mxu0 %vm1390_vm0, %v1389_v0  ;;  %v690_v34 = vpop.permute.xlu1 %689 }
 0x422   : > { %1277 = vmatprep.subr.bf16.mxu0 %v1389_v0  ;;  %v695_v36 = vsel %vm242_vm4, %v690_v34, 0 }
 0x423   : > { %v1370_v25 = vpop.eup %1369 }
 0x424   : > { %v463_v28 = vmul.f32 %v1370_v25, %v1356_v55 }
 0x426   : > { %v464_v30 = vpack.c.bf16 %v463_v28, %v463_v28 }
 0x428   : > { %1268 = vmatmul.mubr.msk.bf16.vlgmr.msra.gmra.mxu0 %vm226_vm3, %v464_v30 }
 0x429   : > { %1278 = vmatpush3.bf16.msra.mxu0 %v583_v31  ;;  %1279 = vmatprep.mubr.msk.bf16.mxu0 %vm1390_vm0, %v1389_v0 }
 0x42a   : > { %1289 = vmatprep.subr.bf16.mxu0 %v1389_v0 }
 0x42b   : > { %v1372_v32 = vpop.eup %1371 }
 0x42c   : > { %v575_v33 = vmul.f32 %v1372_v32, %v1529_v57 }
 0x42e   : > { %v576_v35 = vpack.c.bf16 %v575_v33, %v575_v33 }
 0x430   : > { %1280 = vmatmul.mubr.msk.bf16.vlgmr.msra.gmra.mxu0 %vm226_vm3, %v576_v35 }
 0x431   : > { %1290 = vmatpush3.bf16.msra.mxu0 %v695_v36  ;;  %1291 = vmatprep.mubr.msk.bf16.mxu0 %vm1390_vm0, %v1389_v0 }
 0x432   : > { %1301 = vmatprep.subr.bf16.mxu0 %v1389_v0 }
 0x44a   : > { %v685_v37 = vpop.xlane.xlu0 %684 }
 0x44b   : > { %1373 = vrcp.f32 %v685_v37 }
 0x44e   : > { %v797_v38 = vpop.xlane.xlu0 %796 }
 0x44f   : > { %1375 = vrcp.f32 %v797_v38 }
 0x452   : > { %v909_v39 = vpop.xlane.xlu1 %908  ;;  %v1021_v40 = vpop.xlane.xlu0 %1020 }
 0x453   : > { %1377 = vrcp.f32 %v909_v39 }
 0x454   : > { %1379 = vrcp.f32 %v1021_v40 }
 0x456   : > { %v802_v42 = vpop.permute.xlu0 %801  ;;  %v914_v48 = vpop.permute.xlu1 %913 }
 0x457   : > { %v807_v44 = vsel %vm242_vm4, %v802_v42, 0  ;;  %v919_v49 = vsel %vm242_vm4, %v914_v48, 0 }
 0x458   : > { %v1374_v41 = vpop.eup %1373 }
 0x459   : > { %v687_v43 = vmul.f32 %v1374_v41, %v1360_v10 }
 0x45a   : > { %v1026_v53 = vpop.permute.xlu1 %1025 }
 0x45b   : > { %v688_v45 = vpack.c.bf16 %v687_v43, %v687_v43  ;;  %v1031_v54 = vsel %vm242_vm4, %v1026_v53, 0 }
 0x45c   : > { %v1376_v46 = vpop.eup %1375 }
 0x45d   : > { %1292 = vmatmul.mubr.msk.bf16.vlgmr.msra.gmra.mxu0 %vm226_vm3, %v688_v45  ;;  %v799_v47 = vmul.f32 %v1376_v46, %v1540_v13 }
 0x45e   : > { %1302 = vmatpush3.bf16.msra.mxu0 %v807_v44  ;;  %1303 = vmatprep.mubr.msk.bf16.mxu0 %vm1390_vm0, %v1389_v0 }
 0x45f   : > { %1313 = vmatprep.subr.bf16.mxu0 %v1389_v0  ;;  %v800_v11 = vpack.c.bf16 %v799_v47, %v799_v47 }
 0x460   : > { %v1378_v50 = vpop.eup %1377 }
 0x461   : > { %v911_v51 = vmul.f32 %v1378_v50, %v1542_v14  ;;  %v1380_v56 = vpop.eup %1379 }
 0x462   : > { %v1023_v57 = vmul.f32 %v1380_v56, %v1546_v16 }
 0x463   : > { %v912_v55 = vpack.c.bf16 %v911_v51, %v911_v51 }
 0x464   : > { %v1024_v58 = vpack.c.bf16 %v1023_v57, %v1023_v57 }
 0x465   : > { %1304 = vmatmul.mubr.msk.bf16.vlgmr.msra.gmra.mxu0 %vm226_vm3, %v800_v11 }
 0x466   : > { %1314 = vmatpush3.bf16.msra.mxu0 %v919_v49  ;;  %1315 = vmatprep.mubr.msk.bf16.mxu0 %vm1390_vm0, %v1389_v0 }
 0x467   : > { %1325 = vmatprep.subr.bf16.mxu0 %v1389_v0 }
 0x46d   : > { %1316 = vmatmul.mubr.msk.bf16.vlgmr.msra.gmra.mxu0 %vm226_vm3, %v912_v55 }
 0x46e   : > { %1326 = vmatpush3.bf16.msra.mxu0 %v1031_v54  ;;  %1327 = vmatprep.mubr.msk.bf16.mxu0 %vm1390_vm0, %v1389_v0 }
 0x475   : > { %1328 = vmatmul.mubr.msk.bf16.vlgmr.msra.gmra.mxu0 %vm226_vm3, %v1024_v58 }
 0x4e0   : > { %v395_v59 = vpop.f32.mrf.mxu0 }
 0x4e1   : > { %1074 = vrot.lane.b32.xlu1 %v395_v59, %s1397_s24 }
 0x4e2   : > { %v1257_v60 = vpop.f32.mrf.mxu0 }
 0x4e4   : > { %v398_v61 = vpop.f32.mrf.mxu0 }
 0x4e6   : > { %v1258_v62 = vpop.f32.mrf.mxu0 }
 0x4e8   : > { %v507_v63 = vpop.f32.mrf.mxu0 }
 0x4e9   : > { %1078 = vrot.lane.b32.xlu1 %v507_v63, %s1396_s23 }
 0x4ea   : > { %v1269_v1 = vpop.f32.mrf.mxu0 }
 0x4ec   : > { %v510_v2 = vpop.f32.mrf.mxu0 }
 0x4ee   : > { %v1270_v3 = vpop.f32.mrf.mxu0 }
 0x4f0   : > { %v619_v4 = vpop.f32.mrf.mxu0 }
 0x4f1   : > { %1082 = vrot.lane.b32.xlu0 %v619_v4, %s1395_s22 }
 0x4f2   : > { %v1281_v0 = vpop.f32.mrf.mxu0 }
 0x4f4   : > { %v622_v5 = vpop.f32.mrf.mxu0 }
 0x4f6   : > { %v1282_v6 = vpop.f32.mrf.mxu0 }
 0x51d   : > { %v731_v7 = vpop.f32.mrf.mxu0 }
 0x51e   : > { %1086 = vrot.lane.b32.xlu1 %v731_v7, %s1394_s21 }
 0x51f   : > { %v1293_v8 = vpop.f32.mrf.mxu0 }
 0x521   : > { %v734_v9 = vpop.f32.mrf.mxu0 }
 0x523   : > { %v1294_v10 = vpop.f32.mrf.mxu0 }
 0x525   : > { %v843_v12 = vpop.f32.mrf.mxu0 }
 0x526   : > { %1090 = vrot.lane.b32.xlu0 %v843_v12, %s1393_s20 }
 0x527   : > { %v1305_v13 = vpop.f32.mrf.mxu0 }
 0x529   : > { %v846_v14 = vpop.f32.mrf.mxu0 }
 0x52b   : > { %v1306_v15 = vpop.f32.mrf.mxu0 }
 0x52d   : > { %v955_v16 = vpop.f32.mrf.mxu0 }
 0x52e   : > { %1094 = vrot.lane.b32.xlu1 %v955_v16, %s1392_s19 }
 0x52f   : > { %v1317_v17 = vpop.f32.mrf.mxu0 }
 0x531   : > { %v958_v18 = vpop.f32.mrf.mxu0 }
 0x533   : > { %v1318_v19 = vpop.f32.mrf.mxu0 }
 0x535   : > { %v1067_v20 = vpop.f32.mrf.mxu0 }
 0x536   : > { %1098 = vrot.lane.b32.xlu0 %v1067_v20, %s1391_s18 }
 0x537   : > { %v1329_v21 = vpop.f32.mrf.mxu0 }
 0x539   : > { %v1070_v22 = vpop.f32.mrf.mxu0 }
 0x53b   : > { %v1330_v23 = vpop.f32.mrf.mxu0 }
 0x553   : > { %v1075_v24 = vpop.permute.xlu1 %1074 }
 0x554   : > { %v1101_v28 = vsel %vm177_vm1, %v1507_v52, %v1075_v24 }
 0x55b   : > { %v1079_v26 = vpop.permute.xlu1 %1078 }
 0x55c   : > { %v1103_v29 = vsel %vm1102_vm5, %v1101_v28, %v1079_v26 }
 0x563   : > { %v1083_v27 = vpop.permute.xlu0 %1082 }
 0x564   : > { %v1105_v31 = vsel %vm1104_vm6, %v1103_v29, %v1083_v27 }
 0x590   : > { %v1087_v25 = vpop.permute.xlu1 %1086 }
 0x591   : > { %v1107_v33 = vsel %vm1106_vm7, %v1105_v31, %v1087_v25 }
 0x598   : > { %v1091_v30 = vpop.permute.xlu0 %1090 }
 0x599   : > { %v1109_v34 = vsel %vm1108_vm8, %v1107_v33, %v1091_v30 }
 0x5a0   : > { %v1095_v32 = vpop.permute.xlu1 %1094 }
 0x5a1   : > { %v1111_v35 = vsel %vm1110_vm9, %v1109_v34, %v1095_v32 }
 0x5a8   : > { %v1099_v36 = vpop.permute.xlu0 %1098 }
 0x5a9   : > { %v1113_v37 = vsel %vm1112_vm10, %v1111_v35, %v1099_v36 }
 0x5aa   : > { %1114 = vst [vmem:[%s155_s28] sm:$0xff] %v1113_v37 }
 0x5ab PF: > { %s12_s9 = sadd.s32 1, %s1387_s9  }
 0x5ac   : > { %p9_p4 = scmp.ge.s32.totalorder %s12_s9, 4  }
 0x5ae   :  { %11 = sbr.rel (!%p9_p4) target bundleno = 1 (0x1), region = 61 }

// kernel: transformer_forward.22
= control target key start
LH: loop header
LB: loop body
LE: loop exit
PB: predicated region body
PF: predicated region fallthrough
CT: control target
= control target key end

     0   :  { %v244_v0 = vmov 0.0   ;;  %vm245_vm0 = vmmov 0   ;;  %s332_s1 = inlined_call_operand.vmem [shape: bf16[128,128], index: 1, kind: input, shape index: {}]   ;;  %s333_s0 = inlined_call_operand.vmem [shape: f32[16,128], index: 0, kind: input, shape index: {}]   ;;  %s334_s2 = inlined_call_operand.vmem [shape: f32[1,128], index: 2, kind: input, shape index: {}]   ;;  %s335_s3 = inlined_call_operand.vmem [shape: f32[16,128], index: 3, kind: input, shape index: {}]   ;;  %s336_s4 = inlined_call_operand.vmem [shape: f32[1,128], index: 4, kind: input, shape index: {}]   ;;  %s337_s5 = inlined_call_operand.vmem [shape: f32[1,128], index: 5, kind: input, shape index: {}]   ;;  %s338_s6 = inlined_call_operand.vmem [shape: f32[16,128], index: 6, kind: output, shape index: {}]  }
   0x1   :  { %210 = vmatprep.subr.bf16.mxu0 %v244_v0  ;;  %v232_v1 = vld [vmem:[%s332_s1 + $0x38] sm:$0xff]   ;;  %226 = vmatprep.mubr.msk.bf16.mxu0 %vm245_vm0, %v244_v0  ;;  %v233_v2 = vld [vmem:[%s332_s1 + $0x30] sm:$0xff]   ;;  %v234_v3 = vld [vmem:[%s332_s1 + $0x28] sm:$0xff]  }
   0x2   :  { %211 = vmatpush3.bf16.msra.mxu0 %v232_v1  ;;  %v235_v4 = vld [vmem:[%s332_s1 + $0x20] sm:$0xff]   ;;  %v236_v5 = vld [vmem:[%s332_s1 + $0x18] sm:$0xff]   ;;  %v237_v6 = vld [vmem:[%s332_s1 + $0x10] sm:$0xff]  }
   0x3   :  { %212 = vmatprep.subr.bf16.mxu0 %v244_v0  ;;  %v238_v7 = vld [vmem:[%s332_s1 + $0x8] sm:$0xff]   ;;  %v239_v8 = vld [vmem:[%s332_s1] sm:$0xff]  }
   0x4   :  { %v24_v9 = vld [vmem:[%s333_s0] sm:$0xff]  ;;  %v25_v10 = vld [vmem:[%s333_s0 + $0x8] sm:$0xff] }
   0x5   :  { %v26_v11 = vpack.c.bf16 %v25_v10, %v24_v9  ;;  %v190_v12 = vld [vmem:[%s334_s2] ss:$0 sm:$0xff]  ;;  %v140_v19 = vld [vmem:[%s335_s3 + $0x8] sm:$0xff] }
   0x6   :  { %213 = vmatpush3.bf16.msra.mxu0 %v233_v2  ;;  %v139_v14 = vld [vmem:[%s335_s3] sm:$0xff] }
   0x7   :  { %214 = vmatprep.subr.bf16.mxu0 %v244_v0  ;;  %v199_v38 = vld [vmem:[%s336_s4] ss:$0 sm:$0xff] }
   0x8   :  { %v200_v40 = vld [vmem:[%s337_s5] ss:$0 sm:$0xff] }
   0xa   :  { %215 = vmatpush3.bf16.msra.mxu0 %v234_v3 }
   0xb   :  { %216 = vmatprep.subr.bf16.mxu0 %v244_v0 }
   0xe   :  { %217 = vmatpush3.bf16.msra.mxu0 %v235_v4 }
   0xf   :  { %218 = vmatprep.subr.bf16.mxu0 %v244_v0 }
  0x12   :  { %219 = vmatpush3.bf16.msra.mxu0 %v236_v5 }
  0x13   :  { %220 = vmatprep.subr.bf16.mxu0 %v244_v0 }
  0x16   :  { %221 = vmatpush3.bf16.msra.mxu0 %v237_v6 }
  0x17   :  { %222 = vmatprep.subr.bf16.mxu0 %v244_v0 }
  0x1a   :  { %223 = vmatpush3.bf16.msra.mxu0 %v238_v7 }
  0x1b   :  { %224 = vmatprep.subr.bf16.mxu0 %v244_v0 }
  0x1e   :  { %225 = vmatpush3.bf16.msra.mxu0 %v239_v8 }
  0x21   :  { %227 = vmatmul.mubr.bf16.vlgmr.msra.gmra.mxu0 %v26_v11 }
  0xe1   :  { %v132_v13 = vpop.f32.mrf.mxu0 }
  0xe2   :  { %v133_v15 = vadd.f32 %v190_v12, %v132_v13 }
  0xe3   :  { %v228_v16 = vpop.f32.mrf.mxu0 }
  0xe4   :  { %v141_v17 = vadd.f32 %v139_v14, %v133_v15 }
  0xe5   :  { %v135_v18 = vpop.f32.mrf.mxu0 }
  0xe6   :  { %v136_v20 = vadd.f32 %v190_v12, %v135_v18  ;;  %145 = vadd.xlane.f32.xlu0 %v141_v17 }
  0xe7   :  { %v229_v21 = vpop.f32.mrf.mxu0 }
  0xe8   :  { %v142_v22 = vadd.f32 %v140_v19, %v136_v20 }
  0xea   :  { %147 = vadd.xlane.f32.xlu0 %v142_v22 }
 0x16f   :  { %v146_v23 = vpop.xlane.xlu0 %145 }
 0x170   :  { %v150_v24 = vmul.f32 0.0078125, %v146_v23 }
 0x172   :  { %v152_v25 = vsub.f32 %v141_v17, %v150_v24 }
 0x173   :  { %v148_v26 = vpop.xlane.xlu0 %147 }
 0x174   :  { %v151_v27 = vmul.f32 0.0078125, %v148_v26  ;;  %v154_v28 = vmul.f32 %v152_v25, %v152_v25 }
 0x176   :  { %v153_v29 = vsub.f32 %v142_v22, %v151_v27  ;;  %156 = vadd.xlane.f32.xlu1 %v154_v28 }
 0x178   :  { %v155_v30 = vmul.f32 %v153_v29, %v153_v29 }
 0x17a   :  { %158 = vadd.xlane.f32.xlu1 %v155_v30 }
 0x1ff   :  { %v157_v31 = vpop.xlane.xlu1 %156 }
 0x200   :  { %v160_v32 = vmul.f32 0.0078125, %v157_v31 }
 0x202   :  { %v162_v33 = vadd.f32 1e-05, %v160_v32 }
 0x203   :  { %v159_v34 = vpop.xlane.xlu1 %158 }
 0x204   :  { %240 = vrsqrt.f32 %v162_v33  ;;  %v161_v35 = vmul.f32 0.0078125, %v159_v34 }
 0x206   :  { %v163_v36 = vadd.f32 1e-05, %v161_v35 }
 0x208   :  { %242 = vrsqrt.f32 %v163_v36 }
 0x211   :  { %v241_v37 = vpop.eup %240 }
 0x212   :  { %v166_v39 = vmul.f32 %v241_v37, %v152_v25 }
 0x214   :  { %v174_v41 = vmul.f32 %v199_v38, %v166_v39 }
 0x215   :  { %v243_v42 = vpop.eup %242 }
 0x216   :  { %v182_v43 = vadd.f32 %v200_v40, %v174_v41  ;;  %v167_v44 = vmul.f32 %v243_v42, %v153_v29 }
 0x218   :  { %184 = vst [vmem:[%s338_s6] sm:$0xff] %v182_v43  ;;  %v175_v45 = vmul.f32 %v199_v38, %v167_v44 }
 0x21a   :  { %v183_v46 = vadd.f32 %v200_v40, %v175_v45 }
 0x21c   :  { %185 = vst [vmem:[%s338_s6 + $0x8] sm:$0xff] %v183_v46 }

// kernel: transformer_forward.23
= control target key start
LH: loop header
LB: loop body
LE: loop exit
PB: predicated region body
PF: predicated region fallthrough
CT: control target
= control target key end

     0   :  { %v203_v0 = vmov 0.0   ;;  %vm204_vm0 = vmmov 0   ;;  %s264_s1 = inlined_call_operand.vmem [shape: bf16[128,128], index: 1, kind: input, shape index: {}]   ;;  %s265_s0 = inlined_call_operand.vmem [shape: f32[16,128], index: 0, kind: input, shape index: {}]   ;;  %s266_s2 = inlined_call_operand.vmem [shape: f32[1,128], index: 2, kind: input, shape index: {}]   ;;  %s267_s3 = inlined_call_operand.vmem [shape: f32[16,128], index: 3, kind: output, shape index: {}]  }
   0x1   :  { %173 = vmatprep.subr.bf16.mxu0 %v203_v0  ;;  %v195_v1 = vld [vmem:[%s264_s1 + $0x38] sm:$0xff]   ;;  %189 = vmatprep.mubr.msk.bf16.mxu0 %vm204_vm0, %v203_v0  ;;  %v196_v2 = vld [vmem:[%s264_s1 + $0x30] sm:$0xff]   ;;  %v197_v3 = vld [vmem:[%s264_s1 + $0x28] sm:$0xff]  }
   0x2   :  { %174 = vmatpush3.bf16.msra.mxu0 %v195_v1  ;;  %v198_v4 = vld [vmem:[%s264_s1 + $0x20] sm:$0xff]   ;;  %v199_v5 = vld [vmem:[%s264_s1 + $0x18] sm:$0xff]   ;;  %v200_v6 = vld [vmem:[%s264_s1 + $0x10] sm:$0xff]  }
   0x3   :  { %175 = vmatprep.subr.bf16.mxu0 %v203_v0  ;;  %v201_v7 = vld [vmem:[%s264_s1 + $0x8] sm:$0xff]   ;;  %v202_v8 = vld [vmem:[%s264_s1] sm:$0xff]  }
   0x4   :  { %v23_v9 = vld [vmem:[%s265_s0] sm:$0xff]  ;;  %v24_v10 = vld [vmem:[%s265_s0 + $0x8] sm:$0xff] }
   0x5   :  { %v25_v11 = vpack.c.bf16 %v24_v10, %v23_v9  ;;  %v163_v12 = vld [vmem:[%s266_s2] ss:$0 sm:$0xff] }
   0x6   :  { %176 = vmatpush3.bf16.msra.mxu0 %v196_v2 }
   0x7   :  { %177 = vmatprep.subr.bf16.mxu0 %v203_v0 }
   0xa   :  { %178 = vmatpush3.bf16.msra.mxu0 %v197_v3 }
   0xb   :  { %179 = vmatprep.subr.bf16.mxu0 %v203_v0 }
   0xe   :  { %180 = vmatpush3.bf16.msra.mxu0 %v198_v4 }
   0xf   :  { %181 = vmatprep.subr.bf16.mxu0 %v203_v0 }
  0x12   :  { %182 = vmatpush3.bf16.msra.mxu0 %v199_v5 }
  0x13   :  { %183 = vmatprep.subr.bf16.mxu0 %v203_v0 }
  0x16   :  { %184 = vmatpush3.bf16.msra.mxu0 %v200_v6 }
  0x17   :  { %185 = vmatprep.subr.bf16.mxu0 %v203_v0 }
  0x1a   :  { %186 = vmatpush3.bf16.msra.mxu0 %v201_v7 }
  0x1b   :  { %187 = vmatprep.subr.bf16.mxu0 %v203_v0 }
  0x1e   :  { %188 = vmatpush3.bf16.msra.mxu0 %v202_v8 }
  0x21   :  { %190 = vmatmul.mubr.bf16.vlgmr.msra.gmra.mxu0 %v25_v11 }
  0xe1   :  { %v124_v13 = vpop.f32.mrf.mxu0 }
  0xe2   :  { %v147_v14 = vadd.f32 %v163_v12, %v124_v13 }
  0xe3   :  { %v191_v15 = vpop.f32.mrf.mxu0 }
  0xe4   :  { %149 = vst [vmem:[%s267_s3] sm:$0xff] %v147_v14 }
  0xe5   :  { %v127_v16 = vpop.f32.mrf.mxu0 }
  0xe6   :  { %v148_v17 = vadd.f32 %v163_v12, %v127_v16 }
  0xe7   :  { %v192_v18 = vpop.f32.mrf.mxu0 }
  0xe8   :  { %150 = vst [vmem:[%s267_s3 + $0x8] sm:$0xff] %v148_v17 }

// kernel: transformer_forward.16
= control target key start
LH: loop header
LB: loop body
LE: loop exit
PB: predicated region body
PF: predicated region fallthrough
CT: control target
= control target key end

     0   :  { %s1406_s9 = smov 0   ;;  %s1600_s0 = inlined_call_operand.vmem [shape: f32[2,1,8], index: 0, kind: input, shape index: {}]   ;;  %s1601_s1 = inlined_call_operand.vmem [shape: f32[2,8,384], index: 1, kind: input, shape index: {}]   ;;  %s1602_s2 = inlined_call_operand.vmem [shape: f32[2,8,128], index: 2, kind: output, shape index: {}]  }
   0x1 LB: > { %s1170_s10 = sadd.s32 4294967295, %s1380_s9   ;;  %p1174_p0 = scmp.ge.s32.totalorder %s1380_s9, 1  ;;  %s1380_s9 = sphi %s1406_s9, %s12_s9  }
   0x2   : > { %p120_p1 = scmp.lt.s32.totalorder %s1380_s9, 3 }
   0x4   : > { %p121_p2 = pnand %p1174_p0, %p120_p1 }
   0x5   : > { %p144_p3 = scmp.lt.s32.totalorder (!%p121_p2), %s1170_s10, 1  ;;  %s1384_s18 = smov (!%p121_p2), 112  }
   0x6   : > { %124 = sbr.rel (%p121_p2) target bundleno = 1451 (0x5ab), region = 28  ;;  %s1385_s19 = smov (!%p121_p2), 96  }
   0x7   : > { %s1386_s20 = smov (!%p121_p2), 80   ;;  %s1387_s21 = smov (!%p121_p2), 64  }
   0x8   : > { %s1388_s22 = smov (!%p121_p2), 48   ;;  %s1389_s23 = smov (!%p121_p2), 32  }
   0x9   : > { %s1390_s24 = smov (!%p121_p2), 16  }
   0xb   : > { %v1382_v0 = vmov 0.0   ;;  %vm1383_vm0 = vmmov 0   ;;  %s1604_s10 = smov (!%p144_p3, %s1170_s10), 1  ;;  %vm164_vm1 = vcmask 130048   ;;  %vm219_vm2 = vcmask 64512  }
   0xc   : > { %1228 = vmatprep.subr.bf16.mxu0 %v1382_v0  ;;  %1230 = vmatprep.mubr.msk.bf16.mxu0 %vm1383_vm0, %v1382_v0  ;;  %s1324_s11 = smul.u32 24, %s1604_s10  ;;  %s146_s17 = scalar_lea.vmem %s1600_s0, %s1604_s10  ;;  %vm235_vm3 = vcmask 1043456   ;;  %vm1095_vm4 = vcmask 261120   ;;  %vm1097_vm5 = vcmask 392192   ;;  %vm1099_vm6 = vcmask 523264  }
   0xd   : > { %1234 = vmatprep.subr.bf16.mxu1 %v1382_v0  ;;  %1236 = vmatprep.mubr.msk.bf16.mxu1 %vm1383_vm0, %v1382_v0  ;;  %v1439_v7 = vld [vmem:[%s146_s17] ss:$0 sm:$0xff]  ;;  %vm1101_vm7 = vcmask 654336   ;;  %s1176_s25 = sshll.u32 %s1604_s10, 3  ;;  %vm1103_vm8 = vcmask 785408   ;;  %vm1105_vm9 = vcmask 916480  }
   0xe   : > { %s1426_s14 = scalar_lea.vmem %s1601_s1, %s1324_s11  ;;  %s155_s28 = scalar_lea.vmem %s1602_s2, %s1176_s25 }
   0xf   : > { %v158_v1 = vld [vmem:[%s1426_s14 + $0x8] sm:$0xff]  ;;  %v157_v4 = vld [vmem:[%s1426_s14] sm:$0xff]  ;;  %v159_v19 = vld [vmem:[%s1426_s14 + $0x10] sm:$0xff] }
  0x10   : > { %v162_v2 = vpack.c.bf16 %v158_v1, %v158_v1  ;;  %v161_v5 = vpack.c.bf16 %v157_v4, %v157_v4  ;;  %v1455_v20 = vpack.c.bf16 %v159_v19, %v159_v19 }
  0x12   : > { %v169_v3 = vsel %vm164_vm1, %v162_v2, 0  ;;  %283 = vrot.lane.b32.xlu1 %v162_v2, %s1384_s18  ;;  %v237_v21 = vsel %vm235_vm3, %v1455_v20, 0 }
  0x13   : > { %1229 = vmatpush3.bf16.xpose.msra.mxu0 %v169_v3  ;;  %1235 = vmatpush3.bf16.msra.mxu1 %v237_v21 }
  0x14   : > { %1246 = vmatprep.subr.bf16.mxu0 %v1382_v0  ;;  %1240 = vmatprep.subr.bf16.mxu1 %v1382_v0 }
  0x16   : > { %280 = vrot.lane.b32.xlu1 %v161_v5, %s1384_s18 }
  0x1a   : > { %1231 = vmatmul.mubr.msk.bf16.vlgmr.msra.gmra.mxu0 %vm164_vm1, %v161_v5  ;;  %394 = vrot.lane.b32.xlu1 %v161_v5, %s1385_s19 }
  0x1b   : > { %1248 = vmatprep.mubr.msk.bf16.mxu0 %vm1383_vm0, %v1382_v0 }
  0x1e   : > { %508 = vrot.lane.b32.xlu1 %v162_v2, %s1386_s20 }
  0x22   : > { %506 = vrot.lane.b32.xlu1 %v161_v5, %s1386_s20 }
  0x26   : > { %620 = vrot.lane.b32.xlu1 %v162_v2, %s1387_s21 }
  0x2a   : > { %618 = vrot.lane.b32.xlu1 %v161_v5, %s1387_s21 }
  0x2e   : > { %732 = vrot.lane.b32.xlu1 %v162_v2, %s1388_s22 }
  0x32   : > { %844 = vrot.lane.b32.xlu1 %v162_v2, %s1389_s23 }
  0x36   : > { %956 = vrot.lane.b32.xlu1 %v162_v2, %s1390_s24 }
  0x84   : > { %v284_v23 = vpop.permute.xlu1 %283 }
  0x85   : > { %v289_v28 = vsel %vm164_vm1, %v284_v23, 0 }
  0x88   : > { %v281_v24 = vpop.permute.xlu1 %280 }
  0x8c   : > { %v395_v27 = vpop.permute.xlu1 %394 }
  0x90   : > { %v509_v31 = vpop.permute.xlu1 %508 }
  0x91   : > { %v514_v34 = vsel %vm164_vm1, %v509_v31, 0 }
  0x94   : > { %v507_v33 = vpop.permute.xlu1 %506 }
  0x98   : > { %v621_v35 = vpop.permute.xlu1 %620 }
  0x99   : > { %v626_v37 = vsel %vm164_vm1, %v621_v35, 0 }
  0x9c   : > { %v619_v36 = vpop.permute.xlu1 %618 }
  0xa0   : > { %v733_v38 = vpop.permute.xlu1 %732 }
  0xa1   : > { %v738_v39 = vsel %vm164_vm1, %v733_v38, 0 }
  0xa4   : > { %v845_v40 = vpop.permute.xlu1 %844 }
  0xa5   : > { %v850_v42 = vsel %vm164_vm1, %v845_v40, 0 }
  0xa8   : > { %v957_v43 = vpop.permute.xlu1 %956 }
  0xa9   : > { %v962_v45 = vsel %vm164_vm1, %v957_v43, 0 }
  0xda   : > { %v205_v6 = vpop.f32.mrf.mxu0 }
  0xdb   : > { %v211_v8 = vmul.f32 0.25, %v205_v6 }
  0xdc   : > { %v1232_v9 = vpop.f32.mrf.mxu0 }
  0xdd   : > { %v218_v10 = vadd.f32 %v1439_v7, %v211_v8 }
  0xde   : > { %v208_v11 = vpop.f32.mrf.mxu0 }
  0xdf   : > { %v220_v12 = vsel %vm219_vm2, %v218_v10, -inf }
  0xe0   : > { %v1233_v13 = vpop.f32.mrf.mxu0  ;;  %221 = vmax.xlane.f32.xlu0 %v220_v12 }
 0x169   : > { %v222_v14 = vpop.xlane.xlu0 %221 }
 0x16a   : > { %v223_v15 = vsub.f32 %v218_v10, %v222_v14 }
 0x16c   : > { %v224_v16 = vmul.f32 1.442695, %v223_v15 }
 0x16e   : > { %1342 = vpow2.f32 %v224_v16 }
 0x17b   : > { %v1343_v17 = vpop.eup %1342 }
 0x17c   : > { %v226_v18 = vsel %vm219_vm2, %v1343_v17, 0.0 }
 0x17d   : > { %227 = vadd.xlane.f32.xlu0 %v226_v18 }
 0x193   : > { %396 = vrot.lane.b32.xlu0 %v162_v2, %s1385_s19 }
 0x197   : > { %730 = vrot.lane.b32.xlu0 %v161_v5, %s1388_s22 }
 0x19b   : > { %842 = vrot.lane.b32.xlu0 %v161_v5, %s1389_s23 }
 0x19f   : > { %954 = vrot.lane.b32.xlu0 %v161_v5, %s1390_s24 }
 0x206   : > { %v228_v22 = vpop.xlane.xlu0 %227 }
 0x207   : > { %1344 = vrcp.f32 %v228_v22 }
 0x20a   : > { %v397_v30 = vpop.permute.xlu0 %396 }
 0x20b   : > { %v402_v32 = vsel %vm164_vm1, %v397_v30, 0 }
 0x20e   : > { %v731_v41 = vpop.permute.xlu0 %730 }
 0x212   : > { %v843_v44 = vpop.permute.xlu0 %842 }
 0x214   : > { %v1345_v25 = vpop.eup %1344 }
 0x215   : > { %v230_v26 = vmul.f32 %v1345_v25, %v1343_v17 }
 0x216   : > { %v955_v46 = vpop.permute.xlu0 %954 }
 0x217   : > { %v231_v29 = vpack.c.bf16 %v230_v26, %v230_v26 }
 0x219   : > { %1237 = vmatmul.mubr.msk.bf16.vlgmr.msra.gmra.mxu1 %vm219_vm2, %v231_v29 }
 0x21a   : > { %1241 = vmatpush3.bf16.xpose.msra.mxu1 %v289_v28  ;;  %1242 = vmatprep.mubr.msk.bf16.mxu1 %vm1383_vm0, %v1382_v0 }
 0x21b   : > { %1252 = vmatprep.subr.bf16.mxu1 %v1382_v0 }
 0x221   : > { %1243 = vmatmul.mubr.msk.bf16.vlgmr.msra.gmra.mxu1 %vm164_vm1, %v281_v24 }
 0x222   : > { %1253 = vmatpush3.bf16.xpose.msra.mxu1 %v402_v32  ;;  %1254 = vmatprep.mubr.msk.bf16.mxu1 %vm1383_vm0, %v1382_v0 }
 0x223   : > { %1264 = vmatprep.subr.bf16.mxu1 %v1382_v0 }
 0x229   : > { %1255 = vmatmul.mubr.msk.bf16.vlgmr.msra.gmra.mxu1 %vm164_vm1, %v395_v27 }
 0x22a   : > { %1265 = vmatpush3.bf16.xpose.msra.mxu1 %v514_v34  ;;  %1266 = vmatprep.mubr.msk.bf16.mxu1 %vm1383_vm0, %v1382_v0 }
 0x22b   : > { %1276 = vmatprep.subr.bf16.mxu1 %v1382_v0 }
 0x231   : > { %1267 = vmatmul.mubr.msk.bf16.vlgmr.msra.gmra.mxu1 %vm164_vm1, %v507_v33 }
 0x232   : > { %1277 = vmatpush3.bf16.xpose.msra.mxu1 %v626_v37  ;;  %1278 = vmatprep.mubr.msk.bf16.mxu1 %vm1383_vm0, %v1382_v0 }
 0x233   : > { %1288 = vmatprep.subr.bf16.mxu1 %v1382_v0 }
 0x239   : > { %1279 = vmatmul.mubr.msk.bf16.vlgmr.msra.gmra.mxu1 %vm164_vm1, %v619_v36 }
 0x23a   : > { %1289 = vmatpush3.bf16.xpose.msra.mxu1 %v738_v39  ;;  %1290 = vmatprep.mubr.msk.bf16.mxu1 %vm1383_vm0, %v1382_v0 }
 0x23b   : > { %1300 = vmatprep.subr.bf16.mxu1 %v1382_v0 }
 0x241   : > { %1291 = vmatmul.mubr.msk.bf16.vlgmr.msra.gmra.mxu1 %vm164_vm1, %v731_v41 }
 0x242   : > { %1301 = vmatpush3.bf16.xpose.msra.mxu1 %v850_v42  ;;  %1302 = vmatprep.mubr.msk.bf16.mxu1 %vm1383_vm0, %v1382_v0 }
 0x243   : > { %1312 = vmatprep.subr.bf16.mxu1 %v1382_v0 }
 0x249   : > { %1303 = vmatmul.mubr.msk.bf16.vlgmr.msra.gmra.mxu1 %vm164_vm1, %v843_v44 }
 0x24a   : > { %1313 = vmatpush3.bf16.xpose.msra.mxu1 %v962_v45  ;;  %1314 = vmatprep.mubr.msk.bf16.mxu1 %vm1383_vm0, %v1382_v0 }
 0x251   : > { %1315 = vmatmul.mubr.msk.bf16.vlgmr.msra.gmra.mxu1 %vm164_vm1, %v955_v46 }
 0x2d9   : > { %v1499_v47 = vpop.f32.mrf.mxu1 }
 0x2db   : > { %v1238_v48 = vpop.f32.mrf.mxu1 }
 0x2dd   : > { %v276_v49 = vpop.f32.mrf.mxu1 }
 0x2df   : > { %v1239_v50 = vpop.f32.mrf.mxu1 }
 0x2e1   : > { %v325_v51 = vpop.f32.mrf.mxu1 }
 0x2e2   : > { %v331_v52 = vmul.f32 0.25, %v325_v51 }
 0x2e3   : > { %v1244_v53 = vpop.f32.mrf.mxu1 }
 0x2e4   : > { %v332_v54 = vadd.f32 %v1439_v7, %v331_v52 }
 0x2e5   : > { %v328_v55 = vpop.f32.mrf.mxu1 }
 0x2e6   : > { %v333_v56 = vsel %vm219_vm2, %v332_v54, -inf }
 0x2e7   : > { %334 = vmax.xlane.f32.xlu1 %v333_v56  ;;  %v1245_v57 = vpop.f32.mrf.mxu1 }
 0x2e9   : > { %v438_v58 = vpop.f32.mrf.mxu1 }
 0x2ea   : > { %v444_v59 = vmul.f32 0.25, %v438_v58 }
 0x2eb   : > { %v1256_v60 = vpop.f32.mrf.mxu1 }
 0x2ec   : > { %v445_v61 = vadd.f32 %v1439_v7, %v444_v59 }
 0x2ed   : > { %v441_v62 = vpop.f32.mrf.mxu1 }
 0x2ee   : > { %v446_v63 = vsel %vm219_vm2, %v445_v61, -inf }
 0x2ef   : > { %447 = vmax.xlane.f32.xlu0 %v446_v63  ;;  %v1257_v1 = vpop.f32.mrf.mxu1 }
 0x2f1   : > { %v550_v2 = vpop.f32.mrf.mxu1 }
 0x2f2   : > { %v556_v3 = vmul.f32 0.25, %v550_v2 }
 0x2f3   : > { %v1268_v4 = vpop.f32.mrf.mxu1 }
 0x2f4   : > { %v557_v5 = vadd.f32 %v1439_v7, %v556_v3 }
 0x2f5   : > { %v553_v6 = vpop.f32.mrf.mxu1 }
 0x2f6   : > { %v558_v8 = vsel %vm219_vm2, %v557_v5, -inf }
 0x2f7   : > { %559 = vmax.xlane.f32.xlu0 %v558_v8  ;;  %v1269_v9 = vpop.f32.mrf.mxu1 }
 0x2f9   : > { %v662_v10 = vpop.f32.mrf.mxu1 }
 0x2fa   : > { %v668_v11 = vmul.f32 0.25, %v662_v10 }
 0x2fb   : > { %v1280_v12 = vpop.f32.mrf.mxu1 }
 0x2fc   : > { %v669_v13 = vadd.f32 %v1439_v7, %v668_v11 }
 0x2fd   : > { %v665_v14 = vpop.f32.mrf.mxu1 }
 0x2fe   : > { %v670_v15 = vsel %vm219_vm2, %v669_v13, -inf }
 0x2ff   : > { %671 = vmax.xlane.f32.xlu1 %v670_v15  ;;  %v1281_v16 = vpop.f32.mrf.mxu1 }
 0x301   : > { %v774_v17 = vpop.f32.mrf.mxu1 }
 0x302   : > { %v780_v18 = vmul.f32 0.25, %v774_v17 }
 0x303   : > { %v1292_v19 = vpop.f32.mrf.mxu1 }
 0x304   : > { %v781_v21 = vadd.f32 %v1439_v7, %v780_v18 }
 0x305   : > { %v777_v22 = vpop.f32.mrf.mxu1 }
 0x306   : > { %v782_v23 = vsel %vm219_vm2, %v781_v21, -inf }
 0x307   : > { %783 = vmax.xlane.f32.xlu0 %v782_v23  ;;  %v1293_v24 = vpop.f32.mrf.mxu1 }
 0x309   : > { %v886_v25 = vpop.f32.mrf.mxu1 }
 0x30a   : > { %v892_v26 = vmul.f32 0.25, %v886_v25 }
 0x30b   : > { %v1304_v27 = vpop.f32.mrf.mxu1 }
 0x30c   : > { %v893_v28 = vadd.f32 %v1439_v7, %v892_v26 }
 0x30d   : > { %v889_v29 = vpop.f32.mrf.mxu1 }
 0x30e   : > { %v894_v30 = vsel %vm219_vm2, %v893_v28, -inf }
 0x30f   : > { %895 = vmax.xlane.f32.xlu1 %v894_v30  ;;  %v1305_v31 = vpop.f32.mrf.mxu1 }
 0x311   : > { %v998_v32 = vpop.f32.mrf.mxu1 }
 0x312   : > { %v1004_v33 = vmul.f32 0.25, %v998_v32 }
 0x313   : > { %v1316_v34 = vpop.f32.mrf.mxu1 }
 0x314   : > { %v1005_v35 = vadd.f32 %v1439_v7, %v1004_v33 }
 0x315   : > { %v1001_v36 = vpop.f32.mrf.mxu1 }
 0x316   : > { %v1006_v37 = vsel %vm219_vm2, %v1005_v35, -inf }
 0x317   : > { %1007 = vmax.xlane.f32.xlu0 %v1006_v37  ;;  %v1317_v38 = vpop.f32.mrf.mxu1 }
 0x320   : > { %346 = vrot.lane.b32.xlu1 %v1455_v20, %s1384_s18 }
 0x32d   : > { %458 = vrot.lane.b32.xlu0 %v1455_v20, %s1385_s19 }
 0x370   : > { %v335_v39 = vpop.xlane.xlu1 %334 }
 0x371   : > { %v336_v40 = vsub.f32 %v332_v54, %v335_v39 }
 0x373   : > { %v337_v41 = vmul.f32 1.442695, %v336_v40 }
 0x375   : > { %1346 = vpow2.f32 %v337_v41 }
 0x378   : > { %v448_v42 = vpop.xlane.xlu0 %447 }
 0x379   : > { %v449_v43 = vsub.f32 %v445_v61, %v448_v42 }
 0x37b   : > { %v450_v44 = vmul.f32 1.442695, %v449_v43 }
 0x37d   : > { %1348 = vpow2.f32 %v450_v44 }
 0x380   : > { %v560_v7 = vpop.xlane.xlu0 %559 }
 0x381   : > { %v561_v45 = vsub.f32 %v557_v5, %v560_v7 }
 0x382   : > { %v1347_v46 = vpop.eup %1346 }
 0x383   : > { %v562_v48 = vmul.f32 1.442695, %v561_v45  ;;  %v339_v49 = vsel %vm219_vm2, %v1347_v46, 0.0 }
 0x384   : > { %340 = vadd.xlane.f32.xlu1 %v339_v49 }
 0x385   : > { %1350 = vpow2.f32 %v562_v48 }
 0x388   : > { %v672_v54 = vpop.xlane.xlu1 %671 }
 0x389   : > { %v673_v58 = vsub.f32 %v669_v13, %v672_v54 }
 0x38a   : > { %v1349_v50 = vpop.eup %1348 }
 0x38b   : > { %v452_v51 = vsel %vm219_vm2, %v1349_v50, 0.0  ;;  %v674_v60 = vmul.f32 1.442695, %v673_v58 }
 0x38c   : > { %453 = vadd.xlane.f32.xlu0 %v452_v51 }
 0x38d   : > { %1352 = vpow2.f32 %v674_v60 }
 0x390   : > { %v784_v59 = vpop.xlane.xlu0 %783 }
 0x391   : > { %v785_v61 = vsub.f32 %v781_v21, %v784_v59 }
 0x392   : > { %v1521_v52 = vpop.eup %1350 }
 0x393   : > { %v564_v53 = vsel %vm219_vm2, %v1521_v52, 0.0  ;;  %v786_v1 = vmul.f32 1.442695, %v785_v61 }
 0x394   : > { %565 = vadd.xlane.f32.xlu1 %v564_v53 }
 0x395   : > { %1354 = vpow2.f32 %v786_v1 }
 0x398   : > { %v896_v55 = vpop.xlane.xlu1 %895 }
 0x399   : > { %v897_v63 = vsub.f32 %v893_v28, %v896_v55 }
 0x39a   : > { %v1353_v5 = vpop.eup %1352 }
 0x39b   : > { %v898_v3 = vmul.f32 1.442695, %v897_v63  ;;  %v676_v6 = vsel %vm219_vm2, %v1353_v5, 0.0 }
 0x39c   : > { %v347_v56 = vpop.permute.xlu1 %346 }
 0x39d   : > { %v352_v57 = vsel %vm235_vm3, %v347_v56, 0  ;;  %1356 = vpow2.f32 %v898_v3 }
 0x39e   : > { %1247 = vmatpush3.bf16.msra.mxu0 %v352_v57 }
 0x39f   : > { %1258 = vmatprep.subr.bf16.mxu0 %v1382_v0 }
 0x3a0   : > { %v1008_v62 = vpop.xlane.xlu0 %1007 }
 0x3a1   : > { %v1009_v2 = vsub.f32 %v1005_v35, %v1008_v62 }
 0x3a2   : > { %570 = vrot.lane.b32.xlu0 %v1455_v20, %s1386_s20  ;;  %v1532_v8 = vpop.eup %1354 }
 0x3a3   : > { %v1010_v4 = vmul.f32 1.442695, %v1009_v2  ;;  %v788_v10 = vsel %vm219_vm2, %v1532_v8, 0.0 }
 0x3a4   : > { %v459_v15 = vpop.permute.xlu0 %458 }
 0x3a5   : > { %682 = vrot.lane.b32.xlu1 %v1455_v20, %s1387_s21  ;;  %1358 = vpow2.f32 %v1010_v4  ;;  %v464_v22 = vsel %vm235_vm3, %v459_v15, 0 }
 0x3aa   : > { %v1534_v9 = vpop.eup %1356 }
 0x3ab   : > { %v900_v12 = vsel %vm219_vm2, %v1534_v9, 0.0 }
 0x3b2   : > { %v1538_v11 = vpop.eup %1358 }
 0x3b3   : > { %v1012_v13 = vsel %vm219_vm2, %v1538_v11, 0.0 }
 0x3c1   : > { %677 = vadd.xlane.f32.xlu0 %v676_v6 }
 0x3c5   : > { %789 = vadd.xlane.f32.xlu0 %v788_v10 }
 0x3c9   : > { %901 = vadd.xlane.f32.xlu1 %v900_v12  ;;  %1013 = vadd.xlane.f32.xlu0 %v1012_v13 }
 0x3da   : > { %906 = vrot.lane.b32.xlu1 %v1455_v20, %s1389_s23 }
 0x3de   : > { %1018 = vrot.lane.b32.xlu1 %v1455_v20, %s1390_s24 }
 0x3df   : > { %794 = vrot.lane.b32.xlu0 %v1455_v20, %s1388_s22 }
 0x40d   : > { %v341_v14 = vpop.xlane.xlu1 %340 }
 0x40e   : > { %1360 = vrcp.f32 %v341_v14 }
 0x415   : > { %v454_v16 = vpop.xlane.xlu0 %453 }
 0x416   : > { %1362 = vrcp.f32 %v454_v16 }
 0x419   : > { %v571_v24 = vpop.permute.xlu0 %570 }
 0x41a   : > { %v576_v26 = vsel %vm235_vm3, %v571_v24, 0 }
 0x41b   : > { %v1361_v17 = vpop.eup %1360 }
 0x41c   : > { %v343_v18 = vmul.f32 %v1361_v17, %v1347_v46 }
 0x41d   : > { %v566_v19 = vpop.xlane.xlu1 %565 }
 0x41e   : > { %1364 = vrcp.f32 %v566_v19  ;;  %v344_v21 = vpack.c.bf16 %v343_v18, %v343_v18 }
 0x420   : > { %1249 = vmatmul.mubr.msk.bf16.vlgmr.msra.gmra.mxu0 %vm219_vm2, %v344_v21 }
 0x421   : > { %1259 = vmatpush3.bf16.msra.mxu0 %v464_v22  ;;  %1260 = vmatprep.mubr.msk.bf16.mxu0 %vm1383_vm0, %v1382_v0  ;;  %v683_v29 = vpop.permute.xlu1 %682 }
 0x422   : > { %1270 = vmatprep.subr.bf16.mxu0 %v1382_v0  ;;  %v688_v31 = vsel %vm235_vm3, %v683_v29, 0 }
 0x423   : > { %v1363_v20 = vpop.eup %1362 }
 0x424   : > { %v456_v23 = vmul.f32 %v1363_v20, %v1349_v50 }
 0x426   : > { %v457_v25 = vpack.c.bf16 %v456_v23, %v456_v23 }
 0x428   : > { %1261 = vmatmul.mubr.msk.bf16.vlgmr.msra.gmra.mxu0 %vm219_vm2, %v457_v25 }
 0x429   : > { %1271 = vmatpush3.bf16.msra.mxu0 %v576_v26  ;;  %1272 = vmatprep.mubr.msk.bf16.mxu0 %vm1383_vm0, %v1382_v0 }
 0x42a   : > { %1282 = vmatprep.subr.bf16.mxu0 %v1382_v0 }
 0x42b   : > { %v1365_v27 = vpop.eup %1364 }
 0x42c   : > { %v568_v28 = vmul.f32 %v1365_v27, %v1521_v52 }
 0x42e   : > { %v569_v30 = vpack.c.bf16 %v568_v28, %v568_v28 }
 0x430   : > { %1273 = vmatmul.mubr.msk.bf16.vlgmr.msra.gmra.mxu0 %vm219_vm2, %v569_v30 }
 0x431   : > { %1283 = vmatpush3.bf16.msra.mxu0 %v688_v31  ;;  %1284 = vmatprep.mubr.msk.bf16.mxu0 %vm1383_vm0, %v1382_v0 }
 0x432   : > { %1294 = vmatprep.subr.bf16.mxu0 %v1382_v0 }
 0x44a   : > { %v678_v32 = vpop.xlane.xlu0 %677 }
 0x44b   : > { %1366 = vrcp.f32 %v678_v32 }
 0x44e   : > { %v790_v33 = vpop.xlane.xlu0 %789 }
 0x44f   : > { %1368 = vrcp.f32 %v790_v33 }
 0x452   : > { %v902_v34 = vpop.xlane.xlu1 %901  ;;  %v1014_v35 = vpop.xlane.xlu0 %1013 }
 0x453   : > { %1370 = vrcp.f32 %v902_v34 }
 0x454   : > { %1372 = vrcp.f32 %v1014_v35 }
 0x456   : > { %v795_v37 = vpop.permute.xlu0 %794  ;;  %v907_v43 = vpop.permute.xlu1 %906 }
 0x457   : > { %v800_v39 = vsel %vm235_vm3, %v795_v37, 0  ;;  %v912_v44 = vsel %vm235_vm3, %v907_v43, 0 }
 0x458   : > { %v1367_v36 = vpop.eup %1366 }
 0x459   : > { %v680_v38 = vmul.f32 %v1367_v36, %v1353_v5 }
 0x45a   : > { %v1019_v48 = vpop.permute.xlu1 %1018 }
 0x45b   : > { %v681_v40 = vpack.c.bf16 %v680_v38, %v680_v38  ;;  %v1024_v49 = vsel %vm235_vm3, %v1019_v48, 0 }
 0x45c   : > { %v1369_v41 = vpop.eup %1368 }
 0x45d   : > { %1285 = vmatmul.mubr.msk.bf16.vlgmr.msra.gmra.mxu0 %vm219_vm2, %v681_v40  ;;  %v792_v42 = vmul.f32 %v1369_v41, %v1532_v8 }
 0x45e   : > { %1295 = vmatpush3.bf16.msra.mxu0 %v800_v39  ;;  %1296 = vmatprep.mubr.msk.bf16.mxu0 %vm1383_vm0, %v1382_v0 }
 0x45f   : > { %1306 = vmatprep.subr.bf16.mxu0 %v1382_v0  ;;  %v793_v7 = vpack.c.bf16 %v792_v42, %v792_v42 }
 0x460   : > { %v1371_v45 = vpop.eup %1370 }
 0x461   : > { %v904_v46 = vmul.f32 %v1371_v45, %v1534_v9  ;;  %v1373_v51 = vpop.eup %1372 }
 0x462   : > { %v1016_v52 = vmul.f32 %v1373_v51, %v1538_v11 }
 0x463   : > { %v905_v50 = vpack.c.bf16 %v904_v46, %v904_v46 }
 0x464   : > { %v1017_v53 = vpack.c.bf16 %v1016_v52, %v1016_v52 }
 0x465   : > { %1297 = vmatmul.mubr.msk.bf16.vlgmr.msra.gmra.mxu0 %vm219_vm2, %v793_v7 }
 0x466   : > { %1307 = vmatpush3.bf16.msra.mxu0 %v912_v44  ;;  %1308 = vmatprep.mubr.msk.bf16.mxu0 %vm1383_vm0, %v1382_v0 }
 0x467   : > { %1318 = vmatprep.subr.bf16.mxu0 %v1382_v0 }
 0x46d   : > { %1309 = vmatmul.mubr.msk.bf16.vlgmr.msra.gmra.mxu0 %vm219_vm2, %v905_v50 }
 0x46e   : > { %1319 = vmatpush3.bf16.msra.mxu0 %v1024_v49  ;;  %1320 = vmatprep.mubr.msk.bf16.mxu0 %vm1383_vm0, %v1382_v0 }
 0x475   : > { %1321 = vmatmul.mubr.msk.bf16.vlgmr.msra.gmra.mxu0 %vm219_vm2, %v1017_v53 }
 0x4e0   : > { %v388_v54 = vpop.f32.mrf.mxu0 }
 0x4e1   : > { %1067 = vrot.lane.b32.xlu1 %v388_v54, %s1390_s24 }
 0x4e2   : > { %v1250_v55 = vpop.f32.mrf.mxu0 }
 0x4e4   : > { %v391_v56 = vpop.f32.mrf.mxu0 }
 0x4e6   : > { %v1251_v57 = vpop.f32.mrf.mxu0 }
 0x4e8   : > { %v500_v58 = vpop.f32.mrf.mxu0 }
 0x4e9   : > { %1071 = vrot.lane.b32.xlu1 %v500_v58, %s1389_s23 }
 0x4ea   : > { %v1262_v59 = vpop.f32.mrf.mxu0 }
 0x4ec   : > { %v503_v60 = vpop.f32.mrf.mxu0 }
 0x4ee   : > { %v1263_v61 = vpop.f32.mrf.mxu0 }
 0x4f0   : > { %v612_v62 = vpop.f32.mrf.mxu0 }
 0x4f1   : > { %1075 = vrot.lane.b32.xlu0 %v612_v62, %s1388_s22 }
 0x4f2   : > { %v1274_v0 = vpop.f32.mrf.mxu0 }
 0x4f4   : > { %v615_v63 = vpop.f32.mrf.mxu0 }
 0x4f6   : > { %v1275_v1 = vpop.f32.mrf.mxu0 }
 0x51d   : > { %v724_v2 = vpop.f32.mrf.mxu0 }
 0x51e   : > { %1079 = vrot.lane.b32.xlu1 %v724_v2, %s1387_s21 }
 0x51f   : > { %v1286_v3 = vpop.f32.mrf.mxu0 }
 0x521   : > { %v727_v4 = vpop.f32.mrf.mxu0 }
 0x523   : > { %v1287_v5 = vpop.f32.mrf.mxu0 }
 0x525   : > { %v836_v6 = vpop.f32.mrf.mxu0 }
 0x526   : > { %1083 = vrot.lane.b32.xlu0 %v836_v6, %s1386_s20 }
 0x527   : > { %v1298_v8 = vpop.f32.mrf.mxu0 }
 0x529   : > { %v839_v9 = vpop.f32.mrf.mxu0 }
 0x52b   : > { %v1299_v10 = vpop.f32.mrf.mxu0 }
 0x52d   : > { %v948_v11 = vpop.f32.mrf.mxu0 }
 0x52e   : > { %1087 = vrot.lane.b32.xlu1 %v948_v11, %s1385_s19 }
 0x52f   : > { %v1310_v12 = vpop.f32.mrf.mxu0 }
 0x531   : > { %v951_v13 = vpop.f32.mrf.mxu0 }
 0x533   : > { %v1311_v14 = vpop.f32.mrf.mxu0 }
 0x535   : > { %v1060_v15 = vpop.f32.mrf.mxu0 }
 0x536   : > { %1091 = vrot.lane.b32.xlu0 %v1060_v15, %s1384_s18 }
 0x537   : > { %v1322_v16 = vpop.f32.mrf.mxu0 }
 0x539   : > { %v1063_v17 = vpop.f32.mrf.mxu0 }
 0x53b   : > { %v1323_v18 = vpop.f32.mrf.mxu0 }
 0x553   : > { %v1068_v19 = vpop.permute.xlu1 %1067 }
 0x554   : > { %v1094_v23 = vsel %vm164_vm1, %v1499_v47, %v1068_v19 }
 0x55b   : > { %v1072_v21 = vpop.permute.xlu1 %1071 }
 0x55c   : > { %v1096_v24 = vsel %vm1095_vm4, %v1094_v23, %v1072_v21 }
 0x563   : > { %v1076_v22 = vpop.permute.xlu0 %1075 }
 0x564   : > { %v1098_v26 = vsel %vm1097_vm5, %v1096_v24, %v1076_v22 }
 0x590   : > { %v1080_v20 = vpop.permute.xlu1 %1079 }
 0x591   : > { %v1100_v28 = vsel %vm1099_vm6, %v1098_v26, %v1080_v20 }
 0x598   : > { %v1084_v25 = vpop.permute.xlu0 %1083 }
 0x599   : > { %v1102_v29 = vsel %vm1101_vm7, %v1100_v28, %v1084_v25 }
 0x5a0   : > { %v1088_v27 = vpop.permute.xlu1 %1087 }
 0x5a1   : > { %v1104_v30 = vsel %vm1103_vm8, %v1102_v29, %v1088_v27 }
 0x5a8   : > { %v1092_v31 = vpop.permute.xlu0 %1091 }
 0x5a9   : > { %v1106_v32 = vsel %vm1105_vm9, %v1104_v30, %v1092_v31 }
 0x5aa   : > { %1107 = vst [vmem:[%s155_s28] sm:$0xff] %v1106_v32 }
 0x5ab PF: > { %s12_s9 = sadd.s32 1, %s1380_s9  }
 0x5ac   : > { %p9_p4 = scmp.ge.s32.totalorder %s12_s9, 4  }
 0x5ae   :  { %11 = sbr.rel (!%p9_p4) target bundleno = 1 (0x1), region = 61 }

// kernel: transformer_forward.19
= control target key start
LH: loop header
LB: loop body
LE: loop exit
PB: predicated region body
PF: predicated region fallthrough
CT: control target
= control target key end

     0   :  { %s107_s0 = inlined_call_operand.vmem [shape: f32[16,128], index: 0, kind: input, shape index: {}]   ;;  %s108_s1 = inlined_call_operand.vmem [shape: f32[1,128], index: 1, kind: input, shape index: {}]   ;;  %s109_s2 = inlined_call_operand.vmem [shape: f32[1,128], index: 2, kind: input, shape index: {}]   ;;  %s110_s3 = inlined_call_operand.vmem [shape: f32[16,128], index: 3, kind: output, shape index: {}]  }
   0x1   :  { %v14_v0 = vld [vmem:[%s107_s0] sm:$0xff]  ;;  %v15_v1 = vld [vmem:[%s107_s0 + $0x8] sm:$0xff] }
   0x2   :  { %18 = vadd.xlane.f32.xlu0 %v14_v0  ;;  %v63_v17 = vld [vmem:[%s108_s1] ss:$0 sm:$0xff] }
   0x3   :  { %v64_v19 = vld [vmem:[%s109_s2] ss:$0 sm:$0xff] }
   0x6   :  { %20 = vadd.xlane.f32.xlu0 %v15_v1 }
  0x8b   :  { %v19_v2 = vpop.xlane.xlu0 %18 }
  0x8c   :  { %v23_v3 = vmul.f32 0.0078125, %v19_v2 }
  0x8e   :  { %v25_v4 = vsub.f32 %v14_v0, %v23_v3 }
  0x8f   :  { %v21_v5 = vpop.xlane.xlu0 %20 }
  0x90   :  { %v24_v6 = vmul.f32 0.0078125, %v21_v5  ;;  %v27_v7 = vmul.f32 %v25_v4, %v25_v4 }
  0x92   :  { %v26_v8 = vsub.f32 %v15_v1, %v24_v6  ;;  %29 = vadd.xlane.f32.xlu1 %v27_v7 }
  0x94   :  { %v28_v9 = vmul.f32 %v26_v8, %v26_v8 }
  0x96   :  { %31 = vadd.xlane.f32.xlu1 %v28_v9 }
 0x11b   :  { %v30_v10 = vpop.xlane.xlu1 %29 }
 0x11c   :  { %v33_v11 = vmul.f32 0.0078125, %v30_v10 }
 0x11e   :  { %v35_v12 = vadd.f32 1e-05, %v33_v11 }
 0x11f   :  { %v32_v13 = vpop.xlane.xlu1 %31 }
 0x120   :  { %65 = vrsqrt.f32 %v35_v12  ;;  %v34_v14 = vmul.f32 0.0078125, %v32_v13 }
 0x122   :  { %v36_v15 = vadd.f32 1e-05, %v34_v14 }
 0x124   :  { %67 = vrsqrt.f32 %v36_v15 }
 0x12d   :  { %v66_v16 = vpop.eup %65 }
 0x12e   :  { %v39_v18 = vmul.f32 %v66_v16, %v25_v4 }
 0x130   :  { %v47_v20 = vmul.f32 %v63_v17, %v39_v18 }
 0x131   :  { %v68_v21 = vpop.eup %67 }
 0x132   :  { %v55_v22 = vadd.f32 %v64_v19, %v47_v20  ;;  %v40_v23 = vmul.f32 %v68_v21, %v26_v8 }
 0x134   :  { %57 = vst [vmem:[%s110_s3] sm:$0xff] %v55_v22  ;;  %v48_v24 = vmul.f32 %v63_v17, %v40_v23 }
 0x136   :  { %v56_v25 = vadd.f32 %v64_v19, %v48_v24 }
 0x138   :  { %58 = vst [vmem:[%s110_s3 + $0x8] sm:$0xff] %v56_v25 }

// kernel: transformer_forward.24
= control target key start
LH: loop header
LB: loop body
LE: loop exit
PB: predicated region body
PF: predicated region fallthrough
CT: control target
= control target key end

     0   :  { %v249_v1 = vmov 0   ;;  %v186_v20 = vlaneseq  ;;  %s339_s1 = inlined_call_operand.vmem [shape: bf16[128,256], index: 1, kind: input, shape index: {}]   ;;  %s340_s0 = inlined_call_operand.vmem [shape: f32[16,128], index: 0, kind: input, shape index: {}]   ;;  %s341_s2 = inlined_call_operand.vmem [shape: f32[1,256], index: 2, kind: input, shape index: {}]   ;;  %s342_s3 = inlined_call_operand.vmem [shape: f32[16,256], index: 3, kind: output, shape index: {}]  }
   0x1   :  { %v225_v0 = vld [vmem:[%s339_s1 + $0x74] ss:$8 sps:$4 sm:$0xff]   ;;  %158 = vmatprep.mubr.bf16.mxu0 %v249_v1  ;;  %v227_v2 = vld [vmem:[%s339_s1 + $0x70] ss:$8 sps:$4 sm:$0xff]   ;;  %v228_v3 = vld [vmem:[%s339_s1 + $0x64] ss:$8 sps:$4 sm:$0xff]  }
   0x2   :  { %126 = vmatprep.subr.bf16.mxu0 %v225_v0  ;;  %v230_v4 = vld [vmem:[%s339_s1 + $0x60] ss:$8 sps:$4 sm:$0xff]   ;;  %v231_v5 = vld [vmem:[%s339_s1 + $0x54] ss:$8 sps:$4 sm:$0xff]   ;;  %v233_v6 = vld [vmem:[%s339_s1 + $0x50] ss:$8 sps:$4 sm:$0xff]  }
   0x3   :  { %127 = vmatpush1.bf16.msra.mxu0 %v227_v2  ;;  %v234_v7 = vld [vmem:[%s339_s1 + $0x44] ss:$8 sps:$4 sm:$0xff]   ;;  %v236_v8 = vld [vmem:[%s339_s1 + $0x40] ss:$8 sps:$4 sm:$0xff]   ;;  %v237_v9 = vld [vmem:[%s339_s1 + $0x34] ss:$8 sps:$4 sm:$0xff]  }
   0x4   :  { %128 = vmatprep.subr.bf16.mxu0 %v228_v3  ;;  %v239_v10 = vld [vmem:[%s339_s1 + $0x30] ss:$8 sps:$4 sm:$0xff]   ;;  %v240_v11 = vld [vmem:[%s339_s1 + $0x24] ss:$8 sps:$4 sm:$0xff]   ;;  %v242_v12 = vld [vmem:[%s339_s1 + $0x20] ss:$8 sps:$4 sm:$0xff]  }
   0x5   :  { %v243_v13 = vld [vmem:[%s339_s1 + $0x14] ss:$8 sps:$4 sm:$0xff]   ;;  %v245_v14 = vld [vmem:[%s339_s1 + $0x10] ss:$8 sps:$4 sm:$0xff]   ;;  %v246_v15 = vld [vmem:[%s339_s1 + $0x4] ss:$8 sps:$4 sm:$0xff]  }
   0x6   :  { %v248_v16 = vld [vmem:[%s339_s1] ss:$8 sps:$4 sm:$0xff]   ;;  %v187_v21 = vshrl.u32 %v186_v20, 7 }
   0x7   :  { %129 = vmatpush1.bf16.msra.mxu0 %v230_v4  ;;  %v27_v17 = vld [vmem:[%s340_s0] sm:$0xff]  ;;  %v28_v18 = vld [vmem:[%s340_s0 + $0x8] sm:$0xff] }
   0x8   :  { %130 = vmatprep.subr.bf16.mxu0 %v231_v5  ;;  %v29_v19 = vpack.c.bf16 %v28_v18, %v27_v17  ;;  %v188_v22 = vsub.s32 0, %v187_v21  ;;  %v184_v23 = vld [vmem:[%s341_s2] sm:$0x3]  ;;  %v192_v24 = vsub.s32 1, %v187_v21 }
   0xa   :  { %v189_v25 = vrot.slane %v184_v23, %v188_v22  ;;  %v193_v26 = vrot.slane %v184_v23, %v192_v24 }
   0xb   :  { %131 = vmatpush1.bf16.msra.mxu0 %v233_v6 }
   0xc   :  { %132 = vmatprep.subr.bf16.mxu0 %v234_v7 }
   0xf   :  { %133 = vmatpush1.bf16.msra.mxu0 %v236_v8 }
  0x10   :  { %134 = vmatprep.subr.bf16.mxu0 %v237_v9 }
  0x13   :  { %135 = vmatpush1.bf16.msra.mxu0 %v239_v10 }
  0x14   :  { %136 = vmatprep.subr.bf16.mxu0 %v240_v11 }
  0x17   :  { %137 = vmatpush1.bf16.msra.mxu0 %v242_v12 }
  0x18   :  { %138 = vmatprep.subr.bf16.mxu0 %v243_v13 }
  0x1b   :  { %139 = vmatpush1.bf16.msra.mxu0 %v245_v14 }
  0x1c   :  { %140 = vmatprep.subr.bf16.mxu0 %v246_v15 }
  0x1f   :  { %141 = vmatpush1.bf16.msra.mxu0 %v248_v16 }
  0x22   :  { %159 = vmatmul.mubr.bf16.vlgmr.msra.gmra.mxu0 %v29_v19 }
  0xe2   :  { %v160_v27 = vpop.f32.mrf.mxu0 }
  0xe3   :  { %v196_v28 = vadd.f32 %v189_v25, %v160_v27 }
  0xe4   :  { %v162_v29 = vpop.f32.mrf.mxu0 }
  0xe5   :  { %200 = vst [vmem:[%s342_s3] sm:$0xff] %v196_v28  ;;  %v197_v30 = vadd.f32 %v193_v26, %v162_v29 }
  0xe6   :  { %v164_v31 = vpop.f32.mrf.mxu0 }
  0xe7   :  { %201 = vst [vmem:[%s342_s3 + $0x8] sm:$0xff] %v197_v30  ;;  %v198_v32 = vadd.f32 %v189_v25, %v164_v31 }
  0xe8   :  { %v166_v33 = vpop.f32.mrf.mxu0 }
  0xe9   :  { %202 = vst [vmem:[%s342_s3 + $0x10] sm:$0xff] %v198_v32  ;;  %v199_v34 = vadd.f32 %v193_v26, %v166_v33 }
  0xeb   :  { %203 = vst [vmem:[%s342_s3 + $0x18] sm:$0xff] %v199_v34 }

// kernel: transformer_forward.18
= control target key start
LH: loop header
LB: loop body
LE: loop exit
PB: predicated region body
PF: predicated region fallthrough
CT: control target
= control target key end

     0   :  { %v514_v1 = vmov 0   ;;  %v48_v36 = vlaneseq  ;;  %s675_s1 = inlined_call_operand.vmem [shape: bf16[128,256], index: 1, kind: input, shape index: {}]   ;;  %s676_s3 = inlined_call_operand.vmem [shape: bf16[256,128], index: 3, kind: input, shape index: {}]   ;;  %s677_s0 = inlined_call_operand.vmem [shape: f32[16,128], index: 0, kind: input, shape index: {}]   ;;  %s678_s2 = inlined_call_operand.vmem [shape: f32[1,256], index: 2, kind: input, shape index: {}]   ;;  %s679_s4 = inlined_call_operand.vmem [shape: f32[1,128], index: 4, kind: input, shape index: {}]   ;;  %s680_s5 = inlined_call_operand.vmem [shape: f32[1,128], index: 5, kind: input, shape index: {}]   ;;  %s681_s6 = inlined_call_operand.vmem [shape: f32[1,128], index: 6, kind: input, shape index: {}]   ;;  %s682_s7 = inlined_call_operand.vmem [shape: f32[16,128], index: 7, kind: output, shape index: {}]  }
   0x1   :  { %v470_v0 = vld [vmem:[%s675_s1 + $0x74] ss:$8 sps:$4 sm:$0xff]   ;;  %170 = vmatprep.mubr.bf16.mxu0 %v514_v1  ;;  %v472_v2 = vld [vmem:[%s675_s1 + $0x70] ss:$8 sps:$4 sm:$0xff]   ;;  %v473_v3 = vld [vmem:[%s675_s1 + $0x64] ss:$8 sps:$4 sm:$0xff]  }
   0x2   :  { %138 = vmatprep.subr.bf16.mxu0 %v470_v0  ;;  %v475_v4 = vld [vmem:[%s675_s1 + $0x60] ss:$8 sps:$4 sm:$0xff]   ;;  %v476_v5 = vld [vmem:[%s675_s1 + $0x54] ss:$8 sps:$4 sm:$0xff]   ;;  %v478_v6 = vld [vmem:[%s675_s1 + $0x50] ss:$8 sps:$4 sm:$0xff]  }
   0x3   :  { %139 = vmatpush1.bf16.msra.mxu0 %v472_v2  ;;  %v479_v7 = vld [vmem:[%s675_s1 + $0x44] ss:$8 sps:$4 sm:$0xff]   ;;  %v481_v8 = vld [vmem:[%s675_s1 + $0x40] ss:$8 sps:$4 sm:$0xff]   ;;  %v482_v9 = vld [vmem:[%s675_s1 + $0x34] ss:$8 sps:$4 sm:$0xff]  }
   0x4   :  { %140 = vmatprep.subr.bf16.mxu0 %v473_v3  ;;  %v494_v10 = vld [vmem:[%s676_s3 + $0x78] sm:$0xff]   ;;  %v485_v13 = vld [vmem:[%s675_s1 + $0x24] ss:$8 sps:$4 sm:$0xff]   ;;  %v496_v14 = vld [vmem:[%s676_s3 + $0x70] sm:$0xff]   ;;  %v49_v37 = vshrl.u32 %v48_v36, 7 }
   0x5   :  { %v484_v11 = vld [vmem:[%s675_s1 + $0x30] ss:$8 sps:$4 sm:$0xff]   ;;  %447 = vmatprep.subr.bf16.mxu1 %v494_v10  ;;  %v498_v16 = vld [vmem:[%s676_s3 + $0x68] sm:$0xff]   ;;  %v488_v18 = vld [vmem:[%s675_s1 + $0x14] ss:$8 sps:$4 sm:$0xff]  }
   0x6   :  { %v495_v12 = vld [vmem:[%s676_s3 + $0x38] sm:$0xff]   ;;  %v497_v15 = vld [vmem:[%s676_s3 + $0x30] sm:$0xff]   ;;  %v487_v17 = vld [vmem:[%s675_s1 + $0x20] ss:$8 sps:$4 sm:$0xff]   ;;  %v54_v38 = vsub.s32 1, %v49_v37  ;;  %v50_v39 = vsub.s32 0, %v49_v37 }
   0x7   :  { %141 = vmatpush1.bf16.msra.mxu0 %v475_v4  ;;  %448 = vmatpush3.bf16.msra.mxu1 %v495_v12  ;;  %v499_v19 = vld [vmem:[%s676_s3 + $0x28] sm:$0xff]   ;;  %v500_v20 = vld [vmem:[%s676_s3 + $0x60] sm:$0xff]   ;;  %v490_v21 = vld [vmem:[%s675_s1 + $0x10] ss:$8 sps:$4 sm:$0xff]  }
   0x8   :  { %142 = vmatprep.subr.bf16.mxu0 %v476_v5  ;;  %449 = vmatprep.subr.bf16.mxu1 %v496_v14  ;;  %v501_v22 = vld [vmem:[%s676_s3 + $0x20] sm:$0xff]   ;;  %v502_v24 = vld [vmem:[%s676_s3 + $0x58] sm:$0xff]   ;;  %v28_v27 = vld [vmem:[%s677_s0 + $0x8] sm:$0xff] }
   0x9   :  { %v491_v23 = vld [vmem:[%s675_s1 + $0x4] ss:$8 sps:$4 sm:$0xff]   ;;  %v493_v25 = vld [vmem:[%s675_s1] ss:$8 sps:$4 sm:$0xff]   ;;  %v503_v28 = vld [vmem:[%s676_s3 + $0x18] sm:$0xff]  }
   0xa   :  { %v27_v26 = vld [vmem:[%s677_s0] sm:$0xff]  ;;  %v504_v30 = vld [vmem:[%s676_s3 + $0x50] sm:$0xff]   ;;  %v506_v32 = vld [vmem:[%s676_s3 + $0x48] sm:$0xff]  }
   0xb   :  { %143 = vmatpush1.bf16.msra.mxu0 %v478_v6  ;;  %450 = vmatpush3.bf16.msra.mxu1 %v497_v15  ;;  %v29_v29 = vpack.c.bf16 %v28_v27, %v27_v26  ;;  %v505_v31 = vld [vmem:[%s676_s3 + $0x10] sm:$0xff]   ;;  %v507_v33 = vld [vmem:[%s676_s3 + $0x8] sm:$0xff]   ;;  %v508_v34 = vld [vmem:[%s676_s3 + $0x40] sm:$0xff]  }
   0xc   :  { %144 = vmatprep.subr.bf16.mxu0 %v479_v7  ;;  %451 = vmatprep.subr.bf16.mxu1 %v498_v16  ;;  %v509_v35 = vld [vmem:[%s676_s3] sm:$0xff]  }
   0xd   :  { %v46_v40 = vld [vmem:[%s678_s2] sm:$0x3] }
   0xe   :  { %v55_v42 = vrot.slane %v46_v40, %v54_v38  ;;  %v51_v43 = vrot.slane %v46_v40, %v50_v39  ;;  %v428_v58 = vld [vmem:[%s679_s4] ss:$0 sm:$0xff] }
   0xf   :  { %145 = vmatpush1.bf16.msra.mxu0 %v481_v8  ;;  %452 = vmatpush3.bf16.msra.mxu1 %v499_v19  ;;  %v445_v19 = vld [vmem:[%s680_s5] ss:$0 sm:$0xff] }
  0x10   :  { %146 = vmatprep.subr.bf16.mxu0 %v482_v9  ;;  %453 = vmatprep.subr.bf16.mxu1 %v500_v20 }
  0x13   :  { %147 = vmatpush1.bf16.msra.mxu0 %v484_v11  ;;  %454 = vmatpush3.bf16.msra.mxu1 %v501_v22 }
  0x14   :  { %148 = vmatprep.subr.bf16.mxu0 %v485_v13  ;;  %455 = vmatprep.subr.bf16.mxu1 %v502_v24 }
  0x17   :  { %149 = vmatpush1.bf16.msra.mxu0 %v487_v17  ;;  %456 = vmatpush3.bf16.msra.mxu1 %v503_v28 }
  0x18   :  { %150 = vmatprep.subr.bf16.mxu0 %v488_v18  ;;  %457 = vmatprep.subr.bf16.mxu1 %v504_v30 }
  0x1b   :  { %151 = vmatpush1.bf16.msra.mxu0 %v490_v21  ;;  %458 = vmatpush3.bf16.msra.mxu1 %v505_v31  ;;  %v446_v21 = vld [vmem:[%s681_s6] ss:$0 sm:$0xff] }
  0x1c   :  { %152 = vmatprep.subr.bf16.mxu0 %v491_v23  ;;  %459 = vmatprep.subr.bf16.mxu1 %v506_v32 }
  0x1f   :  { %153 = vmatpush1.bf16.msra.mxu0 %v493_v25  ;;  %460 = vmatpush3.bf16.msra.mxu1 %v507_v33 }
  0x20   :  { %461 = vmatprep.subr.bf16.mxu1 %v508_v34 }
  0x22   :  { %171 = vmatmul.mubr.bf16.vlgmr.msra.gmra.mxu0 %v29_v29 }
  0x23   :  { %462 = vmatpush3.bf16.msra.mxu1 %v509_v35 }
  0xe2   :  { %v172_v41 = vpop.f32.mrf.mxu0 }
  0xe3   :  { %v173_v48 = vadd.f32 %v172_v41, %v51_v43 }
  0xe4   :  { %v174_v44 = vpop.f32.mrf.mxu0 }
  0xe5   :  { %v175_v46 = vadd.f32 %v174_v44, %v55_v42  ;;  %v181_v54 = vmax.f32 %v173_v48, 0.0 }
  0xe6   :  { %v176_v45 = vpop.f32.mrf.mxu0 }
  0xe7   :  { %v177_v47 = vadd.f32 %v176_v45, %v51_v43  ;;  %v182_v52 = vmax.f32 %v175_v46, 0.0 }
  0xe8   :  { %v178_v49 = vpop.f32.mrf.mxu0 }
  0xe9   :  { %v179_v50 = vadd.f32 %v178_v49, %v55_v42  ;;  %v183_v51 = vmax.f32 %v177_v47, 0.0 }
  0xeb   :  { %v184_v53 = vmax.f32 %v179_v50, 0.0  ;;  %v185_v56 = vpack.c.bf16 %v183_v51, %v181_v54 }
  0xed   :  { %v186_v55 = vpack.c.bf16 %v184_v53, %v182_v52 }
  0xef   :  { %354 = vmatprep.mubr.bf16.mxu1 %v186_v55 }
  0xf0   :  { %355 = vmatmul.mubr.bf16.vlgmr.msra.gmra.mxu1 %v185_v56 }
 0x1b0   :  { %v463_v57 = vpop.f32.mrf.mxu1 }
 0x1b2   :  { %v464_v59 = vpop.f32.mrf.mxu1 }
 0x1b3   :  { %v465_v60 = vadd.f32 %v464_v59, %v463_v57 }
 0x1b4   :  { %v466_v61 = vpop.f32.mrf.mxu1 }
 0x1b5   :  { %v357_v62 = vadd.f32 %v465_v60, %v428_v58 }
 0x1b6   :  { %v467_v63 = vpop.f32.mrf.mxu1 }
 0x1b7   :  { %v468_v0 = vadd.f32 %v467_v63, %v466_v61  ;;  %v363_v1 = vadd.f32 %v357_v62, %v27_v26 }
 0x1b9   :  { %v360_v2 = vadd.f32 %v468_v0, %v428_v58  ;;  %367 = vadd.xlane.f32.xlu0 %v363_v1 }
 0x1bb   :  { %v364_v3 = vadd.f32 %v360_v2, %v28_v27 }
 0x1bd   :  { %369 = vadd.xlane.f32.xlu0 %v364_v3 }
 0x242   :  { %v368_v4 = vpop.xlane.xlu0 %367 }
 0x243   :  { %v372_v5 = vmul.f32 0.0078125, %v368_v4 }
 0x245   :  { %v374_v6 = vsub.f32 %v363_v1, %v372_v5 }
 0x246   :  { %v370_v7 = vpop.xlane.xlu0 %369 }
 0x247   :  { %v373_v8 = vmul.f32 0.0078125, %v370_v7  ;;  %v376_v9 = vmul.f32 %v374_v6, %v374_v6 }
 0x249   :  { %v375_v10 = vsub.f32 %v364_v3, %v373_v8  ;;  %378 = vadd.xlane.f32.xlu1 %v376_v9 }
 0x24b   :  { %v377_v11 = vmul.f32 %v375_v10, %v375_v10 }
 0x24d   :  { %380 = vadd.xlane.f32.xlu1 %v377_v11 }
 0x2d2   :  { %v379_v12 = vpop.xlane.xlu1 %378 }
 0x2d3   :  { %v382_v13 = vmul.f32 0.0078125, %v379_v12 }
 0x2d5   :  { %v384_v14 = vadd.f32 1e-05, %v382_v13 }
 0x2d6   :  { %v381_v15 = vpop.xlane.xlu1 %380 }
 0x2d7   :  { %510 = vrsqrt.f32 %v384_v14  ;;  %v383_v16 = vmul.f32 0.0078125, %v381_v15 }
 0x2d9   :  { %v385_v17 = vadd.f32 1e-05, %v383_v16 }
 0x2db   :  { %512 = vrsqrt.f32 %v385_v17 }
 0x2e4   :  { %v511_v18 = vpop.eup %510 }
 0x2e5   :  { %v388_v20 = vmul.f32 %v511_v18, %v374_v6 }
 0x2e7   :  { %v396_v22 = vmul.f32 %v445_v19, %v388_v20 }
 0x2e8   :  { %v513_v23 = vpop.eup %512 }
 0x2e9   :  { %v404_v24 = vadd.f32 %v446_v21, %v396_v22  ;;  %v389_v25 = vmul.f32 %v513_v23, %v375_v10 }
 0x2eb   :  { %406 = vst [vmem:[%s682_s7] sm:$0xff] %v404_v24  ;;  %v397_v26 = vmul.f32 %v445_v19, %v389_v25 }
 0x2ed   :  { %v405_v27 = vadd.f32 %v446_v21, %v397_v26 }
 0x2ef   :  { %407 = vst [vmem:[%s682_s7 + $0x8] sm:$0xff] %v405_v27 }

// kernel: transformer_forward.25
= control target key start
LH: loop header
LB: loop body
LE: loop exit
PB: predicated region body
PF: predicated region fallthrough
CT: control target
= control target key end

     0   :  { %s1398_s9 = smov 0   ;;  %s1584_s0 = inlined_call_operand.vmem [shape: f32[2,8,128], index: 0, kind: input, shape index: {}]   ;;  %s1585_s1 = inlined_call_operand.vmem [shape: f32[2,8,256], index: 1, kind: input, shape index: {}]   ;;  %s1586_s2 = inlined_call_operand.vmem [shape: f32[2,8,128], index: 2, kind: output, shape index: {}]  }
   0x1 LB: > { %s1161_s10 = sadd.s32 4294967295, %s1372_s9   ;;  %p1165_p0 = scmp.ge.s32.totalorder %s1372_s9, 1  ;;  %s1372_s9 = sphi %s1398_s9, %s12_s9  }
   0x2   : > { %p121_p1 = scmp.lt.s32.totalorder %s1372_s9, 3 }
   0x4   : > { %p122_p2 = pnand %p1165_p0, %p121_p1 }
   0x5   : > { %p146_p3 = scmp.lt.s32.totalorder (!%p122_p2), %s1161_s10, 1  ;;  %s1376_s19 = smov (!%p122_p2), 112  }
   0x6   : > { %125 = sbr.rel (%p122_p2) target bundleno = 1446 (0x5a6), region = 28  ;;  %s1377_s20 = smov (!%p122_p2), 96  }
   0x7   : > { %s1378_s21 = smov (!%p122_p2), 80   ;;  %s1379_s22 = smov (!%p122_p2), 64  }
   0x8   : > { %s1380_s23 = smov (!%p122_p2), 48   ;;  %s1381_s24 = smov (!%p122_p2), 32  }
   0x9   : > { %s1382_s25 = smov (!%p122_p2), 16  }
   0xb   : > { %v1374_v0 = vmov 0.0   ;;  %vm1375_vm0 = vmmov 0   ;;  %s1588_s10 = smov (!%p146_p3, %s1161_s10), 1  ;;  %vm166_vm1 = vcmask 130048   ;;  %vm214_vm2 = vcmask 64512  }
   0xc   : > { %1221 = vmatprep.subr.bf16.mxu0 %v1374_v0  ;;  %1223 = vmatprep.mubr.msk.bf16.mxu0 %vm1375_vm0, %v1374_v0  ;;  %s1188_s11 = sshll.u32 %s1588_s10, 4  ;;  %s1166_s12 = sshll.u32 %s1588_s10, 3  ;;  %vm230_vm3 = vcmask 1043456   ;;  %vm1083_vm4 = vcmask 261120   ;;  %vm1085_vm5 = vcmask 392192   ;;  %vm1087_vm6 = vcmask 523264  }
   0xd   : > { %1227 = vmatprep.subr.bf16.mxu1 %v1374_v0  ;;  %1229 = vmatprep.mubr.msk.bf16.mxu1 %vm1375_vm0, %v1374_v0  ;;  %s1419_s15 = scalar_lea.vmem %s1585_s1, %s1188_s11  ;;  %s149_s18 = scalar_lea.vmem %s1584_s0, %s1166_s12  ;;  %vm1089_vm7 = vcmask 654336   ;;  %vm1091_vm8 = vcmask 785408   ;;  %vm1093_vm9 = vcmask 916480  }
   0xe   : > { %v161_v1 = vld [vmem:[%s1419_s15] sm:$0xff]  ;;  %v162_v17 = vld [vmem:[%s1419_s15 + $0x8] sm:$0xff]  ;;  %s158_s28 = scalar_lea.vmem %s1586_s2, %s1166_s12 }
   0xf   : > { %v164_v2 = vpack.c.bf16 %v161_v1, %v161_v1  ;;  %v160_v4 = vld [vmem:[%s149_s18] sm:$0xff]  ;;  %v1445_v18 = vpack.c.bf16 %v162_v17, %v162_v17 }
  0x10   : > { %v163_v5 = vpack.c.bf16 %v160_v4, %v160_v4 }
  0x11   : > { %v171_v3 = vsel %vm166_vm1, %v164_v2, 0  ;;  %278 = vrot.lane.b32.xlu1 %v164_v2, %s1376_s19  ;;  %v232_v19 = vsel %vm230_vm3, %v1445_v18, 0 }
  0x12   : > { %1222 = vmatpush3.bf16.xpose.msra.mxu0 %v171_v3  ;;  %1228 = vmatpush3.bf16.msra.mxu1 %v232_v19 }
  0x13   : > { %1239 = vmatprep.subr.bf16.mxu0 %v1374_v0  ;;  %1233 = vmatprep.subr.bf16.mxu1 %v1374_v0 }
  0x15   : > { %275 = vrot.lane.b32.xlu1 %v163_v5, %s1376_s19 }
  0x19   : > { %1224 = vmatmul.mubr.msk.bf16.vlgmr.msra.gmra.mxu0 %vm166_vm1, %v163_v5  ;;  %388 = vrot.lane.b32.xlu1 %v163_v5, %s1377_s20 }
  0x1a   : > { %1241 = vmatprep.mubr.msk.bf16.mxu0 %vm1375_vm0, %v1374_v0 }
  0x1d   : > { %501 = vrot.lane.b32.xlu1 %v164_v2, %s1378_s21 }
  0x21   : > { %499 = vrot.lane.b32.xlu1 %v163_v5, %s1378_s21 }
  0x25   : > { %612 = vrot.lane.b32.xlu1 %v164_v2, %s1379_s22 }
  0x29   : > { %610 = vrot.lane.b32.xlu1 %v163_v5, %s1379_s22 }
  0x2d   : > { %723 = vrot.lane.b32.xlu1 %v164_v2, %s1380_s23 }
  0x31   : > { %834 = vrot.lane.b32.xlu1 %v164_v2, %s1381_s24 }
  0x35   : > { %945 = vrot.lane.b32.xlu1 %v164_v2, %s1382_s25 }
  0x83   : > { %v279_v21 = vpop.permute.xlu1 %278 }
  0x84   : > { %v284_v26 = vsel %vm166_vm1, %v279_v21, 0 }
  0x87   : > { %v276_v22 = vpop.permute.xlu1 %275 }
  0x8b   : > { %v389_v25 = vpop.permute.xlu1 %388 }
  0x8f   : > { %v502_v29 = vpop.permute.xlu1 %501 }
  0x90   : > { %v507_v32 = vsel %vm166_vm1, %v502_v29, 0 }
  0x93   : > { %v500_v31 = vpop.permute.xlu1 %499 }
  0x97   : > { %v613_v33 = vpop.permute.xlu1 %612 }
  0x98   : > { %v618_v35 = vsel %vm166_vm1, %v613_v33, 0 }
  0x9b   : > { %v611_v34 = vpop.permute.xlu1 %610 }
  0x9f   : > { %v724_v36 = vpop.permute.xlu1 %723 }
  0xa0   : > { %v729_v37 = vsel %vm166_vm1, %v724_v36, 0 }
  0xa3   : > { %v835_v38 = vpop.permute.xlu1 %834 }
  0xa4   : > { %v840_v40 = vsel %vm166_vm1, %v835_v38, 0 }
  0xa7   : > { %v946_v41 = vpop.permute.xlu1 %945 }
  0xa8   : > { %v951_v43 = vsel %vm166_vm1, %v946_v41, 0 }
  0xd9   : > { %v207_v6 = vpop.f32.mrf.mxu0 }
  0xda   : > { %v213_v7 = vmul.f32 0.25, %v207_v6 }
  0xdb   : > { %v1225_v8 = vpop.f32.mrf.mxu0 }
  0xdc   : > { %v215_v9 = vsel %vm214_vm2, %v213_v7, -inf }
  0xdd   : > { %216 = vmax.xlane.f32.xlu0 %v215_v9  ;;  %v210_v10 = vpop.f32.mrf.mxu0 }
  0xdf   : > { %v1226_v11 = vpop.f32.mrf.mxu0 }
 0x166   : > { %v217_v12 = vpop.xlane.xlu0 %216 }
 0x167   : > { %v218_v13 = vsub.f32 %v213_v7, %v217_v12 }
 0x169   : > { %v219_v14 = vmul.f32 1.442695, %v218_v13 }
 0x16b   : > { %1334 = vpow2.f32 %v219_v14 }
 0x178   : > { %v1335_v15 = vpop.eup %1334 }
 0x179   : > { %v221_v16 = vsel %vm214_vm2, %v1335_v15, 0.0 }
 0x17a   : > { %222 = vadd.xlane.f32.xlu0 %v221_v16 }
 0x190   : > { %390 = vrot.lane.b32.xlu0 %v164_v2, %s1377_s20 }
 0x194   : > { %721 = vrot.lane.b32.xlu0 %v163_v5, %s1380_s23 }
 0x198   : > { %832 = vrot.lane.b32.xlu0 %v163_v5, %s1381_s24 }
 0x19c   : > { %943 = vrot.lane.b32.xlu0 %v163_v5, %s1382_s25 }
 0x203   : > { %v223_v20 = vpop.xlane.xlu0 %222 }
 0x204   : > { %1336 = vrcp.f32 %v223_v20 }
 0x207   : > { %v391_v28 = vpop.permute.xlu0 %390 }
 0x208   : > { %v396_v30 = vsel %vm166_vm1, %v391_v28, 0 }
 0x20b   : > { %v722_v39 = vpop.permute.xlu0 %721 }
 0x20f   : > { %v833_v42 = vpop.permute.xlu0 %832 }
 0x211   : > { %v1337_v23 = vpop.eup %1336 }
 0x212   : > { %v225_v24 = vmul.f32 %v1337_v23, %v1335_v15 }
 0x213   : > { %v944_v44 = vpop.permute.xlu0 %943 }
 0x214   : > { %v226_v27 = vpack.c.bf16 %v225_v24, %v225_v24 }
 0x216   : > { %1230 = vmatmul.mubr.msk.bf16.vlgmr.msra.gmra.mxu1 %vm214_vm2, %v226_v27 }
 0x217   : > { %1234 = vmatpush3.bf16.xpose.msra.mxu1 %v284_v26  ;;  %1235 = vmatprep.mubr.msk.bf16.mxu1 %vm1375_vm0, %v1374_v0 }
 0x218   : > { %1245 = vmatprep.subr.bf16.mxu1 %v1374_v0 }
 0x21e   : > { %1236 = vmatmul.mubr.msk.bf16.vlgmr.msra.gmra.mxu1 %vm166_vm1, %v276_v22 }
 0x21f   : > { %1246 = vmatpush3.bf16.xpose.msra.mxu1 %v396_v30  ;;  %1247 = vmatprep.mubr.msk.bf16.mxu1 %vm1375_vm0, %v1374_v0 }
 0x220   : > { %1257 = vmatprep.subr.bf16.mxu1 %v1374_v0 }
 0x226   : > { %1248 = vmatmul.mubr.msk.bf16.vlgmr.msra.gmra.mxu1 %vm166_vm1, %v389_v25 }
 0x227   : > { %1258 = vmatpush3.bf16.xpose.msra.mxu1 %v507_v32  ;;  %1259 = vmatprep.mubr.msk.bf16.mxu1 %vm1375_vm0, %v1374_v0 }
 0x228   : > { %1269 = vmatprep.subr.bf16.mxu1 %v1374_v0 }
 0x22e   : > { %1260 = vmatmul.mubr.msk.bf16.vlgmr.msra.gmra.mxu1 %vm166_vm1, %v500_v31 }
 0x22f   : > { %1270 = vmatpush3.bf16.xpose.msra.mxu1 %v618_v35  ;;  %1271 = vmatprep.mubr.msk.bf16.mxu1 %vm1375_vm0, %v1374_v0 }
 0x230   : > { %1281 = vmatprep.subr.bf16.mxu1 %v1374_v0 }
 0x236   : > { %1272 = vmatmul.mubr.msk.bf16.vlgmr.msra.gmra.mxu1 %vm166_vm1, %v611_v34 }
 0x237   : > { %1282 = vmatpush3.bf16.xpose.msra.mxu1 %v729_v37  ;;  %1283 = vmatprep.mubr.msk.bf16.mxu1 %vm1375_vm0, %v1374_v0 }
 0x238   : > { %1293 = vmatprep.subr.bf16.mxu1 %v1374_v0 }
 0x23e   : > { %1284 = vmatmul.mubr.msk.bf16.vlgmr.msra.gmra.mxu1 %vm166_vm1, %v722_v39 }
 0x23f   : > { %1294 = vmatpush3.bf16.xpose.msra.mxu1 %v840_v40  ;;  %1295 = vmatprep.mubr.msk.bf16.mxu1 %vm1375_vm0, %v1374_v0 }
 0x240   : > { %1305 = vmatprep.subr.bf16.mxu1 %v1374_v0 }
 0x246   : > { %1296 = vmatmul.mubr.msk.bf16.vlgmr.msra.gmra.mxu1 %vm166_vm1, %v833_v42 }
 0x247   : > { %1306 = vmatpush3.bf16.xpose.msra.mxu1 %v951_v43  ;;  %1307 = vmatprep.mubr.msk.bf16.mxu1 %vm1375_vm0, %v1374_v0 }
 0x24e   : > { %1308 = vmatmul.mubr.msk.bf16.vlgmr.msra.gmra.mxu1 %vm166_vm1, %v944_v44 }
 0x2d6   : > { %v1489_v45 = vpop.f32.mrf.mxu1 }
 0x2d8   : > { %v1231_v46 = vpop.f32.mrf.mxu1 }
 0x2da   : > { %v271_v47 = vpop.f32.mrf.mxu1 }
 0x2dc   : > { %v1232_v48 = vpop.f32.mrf.mxu1 }
 0x2de   : > { %v320_v49 = vpop.f32.mrf.mxu1 }
 0x2df   : > { %v326_v50 = vmul.f32 0.25, %v320_v49 }
 0x2e0   : > { %v1237_v51 = vpop.f32.mrf.mxu1 }
 0x2e1   : > { %v327_v52 = vsel %vm214_vm2, %v326_v50, -inf }
 0x2e2   : > { %328 = vmax.xlane.f32.xlu1 %v327_v52  ;;  %v323_v53 = vpop.f32.mrf.mxu1 }
 0x2e4   : > { %v1238_v54 = vpop.f32.mrf.mxu1 }
 0x2e6   : > { %v432_v55 = vpop.f32.mrf.mxu1 }
 0x2e7   : > { %v438_v56 = vmul.f32 0.25, %v432_v55 }
 0x2e8   : > { %v1249_v57 = vpop.f32.mrf.mxu1 }
 0x2e9   : > { %v439_v58 = vsel %vm214_vm2, %v438_v56, -inf }
 0x2ea   : > { %440 = vmax.xlane.f32.xlu0 %v439_v58  ;;  %v435_v59 = vpop.f32.mrf.mxu1 }
 0x2ec   : > { %v1250_v60 = vpop.f32.mrf.mxu1 }
 0x2ee   : > { %v543_v61 = vpop.f32.mrf.mxu1 }
 0x2ef   : > { %v549_v62 = vmul.f32 0.25, %v543_v61 }
 0x2f0   : > { %v1261_v63 = vpop.f32.mrf.mxu1 }
 0x2f1   : > { %v550_v1 = vsel %vm214_vm2, %v549_v62, -inf }
 0x2f2   : > { %551 = vmax.xlane.f32.xlu0 %v550_v1  ;;  %v546_v2 = vpop.f32.mrf.mxu1 }
 0x2f4   : > { %v1262_v3 = vpop.f32.mrf.mxu1 }
 0x2f6   : > { %v654_v4 = vpop.f32.mrf.mxu1 }
 0x2f7   : > { %v660_v5 = vmul.f32 0.25, %v654_v4 }
 0x2f8   : > { %v1273_v6 = vpop.f32.mrf.mxu1 }
 0x2f9   : > { %v661_v7 = vsel %vm214_vm2, %v660_v5, -inf }
 0x2fa   : > { %662 = vmax.xlane.f32.xlu1 %v661_v7  ;;  %v657_v8 = vpop.f32.mrf.mxu1 }
 0x2fc   : > { %v1274_v9 = vpop.f32.mrf.mxu1 }
 0x2fe   : > { %v765_v10 = vpop.f32.mrf.mxu1 }
 0x2ff   : > { %v771_v11 = vmul.f32 0.25, %v765_v10 }
 0x300   : > { %v1285_v12 = vpop.f32.mrf.mxu1 }
 0x301   : > { %v772_v13 = vsel %vm214_vm2, %v771_v11, -inf }
 0x302   : > { %773 = vmax.xlane.f32.xlu0 %v772_v13  ;;  %v768_v14 = vpop.f32.mrf.mxu1 }
 0x304   : > { %v1286_v15 = vpop.f32.mrf.mxu1 }
 0x306   : > { %v876_v16 = vpop.f32.mrf.mxu1 }
 0x307   : > { %v882_v17 = vmul.f32 0.25, %v876_v16 }
 0x308   : > { %v1297_v19 = vpop.f32.mrf.mxu1 }
 0x309   : > { %v883_v20 = vsel %vm214_vm2, %v882_v17, -inf }
 0x30a   : > { %884 = vmax.xlane.f32.xlu1 %v883_v20  ;;  %v879_v21 = vpop.f32.mrf.mxu1 }
 0x30c   : > { %v1298_v22 = vpop.f32.mrf.mxu1 }
 0x30e   : > { %v987_v23 = vpop.f32.mrf.mxu1 }
 0x30f   : > { %v993_v24 = vmul.f32 0.25, %v987_v23 }
 0x310   : > { %v1309_v25 = vpop.f32.mrf.mxu1 }
 0x311   : > { %v994_v26 = vsel %vm214_vm2, %v993_v24, -inf }
 0x312   : > { %995 = vmax.xlane.f32.xlu0 %v994_v26  ;;  %v990_v27 = vpop.f32.mrf.mxu1 }
 0x314   : > { %v1310_v28 = vpop.f32.mrf.mxu1 }
 0x31b   : > { %340 = vrot.lane.b32.xlu1 %v1445_v18, %s1376_s19 }
 0x328   : > { %451 = vrot.lane.b32.xlu0 %v1445_v18, %s1377_s20 }
 0x36b   : > { %v329_v29 = vpop.xlane.xlu1 %328 }
 0x36c   : > { %v330_v30 = vsub.f32 %v326_v50, %v329_v29 }
 0x36e   : > { %v331_v31 = vmul.f32 1.442695, %v330_v30 }
 0x370   : > { %1338 = vpow2.f32 %v331_v31 }
 0x373   : > { %v441_v32 = vpop.xlane.xlu0 %440 }
 0x374   : > { %v442_v33 = vsub.f32 %v438_v56, %v441_v32 }
 0x376   : > { %v443_v34 = vmul.f32 1.442695, %v442_v33 }
 0x378   : > { %1340 = vpow2.f32 %v443_v34 }
 0x37b   : > { %v552_v35 = vpop.xlane.xlu0 %551 }
 0x37c   : > { %v553_v36 = vsub.f32 %v549_v62, %v552_v35 }
 0x37d   : > { %v1339_v37 = vpop.eup %1338 }
 0x37e   : > { %v554_v38 = vmul.f32 1.442695, %v553_v36  ;;  %v333_v39 = vsel %vm214_vm2, %v1339_v37, 0.0 }
 0x37f   : > { %334 = vadd.xlane.f32.xlu1 %v333_v39 }
 0x380   : > { %1342 = vpow2.f32 %v554_v38 }
 0x383   : > { %v663_v44 = vpop.xlane.xlu1 %662 }
 0x384   : > { %v664_v49 = vsub.f32 %v660_v5, %v663_v44 }
 0x385   : > { %v1341_v40 = vpop.eup %1340 }
 0x386   : > { %v445_v41 = vsel %vm214_vm2, %v1341_v40, 0.0  ;;  %v665_v51 = vmul.f32 1.442695, %v664_v49 }
 0x387   : > { %446 = vadd.xlane.f32.xlu0 %v445_v41 }
 0x388   : > { %1344 = vpow2.f32 %v665_v51 }
 0x38b   : > { %v774_v50 = vpop.xlane.xlu0 %773 }
 0x38c   : > { %v775_v52 = vsub.f32 %v771_v11, %v774_v50 }
 0x38d   : > { %v1504_v42 = vpop.eup %1342 }
 0x38e   : > { %v556_v43 = vsel %vm214_vm2, %v1504_v42, 0.0  ;;  %v776_v55 = vmul.f32 1.442695, %v775_v52 }
 0x38f   : > { %557 = vadd.xlane.f32.xlu1 %v556_v43 }
 0x390   : > { %1346 = vpow2.f32 %v776_v55 }
 0x393   : > { %v885_v46 = vpop.xlane.xlu1 %884 }
 0x394   : > { %v886_v54 = vsub.f32 %v882_v17, %v885_v46 }
 0x395   : > { %v1345_v59 = vpop.eup %1344 }
 0x396   : > { %v887_v57 = vmul.f32 1.442695, %v886_v54  ;;  %v667_v60 = vsel %vm214_vm2, %v1345_v59, 0.0 }
 0x397   : > { %v341_v47 = vpop.permute.xlu1 %340 }
 0x398   : > { %v346_v48 = vsel %vm230_vm3, %v341_v47, 0  ;;  %1348 = vpow2.f32 %v887_v57 }
 0x399   : > { %1240 = vmatpush3.bf16.msra.mxu0 %v346_v48 }
 0x39a   : > { %1251 = vmatprep.subr.bf16.mxu0 %v1374_v0 }
 0x39b   : > { %v996_v53 = vpop.xlane.xlu0 %995 }
 0x39c   : > { %v997_v56 = vsub.f32 %v993_v24, %v996_v53 }
 0x39d   : > { %562 = vrot.lane.b32.xlu0 %v1445_v18, %s1378_s21  ;;  %v1515_v61 = vpop.eup %1346 }
 0x39e   : > { %v998_v58 = vmul.f32 1.442695, %v997_v56  ;;  %v778_v63 = vsel %vm214_vm2, %v1515_v61, 0.0 }
 0x39f   : > { %v452_v5 = vpop.permute.xlu0 %451 }
 0x3a0   : > { %673 = vrot.lane.b32.xlu1 %v1445_v18, %s1379_s22  ;;  %1350 = vpow2.f32 %v998_v58  ;;  %v457_v11 = vsel %vm230_vm3, %v452_v5, 0 }
 0x3a5   : > { %v1517_v62 = vpop.eup %1348 }
 0x3a6   : > { %v889_v2 = vsel %vm214_vm2, %v1517_v62, 0.0 }
 0x3ad   : > { %v1521_v1 = vpop.eup %1350 }
 0x3ae   : > { %v1000_v3 = vsel %vm214_vm2, %v1521_v1, 0.0 }
 0x3bc   : > { %668 = vadd.xlane.f32.xlu0 %v667_v60 }
 0x3c0   : > { %779 = vadd.xlane.f32.xlu0 %v778_v63 }
 0x3c4   : > { %890 = vadd.xlane.f32.xlu1 %v889_v2  ;;  %1001 = vadd.xlane.f32.xlu0 %v1000_v3 }
 0x3d5   : > { %895 = vrot.lane.b32.xlu1 %v1445_v18, %s1381_s24 }
 0x3d9   : > { %1006 = vrot.lane.b32.xlu1 %v1445_v18, %s1382_s25 }
 0x3da   : > { %784 = vrot.lane.b32.xlu0 %v1445_v18, %s1380_s23 }
 0x408   : > { %v335_v4 = vpop.xlane.xlu1 %334 }
 0x409   : > { %1352 = vrcp.f32 %v335_v4 }
 0x410   : > { %v447_v6 = vpop.xlane.xlu0 %446 }
 0x411   : > { %1354 = vrcp.f32 %v447_v6 }
 0x414   : > { %v563_v13 = vpop.permute.xlu0 %562 }
 0x415   : > { %v568_v15 = vsel %vm230_vm3, %v563_v13, 0 }
 0x416   : > { %v1353_v7 = vpop.eup %1352 }
 0x417   : > { %v337_v8 = vmul.f32 %v1353_v7, %v1339_v37 }
 0x418   : > { %v558_v9 = vpop.xlane.xlu1 %557 }
 0x419   : > { %1356 = vrcp.f32 %v558_v9  ;;  %v338_v10 = vpack.c.bf16 %v337_v8, %v337_v8 }
 0x41b   : > { %1242 = vmatmul.mubr.msk.bf16.vlgmr.msra.gmra.mxu0 %vm214_vm2, %v338_v10 }
 0x41c   : > { %1252 = vmatpush3.bf16.msra.mxu0 %v457_v11  ;;  %1253 = vmatprep.mubr.msk.bf16.mxu0 %vm1375_vm0, %v1374_v0  ;;  %v674_v19 = vpop.permute.xlu1 %673 }
 0x41d   : > { %1263 = vmatprep.subr.bf16.mxu0 %v1374_v0  ;;  %v679_v21 = vsel %vm230_vm3, %v674_v19, 0 }
 0x41e   : > { %v1355_v18 = vpop.eup %1354 }
 0x41f   : > { %v449_v12 = vmul.f32 %v1355_v18, %v1341_v40 }
 0x421   : > { %v450_v14 = vpack.c.bf16 %v449_v12, %v449_v12 }
 0x423   : > { %1254 = vmatmul.mubr.msk.bf16.vlgmr.msra.gmra.mxu0 %vm214_vm2, %v450_v14 }
 0x424   : > { %1264 = vmatpush3.bf16.msra.mxu0 %v568_v15  ;;  %1265 = vmatprep.mubr.msk.bf16.mxu0 %vm1375_vm0, %v1374_v0 }
 0x425   : > { %1275 = vmatprep.subr.bf16.mxu0 %v1374_v0 }
 0x426   : > { %v1357_v16 = vpop.eup %1356 }
 0x427   : > { %v560_v17 = vmul.f32 %v1357_v16, %v1504_v42 }
 0x429   : > { %v561_v20 = vpack.c.bf16 %v560_v17, %v560_v17 }
 0x42b   : > { %1266 = vmatmul.mubr.msk.bf16.vlgmr.msra.gmra.mxu0 %vm214_vm2, %v561_v20 }
 0x42c   : > { %1276 = vmatpush3.bf16.msra.mxu0 %v679_v21  ;;  %1277 = vmatprep.mubr.msk.bf16.mxu0 %vm1375_vm0, %v1374_v0 }
 0x42d   : > { %1287 = vmatprep.subr.bf16.mxu0 %v1374_v0 }
 0x445   : > { %v669_v22 = vpop.xlane.xlu0 %668 }
 0x446   : > { %1358 = vrcp.f32 %v669_v22 }
 0x449   : > { %v780_v23 = vpop.xlane.xlu0 %779 }
 0x44a   : > { %1360 = vrcp.f32 %v780_v23 }
 0x44d   : > { %v891_v24 = vpop.xlane.xlu1 %890  ;;  %v1002_v25 = vpop.xlane.xlu0 %1001 }
 0x44e   : > { %1362 = vrcp.f32 %v891_v24 }
 0x44f   : > { %1364 = vrcp.f32 %v1002_v25 }
 0x451   : > { %v785_v27 = vpop.permute.xlu0 %784  ;;  %v896_v33 = vpop.permute.xlu1 %895 }
 0x452   : > { %v790_v29 = vsel %vm230_vm3, %v785_v27, 0  ;;  %v901_v34 = vsel %vm230_vm3, %v896_v33, 0 }
 0x453   : > { %v1359_v26 = vpop.eup %1358 }
 0x454   : > { %v671_v28 = vmul.f32 %v1359_v26, %v1345_v59 }
 0x455   : > { %v1007_v38 = vpop.permute.xlu1 %1006 }
 0x456   : > { %v672_v30 = vpack.c.bf16 %v671_v28, %v671_v28  ;;  %v1012_v39 = vsel %vm230_vm3, %v1007_v38, 0 }
 0x457   : > { %v1361_v31 = vpop.eup %1360 }
 0x458   : > { %1278 = vmatmul.mubr.msk.bf16.vlgmr.msra.gmra.mxu0 %vm214_vm2, %v672_v30  ;;  %v782_v32 = vmul.f32 %v1361_v31, %v1515_v61 }
 0x459   : > { %1288 = vmatpush3.bf16.msra.mxu0 %v790_v29  ;;  %1289 = vmatprep.mubr.msk.bf16.mxu0 %vm1375_vm0, %v1374_v0 }
 0x45a   : > { %1299 = vmatprep.subr.bf16.mxu0 %v1374_v0  ;;  %v783_v35 = vpack.c.bf16 %v782_v32, %v782_v32 }
 0x45b   : > { %v1363_v36 = vpop.eup %1362 }
 0x45c   : > { %v893_v37 = vmul.f32 %v1363_v36, %v1517_v62  ;;  %v1365_v41 = vpop.eup %1364 }
 0x45d   : > { %v1004_v42 = vmul.f32 %v1365_v41, %v1521_v1 }
 0x45e   : > { %v894_v40 = vpack.c.bf16 %v893_v37, %v893_v37 }
 0x45f   : > { %v1005_v43 = vpack.c.bf16 %v1004_v42, %v1004_v42 }
 0x460   : > { %1290 = vmatmul.mubr.msk.bf16.vlgmr.msra.gmra.mxu0 %vm214_vm2, %v783_v35 }
 0x461   : > { %1300 = vmatpush3.bf16.msra.mxu0 %v901_v34  ;;  %1301 = vmatprep.mubr.msk.bf16.mxu0 %vm1375_vm0, %v1374_v0 }
 0x462   : > { %1311 = vmatprep.subr.bf16.mxu0 %v1374_v0 }
 0x468   : > { %1302 = vmatmul.mubr.msk.bf16.vlgmr.msra.gmra.mxu0 %vm214_vm2, %v894_v40 }
 0x469   : > { %1312 = vmatpush3.bf16.msra.mxu0 %v1012_v39  ;;  %1313 = vmatprep.mubr.msk.bf16.mxu0 %vm1375_vm0, %v1374_v0 }
 0x470   : > { %1314 = vmatmul.mubr.msk.bf16.vlgmr.msra.gmra.mxu0 %vm214_vm2, %v1005_v43 }
 0x4db   : > { %v382_v44 = vpop.f32.mrf.mxu0 }
 0x4dc   : > { %1055 = vrot.lane.b32.xlu1 %v382_v44, %s1382_s25 }
 0x4dd   : > { %v1243_v46 = vpop.f32.mrf.mxu0 }
 0x4df   : > { %v385_v47 = vpop.f32.mrf.mxu0 }
 0x4e1   : > { %v1244_v48 = vpop.f32.mrf.mxu0 }
 0x4e3   : > { %v493_v49 = vpop.f32.mrf.mxu0 }
 0x4e4   : > { %1059 = vrot.lane.b32.xlu1 %v493_v49, %s1381_s24 }
 0x4e5   : > { %v1255_v50 = vpop.f32.mrf.mxu0 }
 0x4e7   : > { %v496_v51 = vpop.f32.mrf.mxu0 }
 0x4e9   : > { %v1256_v52 = vpop.f32.mrf.mxu0 }
 0x4eb   : > { %v604_v53 = vpop.f32.mrf.mxu0 }
 0x4ec   : > { %1063 = vrot.lane.b32.xlu0 %v604_v53, %s1380_s23 }
 0x4ed   : > { %v1267_v0 = vpop.f32.mrf.mxu0 }
 0x4ef   : > { %v607_v54 = vpop.f32.mrf.mxu0 }
 0x4f1   : > { %v1268_v55 = vpop.f32.mrf.mxu0 }
 0x518   : > { %v715_v56 = vpop.f32.mrf.mxu0 }
 0x519   : > { %1067 = vrot.lane.b32.xlu1 %v715_v56, %s1379_s22 }
 0x51a   : > { %v1279_v57 = vpop.f32.mrf.mxu0 }
 0x51c   : > { %v718_v58 = vpop.f32.mrf.mxu0 }
 0x51e   : > { %v1280_v59 = vpop.f32.mrf.mxu0 }
 0x520   : > { %v826_v60 = vpop.f32.mrf.mxu0 }
 0x521   : > { %1071 = vrot.lane.b32.xlu0 %v826_v60, %s1378_s21 }
 0x522   : > { %v1291_v61 = vpop.f32.mrf.mxu0 }
 0x524   : > { %v829_v62 = vpop.f32.mrf.mxu0 }
 0x526   : > { %v1292_v63 = vpop.f32.mrf.mxu0 }
 0x528   : > { %v937_v1 = vpop.f32.mrf.mxu0 }
 0x529   : > { %1075 = vrot.lane.b32.xlu1 %v937_v1, %s1377_s20 }
 0x52a   : > { %v1303_v2 = vpop.f32.mrf.mxu0 }
 0x52c   : > { %v940_v3 = vpop.f32.mrf.mxu0 }
 0x52e   : > { %v1304_v4 = vpop.f32.mrf.mxu0 }
 0x530   : > { %v1048_v5 = vpop.f32.mrf.mxu0 }
 0x531   : > { %1079 = vrot.lane.b32.xlu0 %v1048_v5, %s1376_s19 }
 0x532   : > { %v1315_v6 = vpop.f32.mrf.mxu0 }
 0x534   : > { %v1051_v7 = vpop.f32.mrf.mxu0 }
 0x536   : > { %v1316_v8 = vpop.f32.mrf.mxu0 }
 0x54e   : > { %v1056_v9 = vpop.permute.xlu1 %1055 }
 0x54f   : > { %v1082_v12 = vsel %vm166_vm1, %v1489_v45, %v1056_v9 }
 0x556   : > { %v1060_v10 = vpop.permute.xlu1 %1059 }
 0x557   : > { %v1084_v13 = vsel %vm1083_vm4, %v1082_v12, %v1060_v10 }
 0x55e   : > { %v1064_v11 = vpop.permute.xlu0 %1063 }
 0x55f   : > { %v1086_v15 = vsel %vm1085_vm5, %v1084_v13, %v1064_v11 }
 0x58b   : > { %v1068_v18 = vpop.permute.xlu1 %1067 }
 0x58c   : > { %v1088_v17 = vsel %vm1087_vm6, %v1086_v15, %v1068_v18 }
 0x593   : > { %v1072_v14 = vpop.permute.xlu0 %1071 }
 0x594   : > { %v1090_v19 = vsel %vm1089_vm7, %v1088_v17, %v1072_v14 }
 0x59b   : > { %v1076_v16 = vpop.permute.xlu1 %1075 }
 0x59c   : > { %v1092_v20 = vsel %vm1091_vm8, %v1090_v19, %v1076_v16 }
 0x5a3   : > { %v1080_v21 = vpop.permute.xlu0 %1079 }
 0x5a4   : > { %v1094_v22 = vsel %vm1093_vm9, %v1092_v20, %v1080_v21 }
 0x5a5   : > { %1095 = vst [vmem:[%s158_s28] sm:$0xff] %v1094_v22 }
 0x5a6 PF: > { %s12_s9 = sadd.s32 1, %s1372_s9  }
 0x5a7   : > { %p9_p4 = scmp.ge.s32.totalorder %s12_s9, 4  }
 0x5a9   :  { %11 = sbr.rel (!%p9_p4) target bundleno = 1 (0x1), region = 61 }

</bundles_post_ra>
